<compile_context>
chip_gen: v7x
topology: tpu7x:2x2x1
jax: 0.10.0
libtpu: 0.0.40
codegen_flags: <defaults>
</compile_context>

<pallas_src>
import functools

import jax
import jax.numpy as jnp
from jax import lax
from jax.experimental import pallas as pl
from jax.experimental.pallas import tpu as pltpu

LEAKY_SLOPE = 0.2
BN_EPS = 1e-5


def _leaky(v):
    return jnp.where(v > 0, v, LEAKY_SLOPE * v)


# ----------------------------- Pallas kernel --------------------------------
#
# Flattened layout handed in by the wrapper (per image, Wp4 = W + 4):
#   xf[i * Wp4 + j, c] = x_pad2[i, j, c]   (x zero-padded by 2, plus slack rows)
# conv1 is evaluated over an extended (H+3, Wp4) domain; an interior mask
# zeroes the 1-pixel ring (== conv2's zero padding) and the junk columns that
# arise from row wrap-around.  conv2 then consumes that masked slab directly.

def _resblock_kernel(xf_ref, msk_ref, w1_ref, a1_ref, w2_ref, a2_ref, out_ref,
                     *, wp4):
    rows1 = msk_ref.shape[0]          # (H+3) * Wp4  -- conv1 extended domain
    rows2 = out_ref.shape[1]          # H * Wp4      -- conv2 domain
    c = xf_ref.shape[-1]

    xf = xf_ref[0]                    # (Lx, C) f32 (also residual source)
    xb = xf.astype(jnp.bfloat16)      # bf16 operand for the MXU

    # ---- conv1 (3x3, pad=1) + folded BN1 + LeakyReLU -----------------------
    acc1 = jnp.zeros((rows1, c), jnp.float32)
    for kh in range(3):
        for kw in range(3):
            off = kh * wp4 + kw
            acc1 = acc1 + jnp.dot(xb[off:off + rows1, :],
                                  w1_ref[kh * 3 + kw],
                                  preferred_element_type=jnp.float32)
    y = _leaky(acc1 * a1_ref[0] + a1_ref[1])
    # Zero the ring / wrap-around junk: this *is* conv2's zero padding.
    h = (y * msk_ref[...]).astype(jnp.bfloat16)          # (rows1, C) bf16

    # ---- conv2 (3x3, pad=1) + folded BN2 + residual + LeakyReLU ------------
    acc2 = jnp.zeros((rows2, c), jnp.float32)
    for kh in range(3):
        for kw in range(3):
            off = kh * wp4 + kw
            acc2 = acc2 + jnp.dot(h[off:off + rows2, :],
                                  w2_ref[kh * 3 + kw],
                                  preferred_element_type=jnp.float32)
    res = xf[2 * wp4 + 2: 2 * wp4 + 2 + rows2, :]        # original x (f32)
    out = _leaky(acc2 * a2_ref[0] + a2_ref[1] + res)
    out_ref[0] = out.astype(out_ref.dtype)


# ----------------------------- wrapper ---------------------------------------

@jax.jit
def residual_block_forward(x_nchw, folded):
    x = jnp.transpose(x_nchw, (0, 2, 3, 1)).astype(jnp.float32)   # NCHW -> NHWC
    n, h, w, c = x.shape
    wp4 = w + 4
    rows1 = (h + 3) * wp4          # conv1 extended-domain rows
    rows2 = h * wp4                # conv2 domain rows
    lx = (h + 6) * wp4             # flattened length (2-px pad + wrap slack)

    # zero-pad by 2 px, flatten spatial dims, append slack zero rows
    xpad = jnp.pad(x, ((0, 0), (2, 2), (2, 2), (0, 0)))
    xf = xpad.reshape(n, (h + 4) * wp4, c)
    xf = jnp.pad(xf, ((0, 0), (0, lx - (h + 4) * wp4), (0, 0)))

    # interior mask over the extended conv1 domain
    pi = jnp.arange(h + 3)[:, None]
    qi = jnp.arange(wp4)[None, :]
    msk = ((pi >= 1) & (pi <= h) & (qi >= 1) & (qi <= w)).astype(jnp.float32)
    msk = msk.reshape(rows1, 1)

    out = pl.pallas_call(
        functools.partial(_resblock_kernel, wp4=wp4),
        out_shape=jax.ShapeDtypeStruct((n, rows2, c), jnp.float32),
        grid_spec=pltpu.PrefetchScalarGridSpec(
            num_scalar_prefetch=0,
            grid=(n,),
            in_specs=[
                pl.BlockSpec((1, lx, c), lambda b: (b, 0, 0)),
                pl.BlockSpec((rows1, 1), lambda b: (0, 0)),
                pl.BlockSpec((9, c, c), lambda b: (0, 0, 0)),
                pl.BlockSpec((2, 1, c), lambda b: (0, 0, 0)),
                pl.BlockSpec((9, c, c), lambda b: (0, 0, 0)),
                pl.BlockSpec((2, 1, c), lambda b: (0, 0, 0)),
            ],
            out_specs=pl.BlockSpec((1, rows2, c), lambda b: (b, 0, 0)),
        ),
        compiler_params=pltpu.CompilerParams(
            dimension_semantics=("parallel",)),
    )(xf, msk, folded["w1"], folded["a1"], folded["w2"], folded["a2"])

    out = out.reshape(n, h, wp4, c)[:, :, :w, :]     # drop junk columns
    return jnp.transpose(out, (0, 3, 1, 2))          # back to NCHW


# ----------------------------- parameters ------------------------------------

def init_params(key, channels):
    c = channels
    ks = jax.random.split(key, 6)

    def conv_w(k):
        fan_in = 9 * c
        return jax.random.normal(k, (3, 3, c, c), jnp.float32) * (2.0 / fan_in) ** 0.5

    def bn_stats(k):
        kg, kb, km, kv = jax.random.split(k, 4)
        gamma = 1.0 + 0.1 * jax.random.normal(kg, (c,), jnp.float32)
        beta = 0.1 * jax.random.normal(kb, (c,), jnp.float32)
        mean = 0.1 * jax.random.normal(km, (c,), jnp.float32)
        var = 1.0 + 0.1 * jnp.abs(jax.random.normal(kv, (c,), jnp.float32))
        return gamma, beta, mean, var

    w1 = conv_w(ks[0]); b1 = 0.05 * jax.random.normal(ks[1], (c,), jnp.float32)
    w2 = conv_w(ks[2]); b2 = 0.05 * jax.random.normal(ks[3], (c,), jnp.float32)
    g1, be1, mu1, v1 = bn_stats(ks[4])
    g2, be2, mu2, v2 = bn_stats(ks[5])

    def fold(w, b, g, be, mu, var):
        s = g / jnp.sqrt(var + BN_EPS)
        t = be + (b - mu) * s                       # bias folded into shift
        wt = w.reshape(9, c, c).astype(jnp.bfloat16)  # tap-major, (cin, cout)
        return wt, jnp.stack([s, t]).reshape(2, 1, c).astype(jnp.float32)

    w1t, a1 = fold(w1, b1, g1, be1, mu1, v1)
    w2t, a2 = fold(w2, b2, g2, be2, mu2, v2)

    folded = dict(w1=w1t, a1=a1, w2=w2t, a2=a2)
    raw = dict(w1=w1, b1=b1, g1=g1, be1=be1, mu1=mu1, v1=v1,
               w2=w2, b2=b2, g2=g2, be2=be2, mu2=mu2, v2=v2)
    return folded, raw


# ----------------------------- pure-JAX reference ----------------------------

def reference_forward(x_nchw, raw):
    x = jnp.transpose(x_nchw, (0, 2, 3, 1)).astype(jnp.float32)

    def conv_bn(inp, w, b, g, be, mu, var):
        wb = w.astype(jnp.bfloat16).astype(jnp.float32)       # same bf16 rounding
        ib = inp.astype(jnp.bfloat16).astype(jnp.float32)
        z = lax.conv_general_dilated(
            ib, wb, window_strides=(1, 1), padding=((1, 1), (1, 1)),
            dimension_numbers=("NHWC", "HWIO", "NHWC"),
            precision=lax.Precision.HIGHEST) + b
        return (z - mu) / jnp.sqrt(var + BN_EPS) * g + be

    y = _leaky(conv_bn(x, raw["w1"], raw["b1"], raw["g1"], raw["be1"],
                       raw["mu1"], raw["v1"]))
    y = conv_bn(y, raw["w2"], raw["b2"], raw["g2"], raw["be2"],
                raw["mu2"], raw["v2"])
    y = _leaky(y + x)
    return jnp.transpose(y, (0, 3, 1, 2))


# ----------------------------- main -------------------------------------------

if __name__ == "__main__":
    root = jax.random.PRNGKey(0)
    pkey, xkey = jax.random.split(root)
    channels, H, W, batch = 128, 16, 16, 2

    folded, raw = init_params(pkey, channels)
    x = jax.random.normal(xkey, (batch, channels, H, W), jnp.float32)   # NCHW

    out = residual_block_forward(x, folded)
    jax.block_until_ready(out)
    assert out.shape == (batch, channels, H, W)

    ref = reference_forward(x, raw)
    err = float(jnp.max(jnp.abs(out - ref)))
    assert err < 5e-2, f"max abs error vs reference too large: {err}"

    print("KERNEL_OK")
</pallas_src>

<mosaic_0001>
module attributes {stable_mosaic.version = 11 : i64} {
  func.func @_resblock_kernel(%arg0: i32, %arg1: memref<1x440x128xf32, #tpu.memory_space<vmem>>, %arg2: memref<380x1xf32, #tpu.memory_space<vmem>>, %arg3: memref<9x128x128xbf16, #tpu.memory_space<vmem>>, %arg4: memref<2x1x128xf32, #tpu.memory_space<vmem>>, %arg5: memref<9x128x128xbf16, #tpu.memory_space<vmem>>, %arg6: memref<2x1x128xf32, #tpu.memory_space<vmem>>, %arg7: memref<1x320x128xf32, #tpu.memory_space<vmem>>) attributes {dimension_semantics = [#tpu.dimension_semantics<parallel>], iteration_bounds = array<i64: 2>, scalar_prefetch = 0 : i64, scratch_operands = 0 : i64, tpu.core_type = #tpu.core_type<tc>, window_params = [{transform_indices = @transform_0, window_bounds = array<i64: 1, 440, 128>}, {pipeline_mode = #tpu.pipeline_mode<synchronous>, transform_indices = @transform_1, window_bounds = array<i64: 380, 1>}, {pipeline_mode = #tpu.pipeline_mode<synchronous>, transform_indices = @transform_2, window_bounds = array<i64: 9, 128, 128>}, {pipeline_mode = #tpu.pipeline_mode<synchronous>, transform_indices = @transform_3, window_bounds = array<i64: 2, 1, 128>}, {pipeline_mode = #tpu.pipeline_mode<synchronous>, transform_indices = @transform_4, window_bounds = array<i64: 9, 128, 128>}, {pipeline_mode = #tpu.pipeline_mode<synchronous>, transform_indices = @transform_5, window_bounds = array<i64: 2, 1, 128>}, {transform_indices = @transform_6, window_bounds = array<i64: 1, 320, 128>}]} {
    %c0 = arith.constant 0 : index
    %c0_0 = arith.constant 0 : index
    %c0_1 = arith.constant 0 : index
    %0 = vector.load %arg1[%c0, %c0_0, %c0_1] : memref<1x440x128xf32, #tpu.memory_space<vmem>>, vector<1x440x128xf32>
    %1 = vector.shape_cast %0 : vector<1x440x128xf32> to vector<440x128xf32>
    %2 = arith.truncf %1 : vector<440x128xf32> to vector<440x128xbf16>
    %cst = arith.constant 0.000000e+00 : f32
    %3 = vector.broadcast %cst : f32 to vector<380x128xf32>
    %4 = vector.extract_strided_slice %2 {offsets = [0, 0], sizes = [380, 128], strides = [1, 1]} : vector<440x128xbf16> to vector<380x128xbf16>
    %c0_2 = arith.constant 0 : index
    %c0_3 = arith.constant 0 : index
    %c0_4 = arith.constant 0 : index
    %5 = vector.load %arg3[%c0_2, %c0_3, %c0_4] : memref<9x128x128xbf16, #tpu.memory_space<vmem>>, vector<1x128x128xbf16>
    %6 = vector.shape_cast %5 : vector<1x128x128xbf16> to vector<128x128xbf16>
    %cst_5 = arith.constant dense<0.000000e+00> : vector<380x128xf32>
    %7 = tpu.matmul %4, %6, %cst_5 {dimension_numbers = #tpu.dot_dimension_numbers<[1], [0], [0], [1], [0, 0, 1, 1], [], []>} : vector<380x128xbf16>, vector<128x128xbf16>, vector<380x128xf32> -> vector<380x128xf32>
    %8 = arith.addf %3, %7 : vector<380x128xf32>
    %9 = vector.extract_strided_slice %2 {offsets = [1, 0], sizes = [380, 128], strides = [1, 1]} : vector<440x128xbf16> to vector<380x128xbf16>
    %c1 = arith.constant 1 : index
    %c0_6 = arith.constant 0 : index
    %c0_7 = arith.constant 0 : index
    %10 = vector.load %arg3[%c1, %c0_6, %c0_7] : memref<9x128x128xbf16, #tpu.memory_space<vmem>>, vector<1x128x128xbf16>
    %11 = vector.shape_cast %10 : vector<1x128x128xbf16> to vector<128x128xbf16>
    %cst_8 = arith.constant dense<0.000000e+00> : vector<380x128xf32>
    %12 = tpu.matmul %9, %11, %cst_8 {dimension_numbers = #tpu.dot_dimension_numbers<[1], [0], [0], [1], [0, 0, 1, 1], [], []>} : vector<380x128xbf16>, vector<128x128xbf16>, vector<380x128xf32> -> vector<380x128xf32>
    %13 = arith.addf %8, %12 : vector<380x128xf32>
    %14 = vector.extract_strided_slice %2 {offsets = [2, 0], sizes = [380, 128], strides = [1, 1]} : vector<440x128xbf16> to vector<380x128xbf16>
    %c2 = arith.constant 2 : index
    %c0_9 = arith.constant 0 : index
    %c0_10 = arith.constant 0 : index
    %15 = vector.load %arg3[%c2, %c0_9, %c0_10] : memref<9x128x128xbf16, #tpu.memory_space<vmem>>, vector<1x128x128xbf16>
    %16 = vector.shape_cast %15 : vector<1x128x128xbf16> to vector<128x128xbf16>
    %cst_11 = arith.constant dense<0.000000e+00> : vector<380x128xf32>
    %17 = tpu.matmul %14, %16, %cst_11 {dimension_numbers = #tpu.dot_dimension_numbers<[1], [0], [0], [1], [0, 0, 1, 1], [], []>} : vector<380x128xbf16>, vector<128x128xbf16>, vector<380x128xf32> -> vector<380x128xf32>
    %18 = arith.addf %13, %17 : vector<380x128xf32>
    %19 = vector.extract_strided_slice %2 {offsets = [20, 0], sizes = [380, 128], strides = [1, 1]} : vector<440x128xbf16> to vector<380x128xbf16>
    %c3 = arith.constant 3 : index
    %c0_12 = arith.constant 0 : index
    %c0_13 = arith.constant 0 : index
    %20 = vector.load %arg3[%c3, %c0_12, %c0_13] : memref<9x128x128xbf16, #tpu.memory_space<vmem>>, vector<1x128x128xbf16>
    %21 = vector.shape_cast %20 : vector<1x128x128xbf16> to vector<128x128xbf16>
    %cst_14 = arith.constant dense<0.000000e+00> : vector<380x128xf32>
    %22 = tpu.matmul %19, %21, %cst_14 {dimension_numbers = #tpu.dot_dimension_numbers<[1], [0], [0], [1], [0, 0, 1, 1], [], []>} : vector<380x128xbf16>, vector<128x128xbf16>, vector<380x128xf32> -> vector<380x128xf32>
    %23 = arith.addf %18, %22 : vector<380x128xf32>
    %24 = vector.extract_strided_slice %2 {offsets = [21, 0], sizes = [380, 128], strides = [1, 1]} : vector<440x128xbf16> to vector<380x128xbf16>
    %c4 = arith.constant 4 : index
    %c0_15 = arith.constant 0 : index
    %c0_16 = arith.constant 0 : index
    %25 = vector.load %arg3[%c4, %c0_15, %c0_16] : memref<9x128x128xbf16, #tpu.memory_space<vmem>>, vector<1x128x128xbf16>
    %26 = vector.shape_cast %25 : vector<1x128x128xbf16> to vector<128x128xbf16>
    %cst_17 = arith.constant dense<0.000000e+00> : vector<380x128xf32>
    %27 = tpu.matmul %24, %26, %cst_17 {dimension_numbers = #tpu.dot_dimension_numbers<[1], [0], [0], [1], [0, 0, 1, 1], [], []>} : vector<380x128xbf16>, vector<128x128xbf16>, vector<380x128xf32> -> vector<380x128xf32>
    %28 = arith.addf %23, %27 : vector<380x128xf32>
    %29 = vector.extract_strided_slice %2 {offsets = [22, 0], sizes = [380, 128], strides = [1, 1]} : vector<440x128xbf16> to vector<380x128xbf16>
    %c5 = arith.constant 5 : index
    %c0_18 = arith.constant 0 : index
    %c0_19 = arith.constant 0 : index
    %30 = vector.load %arg3[%c5, %c0_18, %c0_19] : memref<9x128x128xbf16, #tpu.memory_space<vmem>>, vector<1x128x128xbf16>
    %31 = vector.shape_cast %30 : vector<1x128x128xbf16> to vector<128x128xbf16>
    %cst_20 = arith.constant dense<0.000000e+00> : vector<380x128xf32>
    %32 = tpu.matmul %29, %31, %cst_20 {dimension_numbers = #tpu.dot_dimension_numbers<[1], [0], [0], [1], [0, 0, 1, 1], [], []>} : vector<380x128xbf16>, vector<128x128xbf16>, vector<380x128xf32> -> vector<380x128xf32>
    %33 = arith.addf %28, %32 : vector<380x128xf32>
    %34 = vector.extract_strided_slice %2 {offsets = [40, 0], sizes = [380, 128], strides = [1, 1]} : vector<440x128xbf16> to vector<380x128xbf16>
    %c6 = arith.constant 6 : index
    %c0_21 = arith.constant 0 : index
    %c0_22 = arith.constant 0 : index
    %35 = vector.load %arg3[%c6, %c0_21, %c0_22] : memref<9x128x128xbf16, #tpu.memory_space<vmem>>, vector<1x128x128xbf16>
    %36 = vector.shape_cast %35 : vector<1x128x128xbf16> to vector<128x128xbf16>
    %cst_23 = arith.constant dense<0.000000e+00> : vector<380x128xf32>
    %37 = tpu.matmul %34, %36, %cst_23 {dimension_numbers = #tpu.dot_dimension_numbers<[1], [0], [0], [1], [0, 0, 1, 1], [], []>} : vector<380x128xbf16>, vector<128x128xbf16>, vector<380x128xf32> -> vector<380x128xf32>
    %38 = arith.addf %33, %37 : vector<380x128xf32>
    %39 = vector.extract_strided_slice %2 {offsets = [41, 0], sizes = [380, 128], strides = [1, 1]} : vector<440x128xbf16> to vector<380x128xbf16>
    %c7 = arith.constant 7 : index
    %c0_24 = arith.constant 0 : index
    %c0_25 = arith.constant 0 : index
    %40 = vector.load %arg3[%c7, %c0_24, %c0_25] : memref<9x128x128xbf16, #tpu.memory_space<vmem>>, vector<1x128x128xbf16>
    %41 = vector.shape_cast %40 : vector<1x128x128xbf16> to vector<128x128xbf16>
    %cst_26 = arith.constant dense<0.000000e+00> : vector<380x128xf32>
    %42 = tpu.matmul %39, %41, %cst_26 {dimension_numbers = #tpu.dot_dimension_numbers<[1], [0], [0], [1], [0, 0, 1, 1], [], []>} : vector<380x128xbf16>, vector<128x128xbf16>, vector<380x128xf32> -> vector<380x128xf32>
    %43 = arith.addf %38, %42 : vector<380x128xf32>
    %44 = vector.extract_strided_slice %2 {offsets = [42, 0], sizes = [380, 128], strides = [1, 1]} : vector<440x128xbf16> to vector<380x128xbf16>
    %c8 = arith.constant 8 : index
    %c0_27 = arith.constant 0 : index
    %c0_28 = arith.constant 0 : index
    %45 = vector.load %arg3[%c8, %c0_27, %c0_28] : memref<9x128x128xbf16, #tpu.memory_space<vmem>>, vector<1x128x128xbf16>
    %46 = vector.shape_cast %45 : vector<1x128x128xbf16> to vector<128x128xbf16>
    %cst_29 = arith.constant dense<0.000000e+00> : vector<380x128xf32>
    %47 = tpu.matmul %44, %46, %cst_29 {dimension_numbers = #tpu.dot_dimension_numbers<[1], [0], [0], [1], [0, 0, 1, 1], [], []>} : vector<380x128xbf16>, vector<128x128xbf16>, vector<380x128xf32> -> vector<380x128xf32>
    %48 = arith.addf %43, %47 : vector<380x128xf32>
    %c0_30 = arith.constant 0 : index
    %c0_31 = arith.constant 0 : index
    %c0_32 = arith.constant 0 : index
    %49 = vector.load %arg4[%c0_30, %c0_31, %c0_32] : memref<2x1x128xf32, #tpu.memory_space<vmem>>, vector<1x1x128xf32>
    %50 = vector.shape_cast %49 : vector<1x1x128xf32> to vector<1x128xf32>
    %51 = vector.broadcast %50 : vector<1x128xf32> to vector<380x128xf32>
    %52 = arith.mulf %48, %51 : vector<380x128xf32>
    %c1_33 = arith.constant 1 : index
    %c0_34 = arith.constant 0 : index
    %c0_35 = arith.constant 0 : index
    %53 = vector.load %arg4[%c1_33, %c0_34, %c0_35] : memref<2x1x128xf32, #tpu.memory_space<vmem>>, vector<1x1x128xf32>
    %54 = vector.shape_cast %53 : vector<1x1x128xf32> to vector<1x128xf32>
    %55 = vector.broadcast %54 : vector<1x128xf32> to vector<380x128xf32>
    %56 = arith.addf %52, %55 : vector<380x128xf32>
    %cst_36 = arith.constant 0.000000e+00 : f32
    %57 = vector.broadcast %cst_36 : f32 to vector<380x128xf32>
    %58 = arith.cmpf ogt, %56, %57 : vector<380x128xf32>
    %cst_37 = arith.constant 2.000000e-01 : f32
    %59 = vector.broadcast %cst_37 : f32 to vector<380x128xf32>
    %60 = arith.mulf %59, %56 : vector<380x128xf32>
    %61 = arith.select %58, %56, %60 : vector<380x128xi1>, vector<380x128xf32>
    %c0_38 = arith.constant 0 : index
    %c0_39 = arith.constant 0 : index
    %62 = vector.load %arg2[%c0_38, %c0_39] : memref<380x1xf32, #tpu.memory_space<vmem>>, vector<380x1xf32>
    %63 = vector.broadcast %62 : vector<380x1xf32> to vector<380x128xf32>
    %64 = arith.mulf %61, %63 : vector<380x128xf32>
    %65 = arith.truncf %64 : vector<380x128xf32> to vector<380x128xbf16>
    %cst_40 = arith.constant 0.000000e+00 : f32
    %66 = vector.broadcast %cst_40 : f32 to vector<320x128xf32>
    %67 = vector.extract_strided_slice %65 {offsets = [0, 0], sizes = [320, 128], strides = [1, 1]} : vector<380x128xbf16> to vector<320x128xbf16>
    %c0_41 = arith.constant 0 : index
    %c0_42 = arith.constant 0 : index
    %c0_43 = arith.constant 0 : index
    %68 = vector.load %arg5[%c0_41, %c0_42, %c0_43] : memref<9x128x128xbf16, #tpu.memory_space<vmem>>, vector<1x128x128xbf16>
    %69 = vector.shape_cast %68 : vector<1x128x128xbf16> to vector<128x128xbf16>
    %cst_44 = arith.constant dense<0.000000e+00> : vector<320x128xf32>
    %70 = tpu.matmul %67, %69, %cst_44 {dimension_numbers = #tpu.dot_dimension_numbers<[1], [0], [0], [1], [0, 0, 1, 1], [], []>} : vector<320x128xbf16>, vector<128x128xbf16>, vector<320x128xf32> -> vector<320x128xf32>
    %71 = arith.addf %66, %70 : vector<320x128xf32>
    %72 = vector.extract_strided_slice %65 {offsets = [1, 0], sizes = [320, 128], strides = [1, 1]} : vector<380x128xbf16> to vector<320x128xbf16>
    %c1_45 = arith.constant 1 : index
    %c0_46 = arith.constant 0 : index
    %c0_47 = arith.constant 0 : index
    %73 = vector.load %arg5[%c1_45, %c0_46, %c0_47] : memref<9x128x128xbf16, #tpu.memory_space<vmem>>, vector<1x128x128xbf16>
    %74 = vector.shape_cast %73 : vector<1x128x128xbf16> to vector<128x128xbf16>
    %cst_48 = arith.constant dense<0.000000e+00> : vector<320x128xf32>
    %75 = tpu.matmul %72, %74, %cst_48 {dimension_numbers = #tpu.dot_dimension_numbers<[1], [0], [0], [1], [0, 0, 1, 1], [], []>} : vector<320x128xbf16>, vector<128x128xbf16>, vector<320x128xf32> -> vector<320x128xf32>
    %76 = arith.addf %71, %75 : vector<320x128xf32>
    %77 = vector.extract_strided_slice %65 {offsets = [2, 0], sizes = [320, 128], strides = [1, 1]} : vector<380x128xbf16> to vector<320x128xbf16>
    %c2_49 = arith.constant 2 : index
    %c0_50 = arith.constant 0 : index
    %c0_51 = arith.constant 0 : index
    %78 = vector.load %arg5[%c2_49, %c0_50, %c0_51] : memref<9x128x128xbf16, #tpu.memory_space<vmem>>, vector<1x128x128xbf16>
    %79 = vector.shape_cast %78 : vector<1x128x128xbf16> to vector<128x128xbf16>
    %cst_52 = arith.constant dense<0.000000e+00> : vector<320x128xf32>
    %80 = tpu.matmul %77, %79, %cst_52 {dimension_numbers = #tpu.dot_dimension_numbers<[1], [0], [0], [1], [0, 0, 1, 1], [], []>} : vector<320x128xbf16>, vector<128x128xbf16>, vector<320x128xf32> -> vector<320x128xf32>
    %81 = arith.addf %76, %80 : vector<320x128xf32>
    %82 = vector.extract_strided_slice %65 {offsets = [20, 0], sizes = [320, 128], strides = [1, 1]} : vector<380x128xbf16> to vector<320x128xbf16>
    %c3_53 = arith.constant 3 : index
    %c0_54 = arith.constant 0 : index
    %c0_55 = arith.constant 0 : index
    %83 = vector.load %arg5[%c3_53, %c0_54, %c0_55] : memref<9x128x128xbf16, #tpu.memory_space<vmem>>, vector<1x128x128xbf16>
    %84 = vector.shape_cast %83 : vector<1x128x128xbf16> to vector<128x128xbf16>
    %cst_56 = arith.constant dense<0.000000e+00> : vector<320x128xf32>
    %85 = tpu.matmul %82, %84, %cst_56 {dimension_numbers = #tpu.dot_dimension_numbers<[1], [0], [0], [1], [0, 0, 1, 1], [], []>} : vector<320x128xbf16>, vector<128x128xbf16>, vector<320x128xf32> -> vector<320x128xf32>
    %86 = arith.addf %81, %85 : vector<320x128xf32>
    %87 = vector.extract_strided_slice %65 {offsets = [21, 0], sizes = [320, 128], strides = [1, 1]} : vector<380x128xbf16> to vector<320x128xbf16>
    %c4_57 = arith.constant 4 : index
    %c0_58 = arith.constant 0 : index
    %c0_59 = arith.constant 0 : index
    %88 = vector.load %arg5[%c4_57, %c0_58, %c0_59] : memref<9x128x128xbf16, #tpu.memory_space<vmem>>, vector<1x128x128xbf16>
    %89 = vector.shape_cast %88 : vector<1x128x128xbf16> to vector<128x128xbf16>
    %cst_60 = arith.constant dense<0.000000e+00> : vector<320x128xf32>
    %90 = tpu.matmul %87, %89, %cst_60 {dimension_numbers = #tpu.dot_dimension_numbers<[1], [0], [0], [1], [0, 0, 1, 1], [], []>} : vector<320x128xbf16>, vector<128x128xbf16>, vector<320x128xf32> -> vector<320x128xf32>
    %91 = arith.addf %86, %90 : vector<320x128xf32>
    %92 = vector.extract_strided_slice %65 {offsets = [22, 0], sizes = [320, 128], strides = [1, 1]} : vector<380x128xbf16> to vector<320x128xbf16>
    %c5_61 = arith.constant 5 : index
    %c0_62 = arith.constant 0 : index
    %c0_63 = arith.constant 0 : index
    %93 = vector.load %arg5[%c5_61, %c0_62, %c0_63] : memref<9x128x128xbf16, #tpu.memory_space<vmem>>, vector<1x128x128xbf16>
    %94 = vector.shape_cast %93 : vector<1x128x128xbf16> to vector<128x128xbf16>
    %cst_64 = arith.constant dense<0.000000e+00> : vector<320x128xf32>
    %95 = tpu.matmul %92, %94, %cst_64 {dimension_numbers = #tpu.dot_dimension_numbers<[1], [0], [0], [1], [0, 0, 1, 1], [], []>} : vector<320x128xbf16>, vector<128x128xbf16>, vector<320x128xf32> -> vector<320x128xf32>
    %96 = arith.addf %91, %95 : vector<320x128xf32>
    %97 = vector.extract_strided_slice %65 {offsets = [40, 0], sizes = [320, 128], strides = [1, 1]} : vector<380x128xbf16> to vector<320x128xbf16>
    %c6_65 = arith.constant 6 : index
    %c0_66 = arith.constant 0 : index
    %c0_67 = arith.constant 0 : index
    %98 = vector.load %arg5[%c6_65, %c0_66, %c0_67] : memref<9x128x128xbf16, #tpu.memory_space<vmem>>, vector<1x128x128xbf16>
    %99 = vector.shape_cast %98 : vector<1x128x128xbf16> to vector<128x128xbf16>
    %cst_68 = arith.constant dense<0.000000e+00> : vector<320x128xf32>
    %100 = tpu.matmul %97, %99, %cst_68 {dimension_numbers = #tpu.dot_dimension_numbers<[1], [0], [0], [1], [0, 0, 1, 1], [], []>} : vector<320x128xbf16>, vector<128x128xbf16>, vector<320x128xf32> -> vector<320x128xf32>
    %101 = arith.addf %96, %100 : vector<320x128xf32>
    %102 = vector.extract_strided_slice %65 {offsets = [41, 0], sizes = [320, 128], strides = [1, 1]} : vector<380x128xbf16> to vector<320x128xbf16>
    %c7_69 = arith.constant 7 : index
    %c0_70 = arith.constant 0 : index
    %c0_71 = arith.constant 0 : index
    %103 = vector.load %arg5[%c7_69, %c0_70, %c0_71] : memref<9x128x128xbf16, #tpu.memory_space<vmem>>, vector<1x128x128xbf16>
    %104 = vector.shape_cast %103 : vector<1x128x128xbf16> to vector<128x128xbf16>
    %cst_72 = arith.constant dense<0.000000e+00> : vector<320x128xf32>
    %105 = tpu.matmul %102, %104, %cst_72 {dimension_numbers = #tpu.dot_dimension_numbers<[1], [0], [0], [1], [0, 0, 1, 1], [], []>} : vector<320x128xbf16>, vector<128x128xbf16>, vector<320x128xf32> -> vector<320x128xf32>
    %106 = arith.addf %101, %105 : vector<320x128xf32>
    %107 = vector.extract_strided_slice %65 {offsets = [42, 0], sizes = [320, 128], strides = [1, 1]} : vector<380x128xbf16> to vector<320x128xbf16>
    %c8_73 = arith.constant 8 : index
    %c0_74 = arith.constant 0 : index
    %c0_75 = arith.constant 0 : index
    %108 = vector.load %arg5[%c8_73, %c0_74, %c0_75] : memref<9x128x128xbf16, #tpu.memory_space<vmem>>, vector<1x128x128xbf16>
    %109 = vector.shape_cast %108 : vector<1x128x128xbf16> to vector<128x128xbf16>
    %cst_76 = arith.constant dense<0.000000e+00> : vector<320x128xf32>
    %110 = tpu.matmul %107, %109, %cst_76 {dimension_numbers = #tpu.dot_dimension_numbers<[1], [0], [0], [1], [0, 0, 1, 1], [], []>} : vector<320x128xbf16>, vector<128x128xbf16>, vector<320x128xf32> -> vector<320x128xf32>
    %111 = arith.addf %106, %110 : vector<320x128xf32>
    %112 = vector.extract_strided_slice %1 {offsets = [42, 0], sizes = [320, 128], strides = [1, 1]} : vector<440x128xf32> to vector<320x128xf32>
    %c0_77 = arith.constant 0 : index
    %c0_78 = arith.constant 0 : index
    %c0_79 = arith.constant 0 : index
    %113 = vector.load %arg6[%c0_77, %c0_78, %c0_79] : memref<2x1x128xf32, #tpu.memory_space<vmem>>, vector<1x1x128xf32>
    %114 = vector.shape_cast %113 : vector<1x1x128xf32> to vector<1x128xf32>
    %115 = vector.broadcast %114 : vector<1x128xf32> to vector<320x128xf32>
    %116 = arith.mulf %111, %115 : vector<320x128xf32>
    %c1_80 = arith.constant 1 : index
    %c0_81 = arith.constant 0 : index
    %c0_82 = arith.constant 0 : index
    %117 = vector.load %arg6[%c1_80, %c0_81, %c0_82] : memref<2x1x128xf32, #tpu.memory_space<vmem>>, vector<1x1x128xf32>
    %118 = vector.shape_cast %117 : vector<1x1x128xf32> to vector<1x128xf32>
    %119 = vector.broadcast %118 : vector<1x128xf32> to vector<320x128xf32>
    %120 = arith.addf %116, %119 : vector<320x128xf32>
    %121 = arith.addf %120, %112 : vector<320x128xf32>
    %cst_83 = arith.constant 0.000000e+00 : f32
    %122 = vector.broadcast %cst_83 : f32 to vector<320x128xf32>
    %123 = arith.cmpf ogt, %121, %122 : vector<320x128xf32>
    %cst_84 = arith.constant 2.000000e-01 : f32
    %124 = vector.broadcast %cst_84 : f32 to vector<320x128xf32>
    %125 = arith.mulf %124, %121 : vector<320x128xf32>
    %126 = arith.select %123, %121, %125 : vector<320x128xi1>, vector<320x128xf32>
    %c0_85 = arith.constant 0 : index
    %c0_86 = arith.constant 0 : index
    %c0_87 = arith.constant 0 : index
    %127 = vector.load %arg7[%c0_85, %c0_86, %c0_87] : memref<1x320x128xf32, #tpu.memory_space<vmem>>, vector<1x320x128xf32>
    %128 = vector.shape_cast %127 : vector<1x320x128xf32> to vector<320x128xf32>
    %129 = vector.shape_cast %126 : vector<320x128xf32> to vector<1x320x128xf32>
    tpu.vector_store %arg7[%c0_85, %c0_86, %c0_87], %129 {strides = array<i32>} : memref<1x320x128xf32, #tpu.memory_space<vmem>>, vector<1x320x128xf32>,
    return
  }
  func.func @transform_0(%arg0: i32) -> (i32, i32, i32) {
    %c0_i32 = arith.constant 0 : i32
    %c0_i32_0 = arith.constant 0 : i32
    %c0_i32_1 = arith.constant 0 : i32
    return %arg0, %c0_i32, %c0_i32_0 : i32, i32, i32
  }
  func.func @transform_1(%arg0: i32) -> (i32, i32) {
    %c0_i32 = arith.constant 0 : i32
    %c0_i32_0 = arith.constant 0 : i32
    %c0_i32_1 = arith.constant 0 : i32
    return %c0_i32, %c0_i32_0 : i32, i32
  }
  func.func @transform_2(%arg0: i32) -> (i32, i32, i32) {
    %c0_i32 = arith.constant 0 : i32
    %c0_i32_0 = arith.constant 0 : i32
    %c0_i32_1 = arith.constant 0 : i32
    %c0_i32_2 = arith.constant 0 : i32
    return %c0_i32, %c0_i32_0, %c0_i32_1 : i32, i32, i32
  }
  func.func @transform_3(%arg0: i32) -> (i32, i32, i32) {
    %c0_i32 = arith.constant 0 : i32
    %c0_i32_0 = arith.constant 0 : i32
    %c0_i32_1 = arith.constant 0 : i32
    %c0_i32_2 = arith.constant 0 : i32
    return %c0_i32, %c0_i32_0, %c0_i32_1 : i32, i32, i32
  }
  func.func @transform_4(%arg0: i32) -> (i32, i32, i32) {
    %c0_i32 = arith.constant 0 : i32
    %c0_i32_0 = arith.constant 0 : i32
    %c0_i32_1 = arith.constant 0 : i32
    %c0_i32_2 = arith.constant 0 : i32
    return %c0_i32, %c0_i32_0, %c0_i32_1 : i32, i32, i32
  }
  func.func @transform_5(%arg0: i32) -> (i32, i32, i32) {
    %c0_i32 = arith.constant 0 : i32
    %c0_i32_0 = arith.constant 0 : i32
    %c0_i32_1 = arith.constant 0 : i32
    %c0_i32_2 = arith.constant 0 : i32
    return %c0_i32, %c0_i32_0, %c0_i32_1 : i32, i32, i32
  }
  func.func @transform_6(%arg0: i32) -> (i32, i32, i32) {
    %c0_i32 = arith.constant 0 : i32
    %c0_i32_0 = arith.constant 0 : i32
    %c0_i32_1 = arith.constant 0 : i32
    return %arg0, %c0_i32, %c0_i32_0 : i32, i32, i32
  }
}

</mosaic_0001>

<bundles_post_ra>
// kernel: residual_block_forward.1
= control target key start
LH: loop header
LB: loop body
LE: loop exit
PB: predicated region body
PF: predicated region fallthrough
CT: control target
= control target key end

     0   :  { %s11546_s21 = smov 0   ;;  %s14259_s0 = inlined_call_operand.vmem [shape: f32[2,440,128], index: 0, kind: input, shape index: {}]   ;;  %s14260_s1 = inlined_call_operand.vmem [shape: f32[380,1], index: 1, kind: input, shape index: {}]   ;;  %s14261_s2 = inlined_call_operand.vmem [shape: bf16[9,128,128], index: 2, kind: input, shape index: {}]   ;;  %s14262_s3 = inlined_call_operand.vmem [shape: f32[2,1,128], index: 3, kind: input, shape index: {}]   ;;  %s14263_s4 = inlined_call_operand.vmem [shape: bf16[9,128,128], index: 4, kind: input, shape index: {}]   ;;  %s14264_s5 = inlined_call_operand.vmem [shape: f32[2,1,128], index: 5, kind: input, shape index: {}]   ;;  %s14265_s6 = inlined_call_operand.vmem [shape: f32[2,320,128], index: 6, kind: output, shape index: {}]  }
   0x1 LB: > { %s8551_s22 = sadd.s32 4294967295, %s11508_s21   ;;  %p8555_p0 = scmp.ge.s32.totalorder %s11508_s21, 1  ;;  %s11508_s21 = sphi %s11546_s21, %s16_s21  }
   0x2   : > { %p212_p1 = scmp.lt.s32.totalorder %s11508_s21, 3 }
   0x4   : > { %p213_p2 = pnand %p8555_p0, %p212_p1 }
   0x6   : > { %216 = sbr.rel (%p213_p2) target bundleno = 1992 (0x7c8), region = 44 }
   0xd   : > { %v11317_v0 = vld [vmem:[%s14261_s2 + $0x40] sm:$0xff]   ;;  %p242_p3 = scmp.lt.s32.totalorder %s8551_s22, 1  ;;  %v11318_v1 = vld [vmem:[%s14261_s2 + $0x48] sm:$0xff]   ;;  %v11319_v2 = vld [vmem:[%s14261_s2 + $0x50] sm:$0xff]   ;;  %vm367_vm0 = vsmask.f32 7424 }
   0xe   : > { %9506 = vmatprep.subr.bf16.mxu0 %v11317_v0  ;;  %v11320_v3 = vld [vmem:[%s14261_s2 + $0x58] sm:$0xff]   ;;  %v11321_v12 = vld [vmem:[%s14261_s2 + $0x60] sm:$0xff]   ;;  %v11322_v19 = vld [vmem:[%s14261_s2 + $0x68] sm:$0xff]   ;;  %vm1166_vm1 = vcmask 1046528   ;;  %vm1573_vm2 = vcmask 1045504   ;;  %vm2444_vm4 = vcmask 1044480  }
   0xf   : > { %s14534_s22 = smov (!%p242_p3, %s8551_s22), 1  ;;  %9507 = vmatpush3.bf16.msra.mxu0 %v11317_v0  ;;  %v11323_v28 = vld [vmem:[%s14261_s2 + $0x70] sm:$0xff]   ;;  %v11324_v33 = vld [vmem:[%s14261_s2 + $0x78] sm:$0xff]   ;;  %v11325_v56 = vld [vmem:[%s14261_s2] sm:$0xff]   ;;  %vm1979_vm3 = vsmask.f32 5376 }
  0x10   : > { %9508 = vmatprep.subr.bf16.mxu0 %v11318_v1  ;;  %s11304_s29 = smul.u32 440, %s14534_s22  ;;  %vm3726_vm5 = vcmask 1042432   ;;  %vm2853_vm6 = vcmask 1043456   ;;  %vm3261_vm7 = vsmask.f32 3328 }
  0x11   : > { %s11305_s13 = smul.u32 320, %s14534_s22 }
  0x12   : > { %s11569_s8 = scalar_lea.vmem %s14259_s0, %s11304_s29 }
  0x13   : > { %9509 = vmatpush3.bf16.msra.mxu0 %v11318_v1  ;;  %v253_v4 = vld [vmem:[%s11569_s8] sm:$0xff]  ;;  %v254_v5 = vld [vmem:[%s11569_s8 + $0x8] sm:$0xff]  ;;  %v255_v6 = vld [vmem:[%s11569_s8 + $0x10] sm:$0xff]  ;;  %s13914_s15 = scalar_lea.vmem %s14265_s6, %s11305_s13 }
  0x14   : > { %9510 = vmatprep.subr.bf16.mxu0 %v11319_v2  ;;  %v256_v7 = vld [vmem:[%s11569_s8 + $0x18] sm:$0xff]  ;;  %v11578_v8 = vpack.c.bf16 %v254_v5, %v253_v4  ;;  %v257_v17 = vld [vmem:[%s11569_s8 + $0x20] sm:$0xff]  ;;  %v258_v18 = vld [vmem:[%s11569_s8 + $0x28] sm:$0xff] }
  0x15   : > { %v11580_v9 = vpack.c.bf16 %v256_v7, %v255_v6  ;;  %v259_v21 = vld [vmem:[%s11569_s8 + $0x30] sm:$0xff]  ;;  %v260_v22 = vld [vmem:[%s11569_s8 + $0x38] sm:$0xff]  ;;  %v11598_v23 = vpack.c.bf16 %v258_v18, %v257_v17  ;;  %v261_v24 = vld [vmem:[%s11569_s8 + $0x40] sm:$0xff] }
  0x16   : > { %v369_v10 = vshrl.u32 %v11578_v8, 16  ;;  %v371_v11 = vshll.u32 %v11578_v8, 16  ;;  %v262_v25 = vld [vmem:[%s11569_s8 + $0x48] sm:$0xff]  ;;  %v263_v26 = vld [vmem:[%s11569_s8 + $0x50] sm:$0xff]  ;;  %v264_v27 = vld [vmem:[%s11569_s8 + $0x58] sm:$0xff]  ;;  %v11607_v29 = vpack.c.bf16 %v260_v22, %v259_v21 }
  0x17   : > { %9511 = vmatpush3.bf16.msra.mxu0 %v11319_v2  ;;  %v14266_v13 = vshll.u32 %v11580_v9, 16  ;;  %14358 = vst [vmem:[#allocation2_spill] sm:$0xff] %v11598_v23  ;;  %v11609_v30 = vpack.c.bf16 %v262_v25, %v261_v24  ;;  %v265_v31 = vld [vmem:[%s11569_s8 + $0x60] sm:$0xff]  ;;  %v266_v32 = vld [vmem:[%s11569_s8 + $0x68] sm:$0xff]  ;;  %v11617_v34 = vshll.u32 %v11598_v23, 16  ;;  %v11619_v35 = vpack.c.bf16 %v264_v27, %v263_v26  ;;  %v267_v36 = vld [vmem:[%s11569_s8 + $0x70] sm:$0xff] }
  0x18   : > { %9512 = vmatprep.subr.bf16.mxu0 %v11320_v3  ;;  %v373_v14 = vrot.slane %v371_v11, 1  ;;  %14359 = vst [vmem:[#allocation3_spill] sm:$0xff] %v11607_v29  ;;  %v268_v37 = vld [vmem:[%s11569_s8 + $0x78] sm:$0xff]  ;;  %v14267_v38 = vshrl.u32 %v11580_v9, 16  ;;  %v269_v39 = vld [vmem:[%s11569_s8 + $0x80] sm:$0xff]  ;;  %v11626_v40 = vshrl.u32 %v11598_v23, 16  ;;  %v11631_v42 = vpack.c.bf16 %v266_v32, %v265_v31 }
  0x19   : > { %v378_v15 = vrot.slane %v14266_v13, 1  ;;  %v11629_v41 = vshll.u32 %v11607_v29, 16  ;;  %v270_v43 = vld [vmem:[%s11569_s8 + $0x88] sm:$0xff]  ;;  %v271_v44 = vld [vmem:[%s11569_s8 + $0x90] sm:$0xff]  ;;  %v272_v45 = vld [vmem:[%s11569_s8 + $0x98] sm:$0xff]  ;;  %v11637_v46 = vshll.u32 %v11609_v30, 16  ;;  %v11643_v49 = vpack.c.bf16 %v268_v37, %v267_v36 }
  0x1a   : > { %v374_v16 = vor.u32 %v373_v14, %v369_v10  ;;  %14360 = vst [vmem:[#allocation4_spill] sm:$0xff] %v11626_v40  ;;  %v386_v47 = vrot.slane %v11617_v34, 1  ;;  %v11641_v48 = vshll.u32 %v11619_v35, 16  ;;  %v11648_v51 = vshrl.u32 %v11607_v29, 16  ;;  %v273_v54 = vld [vmem:[%s11569_s8 + $0xa0] sm:$0xff]  ;;  %v274_v55 = vld [vmem:[%s11569_s8 + $0xa8] sm:$0xff] }
  0x1b   : > { %9513 = vmatpush3.bf16.msra.mxu0 %v11320_v3  ;;  %v382_v50 = vor.u32 %v14267_v38, %v378_v15  ;;  %v11650_v52 = vpack.c.bf16 %v270_v43, %v269_v39  ;;  %v11652_v53 = vpack.c.bf16 %v272_v45, %v271_v44  ;;  %v394_v58 = vrot.slane %v11629_v41, 1  ;;  %v275_v61 = vld [vmem:[%s11569_s8 + $0xb0] sm:$0xff]  ;;  %v276_v0 = vld [vmem:[%s11569_s8 + $0xb8] sm:$0xff]  ;;  %v277_v1 = vld [vmem:[%s11569_s8 + $0xc0] sm:$0xff] }
  0x1c   : > { %9514 = vmatprep.subr.bf16.mxu0 %v11321_v12  ;;  %v379_v20 = vsel %vm367_vm0, %v374_v16, %v378_v15  ;;  %v390_v57 = vor.u32 %v11626_v40, %v386_v47  ;;  %v11662_v59 = vshrl.u32 %v11609_v30, 16  ;;  %v11665_v60 = vshll.u32 %v11631_v42, 16  ;;  %v11326_v2 = vld [vmem:[%s14261_s2 + $0x8] sm:$0xff]   ;;  %v279_v7 = vld [vmem:[%s11569_s8 + $0xd0] sm:$0xff]  ;;  %v280_v14 = vld [vmem:[%s11569_s8 + $0xd8] sm:$0xff] }
  0x1d   : > { %9522 = vmatprep.mubr.bf16.mxu0 %v379_v20  ;;  %v402_v62 = vrot.slane %v11637_v46, 1  ;;  %v11670_v63 = vshrl.u32 %v11619_v35, 16  ;;  %v410_v3 = vrot.slane %v11641_v48, 1  ;;  %v11679_v4 = vshll.u32 %v11643_v49, 16  ;;  %v278_v6 = vld [vmem:[%s11569_s8 + $0xc8] sm:$0xff]  ;;  %v281_v15 = vld [vmem:[%s11569_s8 + $0xe0] sm:$0xff] }
  0x1e   : > { %v11681_v5 = vpack.c.bf16 %v274_v55, %v273_v54  ;;  %v387_v10 = vsel %vm367_vm0, %v382_v50, %v386_v47  ;;  %v11687_v11 = vshll.u32 %v11650_v52, 16  ;;  %v395_v16 = vsel %vm367_vm0, %v390_v57, %v394_v58  ;;  %v283_v20 = vld [vmem:[%s11569_s8 + $0xf0] sm:$0xff]  ;;  %v284_v25 = vld [vmem:[%s11569_s8 + $0xf8] sm:$0xff]  ;;  %v285_v50 = vld [vmem:[%s11569_s8 + $0x100] sm:$0xff] }
  0x1f   : > { %9515 = vmatpush3.bf16.msra.mxu0 %v11321_v12  ;;  %v11690_v12 = vshll.u32 %v11652_v53, 16  ;;  %v418_v17 = vrot.slane %v11665_v60, 1  ;;  %v11697_v18 = vshrl.u32 %v11631_v42, 16  ;;  %v398_v21 = vor.u32 %v11648_v51, %v394_v58  ;;  %v287_v57 = vld [vmem:[%s11569_s8 + $0x110] sm:$0xff]  ;;  %v289_v36 = vld [vmem:[%s11569_s8 + $0x120] sm:$0xff]  ;;  %v290_v32 = vld [vmem:[%s11569_s8 + $0x128] sm:$0xff] }
  0x20   : > { %9516 = vmatprep.subr.bf16.mxu0 %v11322_v19  ;;  %v11703_v22 = vshrl.u32 %v11643_v49, 16  ;;  %v11705_v24 = vpack.c.bf16 %v276_v0, %v275_v61  ;;  %v426_v26 = vrot.slane %v11679_v4, 1  ;;  %v11710_v27 = vshrl.u32 %v11650_v52, 16  ;;  %v11328_v61 = vld [vmem:[%s14261_s2 + $0x18] sm:$0xff]  }
  0x21   : > { %14361 = vst [vmem:[#allocation5_spill] sm:$0xff] %v11690_v12  ;;  %v11715_v31 = vpack.c.bf16 %v278_v6, %v277_v1  ;;  %v11723_v37 = vshrl.u32 %v11652_v53, 16  ;;  %v11725_v39 = vpack.c.bf16 %v280_v14, %v279_v7  ;;  %v406_v43 = vor.u32 %v11662_v59, %v402_v62  ;;  %v288_v7 = vld [vmem:[%s11569_s8 + $0x118] sm:$0xff] }
  0x22   : > { %v11729_v44 = vshrl.u32 %v11681_v5, 16  ;;  %v11733_v47 = vpack.c.bf16 %v284_v25, %v283_v20  ;;  %v11737_v54 = vshll.u32 %v11705_v24, 16  ;;  %v11740_v55 = vshrl.u32 %v11705_v24, 16 }
  0x23   : > { %9517 = vmatpush3.bf16.msra.mxu0 %v11322_v19  ;;  %v282_v19 = vld [vmem:[%s11569_s8 + $0xe8] sm:$0xff]  ;;  %14363 = vst [vmem:[#allocation7_spill] sm:$0xff] %v11723_v37  ;;  %v11749_v0 = vshll.u32 %v11715_v31, 16  ;;  %v403_v1 = vsel %vm367_vm0, %v398_v21, %v402_v62  ;;  %v11753_v6 = vshll.u32 %v11725_v39, 16  ;;  %v11773_v20 = vshrl.u32 %v11725_v39, 16  ;;  %v11329_v21 = vld [vmem:[%s14261_s2 + $0x20] sm:$0xff]  }
  0x24   : > { %9518 = vmatprep.subr.bf16.mxu0 %v11323_v28  ;;  %14364 = vst [vmem:[#allocation8_spill] sm:$0xff] %v11729_v44  ;;  %v11731_v45 = vpack.c.bf16 %v282_v19, %v281_v15  ;;  %14365 = vst [vmem:[#allocation9_spill] sm:$0xff] %v11737_v54  ;;  %v11763_v15 = vshll.u32 %v11733_v47, 16  ;;  %v458_v62 = vrot.slane %v11737_v54, 1  ;;  %v11778_v25 = vpack.c.bf16 %v288_v7, %v287_v57 }
  0x25   : > { %14366 = vst [vmem:[#allocation10_spill] sm:$0xff] %v11740_v55  ;;  %14367 = vst [vmem:[#allocation11_spill] sm:$0xff] %v11749_v0  ;;  %v466_v19 = vrot.slane %v11749_v0, 1  ;;  %v11331_v0 = vld [vmem:[%s14261_s2 + $0x30] sm:$0xff]   ;;  %v14380_v54 = vrot.slane %v11690_v12, 1 }
  0x26   : > { %14368 = vst [vmem:[#allocation12_spill] sm:$0xff] %v11753_v6  ;;  %v11760_v14 = vshll.u32 %v11731_v45, 16  ;;  %14370 = vst [vmem:[#allocation14_spill] sm:$0xff] %v11763_v15  ;;  %v11805_v38 = vshll.u32 %v11778_v25, 16 }
  0x27   : > { %9519 = vmatpush3.bf16.msra.mxu0 %v11323_v28  ;;  %v11713_v28 = vshll.u32 %v11681_v5, 16  ;;  %14372 = vst [vmem:[#allocation16_spill] sm:$0xff] %v11773_v20 }
  0x28   : > { %9520 = vmatprep.subr.bf16.mxu0 %v11324_v33  ;;  %14369 = vst [vmem:[#allocation13_spill] sm:$0xff] %v11760_v14  ;;  %v482_v57 = vrot.slane %v11760_v14, 1  ;;  %14376 = vst [vmem:[#allocation20_spill] sm:$0xff] %v11805_v38 }
  0x29   : > { %14362 = vst [vmem:[#allocation6_spill] sm:$0xff] %v11713_v28 }
  0x2b   : > { %9521 = vmatpush3.bf16.msra.mxu0 %v11324_v33  ;;  %v11327_v33 = vld [vmem:[%s14261_s2 + $0x10] sm:$0xff]  }
  0x2c   : > { %9570 = vmatprep.subr.bf16.mxu0 %v11325_v56 }
  0x2e   : > { %9523 = vmatmul.mubr.bf16.vlgmr.msra.gmra.mrb[0].mxu0 %v387_v10  ;;  %v411_v10 = vsel %vm367_vm0, %v406_v43, %v410_v3  ;;  %v414_v43 = vor.u32 %v11670_v63, %v410_v3 }
  0x2f   : > { %9571 = vmatpush3.bf16.msra.mxu0 %v11325_v56  ;;  %9526 = vmatprep.mubr.bf16.mxu0 %v395_v16  ;;  %v286_v56 = vld [vmem:[%s11569_s8 + $0x108] sm:$0xff] }
  0x30   : > { %9572 = vmatprep.subr.bf16.mxu0 %v11326_v2  ;;  %v11765_v16 = vpack.c.bf16 %v286_v56, %v285_v50  ;;  %v422_v50 = vor.u32 %v11697_v18, %v418_v17  ;;  %v474_v56 = vrot.slane %v11753_v6, 1  ;;  %v419_v7 = vsel %vm367_vm0, %v414_v43, %v418_v17 }
  0x31   : > { %v11817_v6 = vshrl.u32 %v11778_v25, 16  ;;  %v430_v17 = vor.u32 %v11703_v22, %v426_v26 }
  0x32   : > { %v11796_v3 = vshll.u32 %v11765_v16, 16  ;;  %v11802_v13 = vshrl.u32 %v11765_v16, 16  ;;  %v427_v58 = vsel %vm367_vm0, %v422_v50, %v426_v26  ;;  %v11828_v50 = vpack.c.bf16 %v290_v32, %v289_v36 }
  0x33   : > { %9573 = vmatpush3.bf16.msra.mxu0 %v11326_v2  ;;  %v11769_v2 = vshrl.u32 %v11715_v31, 16  ;;  %14377 = vst [vmem:[#allocation21_spill] sm:$0xff] %v11817_v6  ;;  %v506_v32 = vrot.slane %v11805_v38, 1  ;;  %v292_v38 = vld [vmem:[%s11569_s8 + $0x138] sm:$0xff] }
  0x34   : > { %9574 = vmatprep.subr.bf16.mxu0 %v11327_v33  ;;  %14374 = vst [vmem:[#allocation18_spill] sm:$0xff] %v11796_v3  ;;  %14375 = vst [vmem:[#allocation19_spill] sm:$0xff] %v11802_v13  ;;  %v498_v14 = vrot.slane %v11796_v3, 1  ;;  %v11841_v36 = vshll.u32 %v11828_v50, 16 }
  0x35   : > { %14371 = vst [vmem:[#allocation15_spill] sm:$0xff] %v11769_v2 }
  0x36   : > { %9527 = vmatmul.mubr.bf16.gmra.mrb[4].mxu0 %v403_v1  ;;  %v11788_v1 = vshrl.u32 %v11731_v45, 16  ;;  %14381 = vst [vmem:[#allocation22_spill] sm:$0xff] %v11841_v36 }
  0x37   : > { %9530 = vmatprep.mubr.bf16.mxu0 %v411_v10  ;;  %9575 = vmatpush3.bf16.msra.mxu0 %v11327_v33  ;;  %v11793_v10 = vshrl.u32 %v11733_v47, 16  ;;  %v11330_v33 = vld [vmem:[%s14261_s2 + $0x28] sm:$0xff]  }
  0x38   : > { %14373 = vst [vmem:[#allocation17_spill] sm:$0xff] %v11788_v1  ;;  %9576 = vmatprep.subr.bf16.mxu0 %v11328_v61 }
  0x3b   : > { %9577 = vmatpush3.bf16.msra.mxu0 %v11328_v61  ;;  %v14378_v61 = vrot.slane %v11687_v11, 1 }
  0x3c   : > { %9578 = vmatprep.subr.bf16.mxu0 %v11329_v21 }
  0x3d   : > { %v438_v43 = vor.u32 %v11710_v27, %v14378_v61  ;;  %v14379_v3 = vmov %v14378_v61 }
  0x3e   : > { %9531 = vmatmul.mubr.bf16.gmra.mrb[8].mxu0 %v419_v7  ;;  %v11332_v7 = vld [vmem:[%s14261_s2 + $0x38] sm:$0xff]  }
  0x3f   : > { %9534 = vmatprep.mubr.bf16.mxu0 %v427_v58  ;;  %9579 = vmatpush3.bf16.msra.mxu0 %v11329_v21  ;;  %v435_v58 = vsel %vm367_vm0, %v430_v17, %v14379_v3  ;;  %v443_v26 = vsel %vm367_vm0, %v438_v43, %v14380_v54  ;;  %v11846_v21 = vld [vmem:[%s14261_s2 + $0x80] sm:$0xff]   ;;  %v14382_v3 = vmov %v14380_v54  ;;  %v14383_v54 = vrot.slane %v11713_v28, 1 }
  0x40   : > { %9580 = vmatprep.subr.bf16.mxu0 %v11330_v33 }
  0x41   : > { %v454_v17 = vor.u32 %v11729_v44, %v14383_v54  ;;  %v14384_v61 = vmov %v14383_v54 }
  0x43   : > { %9581 = vmatpush3.bf16.msra.mxu0 %v11330_v33  ;;  %v446_v33 = vor.u32 %v11723_v37, %v14382_v3  ;;  %v470_v3 = vor.u32 %v11769_v2, %v466_v19 }
  0x44   : > { %9582 = vmatprep.subr.bf16.mxu0 %v11331_v0 }
  0x45   : > { %v451_v43 = vsel %vm367_vm0, %v446_v33, %v14384_v61  ;;  %v475_v33 = vsel %vm367_vm0, %v470_v3, %v474_v56  ;;  %v11870_v61 = vshrl.u32 %v11828_v50, 16 }
  0x46   : > { %9535 = vmatmul.mubr.bf16.gmra.mrb[12].mxu0 %v435_v58  ;;  %v459_v58 = vsel %vm367_vm0, %v454_v17, %v458_v62  ;;  %v294_v17 = vld [vmem:[%s11569_s8 + $0x148] sm:$0xff] }
  0x47   : > { %9538 = vmatprep.mubr.bf16.mxu0 %v443_v26  ;;  %9583 = vmatpush3.bf16.msra.mxu0 %v11331_v0  ;;  %v291_v26 = vld [vmem:[%s11569_s8 + $0x130] sm:$0xff]  ;;  %v462_v0 = vor.u32 %v11740_v55, %v458_v62  ;;  %14385 = vst [vmem:[#allocation23_spill] sm:$0xff] %v11870_v61  ;;  %v478_v62 = vor.u32 %v11773_v20, %v474_v56  ;;  %v514_v20 = vrot.slane %v11841_v36, 1 }
  0x48   : > { %9584 = vmatprep.subr.bf16.mxu0 %v11332_v7  ;;  %v11863_v54 = vpack.c.bf16 %v292_v38, %v291_v26  ;;  %v486_v38 = vor.u32 %v11788_v1, %v482_v57  ;;  %v14387_v26 = vrot.slane %v11763_v15, 1  ;;  %v295_v56 = vld [vmem:[%s11569_s8 + $0x150] sm:$0xff]  ;;  %v298_v1 = vld [vmem:[%s11569_s8 + $0x168] sm:$0xff] }
  0x49   : > { %v467_v44 = vsel %vm367_vm0, %v462_v0, %v466_v19 }
  0x4a   : > { %v11884_v0 = vshrl.u32 %v11863_v54, 16 }
  0x4b   : > { %9585 = vmatpush3.bf16.msra.mxu0 %v11332_v7  ;;  %v293_v7 = vld [vmem:[%s11569_s8 + $0x140] sm:$0xff] }
  0x4c   : > { %9634 = vmatprep.subr.bf16.mxu0 %v11846_v21  ;;  %v11877_v19 = vpack.c.bf16 %v294_v17, %v293_v7  ;;  %v14389_v7 = vmov %v14387_v26  ;;  %v502_v17 = vor.u32 %v11802_v13, %v498_v14  ;;  %v300_v13 = vld [vmem:[%s11569_s8 + $0x178] sm:$0xff] }
  0x4e   : > { %9539 = vmatmul.mubr.bf16.gmra.mrb[16].mxu0 %v451_v43  ;;  %v11873_v43 = vshll.u32 %v11863_v54, 16  ;;  %v11887_v3 = vshll.u32 %v11877_v19, 16  ;;  %v11905_v15 = vshrl.u32 %v11877_v19, 16 }
  0x4f   : > { %9542 = vmatprep.mubr.bf16.mxu0 %v459_v58  ;;  %v483_v58 = vsel %vm367_vm0, %v478_v62, %v482_v57  ;;  %v494_v57 = vor.u32 %v11793_v10, %v14389_v7  ;;  %v299_v7 = vld [vmem:[%s11569_s8 + $0x170] sm:$0xff] }
  0x50   : > { %14386 = vst [vmem:[#allocation24_spill] sm:$0xff] %v11873_v43  ;;  %14388 = vst [vmem:[#allocation25_spill] sm:$0xff] %v11887_v3  ;;  %v522_v2 = vrot.slane %v11873_v43, 1 }
  0x51   : > { %v499_v62 = vsel %vm367_vm0, %v494_v57, %v498_v14  ;;  %v510_v14 = vor.u32 %v11817_v6, %v506_v32  ;;  %v518_v57 = vor.u32 %v11870_v61, %v514_v20 }
  0x52   : > { %v526_v36 = vor.u32 %v11884_v0, %v522_v2 }
  0x53   : > { %v523_v43 = vsel %vm367_vm0, %v518_v57, %v522_v2 }
  0x56   : > { %9543 = vmatmul.mubr.bf16.gmra.mrb[20].mxu0 %v467_v44  ;;  %v491_v44 = vsel %vm367_vm0, %v486_v38, %v14387_v26  ;;  %v297_v26 = vld [vmem:[%s11569_s8 + $0x160] sm:$0xff] }
  0x57   : > { %9546 = vmatprep.mubr.bf16.mxu0 %v475_v33  ;;  %v296_v33 = vld [vmem:[%s11569_s8 + $0x158] sm:$0xff] }
  0x58   : > { %v11896_v38 = vpack.c.bf16 %v296_v33, %v295_v56 }
  0x5a   : > { %14390 = vst [vmem:[#allocation26_spill] sm:$0xff] %v11896_v38  ;;  %v11911_v56 = vshll.u32 %v11896_v38, 16  ;;  %v11914_v33 = vshrl.u32 %v11896_v38, 16 }
  0x5c   : > { %14391 = vst [vmem:[#allocation27_spill] sm:$0xff] %v11911_v56  ;;  %14392 = vst [vmem:[#allocation28_spill] sm:$0xff] %v11914_v33 }
  0x5e   : > { %9547 = vmatmul.mubr.bf16.gmra.mrb[24].mxu0 %v483_v58  ;;  %v507_v58 = vsel %vm367_vm0, %v502_v17, %v506_v32  ;;  %v11917_v17 = vpack.c.bf16 %v298_v1, %v297_v26 }
  0x5f   : > { %9550 = vmatprep.mubr.bf16.mxu0 %v491_v44  ;;  %v530_v44 = vrot.slane %v11887_v3, 1  ;;  %v11920_v3 = vpack.c.bf16 %v300_v13, %v299_v7 }
  0x60   : > { %14393 = vst [vmem:[#allocation29_spill] sm:$0xff] %v11917_v17  ;;  %v11925_v32 = vshll.u32 %v11917_v17, 16  ;;  %v11929_v6 = vshrl.u32 %v11917_v17, 16 }
  0x61   : > { %14394 = vst [vmem:[#allocation30_spill] sm:$0xff] %v11920_v3  ;;  %v11932_v1 = vshll.u32 %v11920_v3, 16  ;;  %v534_v13 = vor.u32 %v11905_v15, %v530_v44 }
  0x62   : > { %14395 = vst [vmem:[#allocation31_spill] sm:$0xff] %v11925_v32  ;;  %14396 = vst [vmem:[#allocation32_spill] sm:$0xff] %v11929_v6  ;;  %v546_v7 = vrot.slane %v11925_v32, 1 }
  0x63   : > { %14397 = vst [vmem:[#allocation33_spill] sm:$0xff] %v11932_v1  ;;  %v554_v2 = vrot.slane %v11932_v1, 1 }
  0x66   : > { %9551 = vmatmul.mubr.bf16.gmra.mrb[28].mxu0 %v499_v62  ;;  %v515_v62 = vsel %vm367_vm0, %v510_v14, %v514_v20  ;;  %v531_v20 = vsel %vm367_vm0, %v526_v36, %v530_v44  ;;  %v550_v14 = vor.u32 %v11929_v6, %v546_v7  ;;  %v11334_v44 = vld [vmem:[%s14261_s2 + $0x88] sm:$0xff]  }
  0x67   : > { %9554 = vmatprep.mubr.bf16.mxu0 %v507_v58  ;;  %v538_v58 = vrot.slane %v11911_v56, 1  ;;  %v11944_v56 = vshrl.u32 %v11920_v3, 16 }
  0x69   : > { %v539_v26 = vsel %vm367_vm0, %v534_v13, %v538_v58  ;;  %14398 = vst [vmem:[#allocation34_spill] sm:$0xff] %v11944_v56  ;;  %v558_v36 = vor.u32 %v11944_v56, %v554_v2  ;;  %v11336_v13 = vld [vmem:[%s14261_s2 + $0x98] sm:$0xff]  }
  0x6e   : > { %9555 = vmatmul.mubr.bf16.gmra.mrb[32].mxu0 %v515_v62  ;;  %v555_v62 = vsel %vm367_vm0, %v550_v14, %v554_v2  ;;  %v1167_v2 = vrot.slane %v11578_v8, 1  ;;  %v1168_v14 = vrot.slane %v11580_v9, 1 }
  0x6f   : > { %9558 = vmatprep.mubr.bf16.mxu0 %v523_v43  ;;  %v542_v43 = vor.u32 %v11914_v33, %v538_v58  ;;  %v11335_v58 = vld [vmem:[%s14261_s2 + $0x90] sm:$0xff]  }
  0x71   : > { %v547_v57 = vsel %vm367_vm0, %v542_v43, %v546_v7  ;;  %v11340_v7 = vld [vmem:[%s14261_s2 + $0xb8] sm:$0xff]   ;;  %v11341_v43 = vld [vmem:[%s14261_s2 + $0xc0] sm:$0xff]  }
  0x76   : > { %9559 = vmatmul.mubr.bf16.gmra.mrb[36].mxu0 %v531_v20  ;;  %v11338_v20 = vld [vmem:[%s14261_s2 + $0xa8] sm:$0xff]  }
  0x77   : > { %9562 = vmatprep.mubr.bf16.mxu0 %v539_v26  ;;  %v11339_v26 = vld [vmem:[%s14261_s2 + $0xb0] sm:$0xff]  }
  0x7e   : > { %9563 = vmatmul.mubr.bf16.gmra.mrb[40].mxu0 %v547_v57  ;;  %v1169_v57 = vsel %vm1166_vm1, %v1167_v2, %v1168_v14  ;;  %v1178_v2 = vrot.slane %v11631_v42, 1 }
  0x7f   : > { %9566 = vmatprep.mubr.bf16.mxu0 %v555_v62  ;;  %v1170_v62 = vrot.slane %v11598_v23, 1 }
  0x86   : > { %9567 = vmatmul.mubr.bf16.gmra.mrb[44].mxu0 %v558_v36  ;;  %v1172_v36 = vrot.slane %v11607_v29, 1 }
  0x87   : > { %9586 = vmatprep.mubr.bf16.mxu0 %v11578_v8  ;;  %v11342_v8 = vld [vmem:[%s14261_s2 + $0xc8] sm:$0xff]  }
  0x8e   : > { %9587 = vmatmul.mubr.bf16.vlgmr.msra.gmra.mrb[0].mxu0 %v11580_v9 }
  0x8f   : > { %9635 = vmatpush3.bf16.msra.mxu0 %v11846_v21  ;;  %9590 = vmatprep.mubr.bf16.mxu0 %v11598_v23  ;;  %v11337_v21 = vld [vmem:[%s14261_s2 + $0xa0] sm:$0xff]  }
  0x90   : > { %9636 = vmatprep.subr.bf16.mxu0 %v11334_v44 }
  0x93   : > { %9637 = vmatpush3.bf16.msra.mxu0 %v11334_v44  ;;  %v1171_v44 = vsel %vm1166_vm1, %v1168_v14, %v1170_v62  ;;  %v1180_v14 = vrot.slane %v11643_v49, 1 }
  0x94   : > { %9638 = vmatprep.subr.bf16.mxu0 %v11335_v58 }
  0x96   : > { %9591 = vmatmul.mubr.bf16.gmra.mrb[4].mxu0 %v11607_v29 }
  0x97   : > { %9594 = vmatprep.mubr.bf16.mxu0 %v11609_v30  ;;  %9639 = vmatpush3.bf16.msra.mxu0 %v11335_v58  ;;  %v1173_v58 = vsel %vm1166_vm1, %v1170_v62, %v1172_v36 }
  0x98   : > { %9640 = vmatprep.subr.bf16.mxu0 %v11336_v13 }
  0x9b   : > { %9641 = vmatpush3.bf16.msra.mxu0 %v11336_v13  ;;  %v1174_v13 = vrot.slane %v11609_v30, 1 }
  0x9c   : > { %9642 = vmatprep.subr.bf16.mxu0 %v11337_v21 }
  0x9e   : > { %9595 = vmatmul.mubr.bf16.gmra.mrb[8].mxu0 %v11619_v35 }
  0x9f   : > { %9598 = vmatprep.mubr.bf16.mxu0 %v11631_v42  ;;  %9643 = vmatpush3.bf16.msra.mxu0 %v11337_v21  ;;  %v1176_v21 = vrot.slane %v11619_v35, 1 }
  0xa0   : > { %9644 = vmatprep.subr.bf16.mxu0 %v11338_v20 }
  0xa1   : > { %v1179_v62 = vsel %vm1166_vm1, %v1176_v21, %v1178_v2 }
  0xa3   : > { %9645 = vmatpush3.bf16.msra.mxu0 %v11338_v20  ;;  %v11343_v20 = vld [vmem:[%s14261_s2 + $0xd0] sm:$0xff]  }
  0xa4   : > { %9646 = vmatprep.subr.bf16.mxu0 %v11339_v26 }
  0xa6   : > { %9599 = vmatmul.mubr.bf16.gmra.mrb[12].mxu0 %v11643_v49 }
  0xa7   : > { %9602 = vmatprep.mubr.bf16.mxu0 %v11650_v52  ;;  %9647 = vmatpush3.bf16.msra.mxu0 %v11339_v26  ;;  %v1175_v26 = vsel %vm1166_vm1, %v1172_v36, %v1174_v13  ;;  %v1181_v36 = vsel %vm1166_vm1, %v1178_v2, %v1180_v14  ;;  %v11349_v2 = vld [vmem:[%s14261_s2 + $0x100] sm:$0xff]  }
  0xa8   : > { %9648 = vmatprep.subr.bf16.mxu0 %v11340_v7 }
  0xab   : > { %9649 = vmatpush3.bf16.msra.mxu0 %v11340_v7  ;;  %v1177_v7 = vsel %vm1166_vm1, %v1174_v13, %v1176_v21  ;;  %v11347_v13 = vld [vmem:[%s14261_s2 + $0xf0] sm:$0xff]  }
  0xac   : > { %9698 = vmatprep.subr.bf16.mxu0 %v11341_v43 }
  0xae   : > { %9603 = vmatmul.mubr.bf16.gmra.mrb[16].mxu0 %v11652_v53 }
  0xaf   : > { %9606 = vmatprep.mubr.bf16.mxu0 %v11681_v5 }
  0xb6   : > { %9607 = vmatmul.mubr.bf16.gmra.mrb[20].mxu0 %v11705_v24 }
  0xb7   : > { %9610 = vmatprep.mubr.bf16.mxu0 %v11715_v31 }
  0xbe   : > { %9611 = vmatmul.mubr.bf16.gmra.mrb[24].mxu0 %v11725_v39 }
  0xbf   : > { %9614 = vmatprep.mubr.bf16.mxu0 %v11731_v45 }
  0xc6   : > { %9615 = vmatmul.mubr.bf16.gmra.mrb[28].mxu0 %v11733_v47 }
  0xc7   : > { %9618 = vmatprep.mubr.bf16.mxu0 %v11765_v16 }
  0xce   : > { %9619 = vmatmul.mubr.bf16.gmra.mrb[32].mxu0 %v11778_v25 }
  0xcf   : > { %9622 = vmatprep.mubr.bf16.mxu0 %v11828_v50 }
  0xd6   : > { %9623 = vmatmul.mubr.bf16.gmra.mrb[36].mxu0 %v11863_v54 }
  0xd7   : > { %9626 = vmatprep.mubr.bf16.mxu0 %v11877_v19 }
  0xde   : > { %9627 = vmatmul.mubr.bf16.gmra.mrb[40].mxu0 %v11896_v38 }
  0xdf   : > { %9630 = vmatprep.mubr.bf16.mxu0 %v11917_v17 }
  0xe6   : > { %9631 = vmatmul.mubr.bf16.gmra.mrb[44].mxu0 %v11920_v3 }
  0xe7   : > { %9650 = vmatprep.mubr.bf16.mxu0 %v1169_v57  ;;  %v11345_v57 = vld [vmem:[%s14261_s2 + $0xe0] sm:$0xff]  }
  0xee   : > { %9651 = vmatmul.mubr.bf16.vlgmr.msra.gmra.mrb[0].mxu0 %v1171_v44  ;;  %v11346_v44 = vld [vmem:[%s14261_s2 + $0xe8] sm:$0xff]  }
  0xef   : > { %9699 = vmatpush3.bf16.msra.mxu0 %v11341_v43  ;;  %9654 = vmatprep.mubr.bf16.mxu0 %v1173_v58  ;;  %v11344_v43 = vld [vmem:[%s14261_s2 + $0xd8] sm:$0xff]   ;;  %v1182_v58 = vrot.slane %v11650_v52, 1 }
  0xf0   : > { %9700 = vmatprep.subr.bf16.mxu0 %v11342_v8 }
  0xf1   : > { %v1183_v21 = vsel %vm1166_vm1, %v1180_v14, %v1182_v58 }
  0xf3   : > { %9701 = vmatpush3.bf16.msra.mxu0 %v11342_v8  ;;  %v1184_v8 = vrot.slane %v11652_v53, 1 }
  0xf4   : > { %9702 = vmatprep.subr.bf16.mxu0 %v11343_v20 }
  0xf6   : > { %9655 = vmatmul.mubr.bf16.gmra.mrb[4].mxu0 %v1175_v26  ;;  %v11348_v26 = vld [vmem:[%s14261_s2 + $0xf8] sm:$0xff]  }
  0xf7   : > { %9658 = vmatprep.mubr.bf16.mxu0 %v1177_v7  ;;  %9703 = vmatpush3.bf16.msra.mxu0 %v11343_v20  ;;  %v1185_v20 = vsel %vm1166_vm1, %v1182_v58, %v1184_v8  ;;  %v1186_v7 = vrot.slane %v11681_v5, 1 }
  0xf8   : > { %9704 = vmatprep.subr.bf16.mxu0 %v11344_v43 }
  0xf9   : > { %v1187_v14 = vsel %vm1166_vm1, %v1184_v8, %v1186_v7  ;;  %v1196_v8 = vrot.slane %v11733_v47, 1 }
  0xfb   : > { %9705 = vmatpush3.bf16.msra.mxu0 %v11344_v43  ;;  %v1188_v43 = vrot.slane %v11705_v24, 1 }
  0xfc   : > { %9706 = vmatprep.subr.bf16.mxu0 %v11345_v57 }
  0xfe   : > { %9659 = vmatmul.mubr.bf16.gmra.mrb[8].mxu0 %v1179_v62  ;;  %v1190_v62 = vrot.slane %v11715_v31, 1 }
  0xff   : > { %9662 = vmatprep.mubr.bf16.mxu0 %v1181_v36  ;;  %9707 = vmatpush3.bf16.msra.mxu0 %v11345_v57  ;;  %v1189_v57 = vsel %vm1166_vm1, %v1186_v7, %v1188_v43  ;;  %v1192_v36 = vrot.slane %v11725_v39, 1  ;;  %v1200_v7 = vrot.slane %v11778_v25, 1 }
 0x100   : > { %9708 = vmatprep.subr.bf16.mxu0 %v11346_v44 }
 0x101   : > { %v1193_v58 = vsel %vm1166_vm1, %v1190_v62, %v1192_v36 }
 0x103   : > { %9709 = vmatpush3.bf16.msra.mxu0 %v11346_v44  ;;  %v1191_v44 = vsel %vm1166_vm1, %v1188_v43, %v1190_v62  ;;  %v1204_v62 = vrot.slane %v11863_v54, 1 }
 0x104   : > { %9710 = vmatprep.subr.bf16.mxu0 %v11347_v13 }
 0x106   : > { %9663 = vmatmul.mubr.bf16.gmra.mrb[12].mxu0 %v1183_v21 }
 0x107   : > { %9666 = vmatprep.mubr.bf16.mxu0 %v1185_v20  ;;  %9711 = vmatpush3.bf16.msra.mxu0 %v11347_v13  ;;  %v1194_v13 = vrot.slane %v11731_v45, 1 }
 0x108   : > { %9712 = vmatprep.subr.bf16.mxu0 %v11348_v26 }
 0x109   : > { %v1195_v21 = vsel %vm1166_vm1, %v1192_v36, %v1194_v13  ;;  %v1197_v20 = vsel %vm1166_vm1, %v1194_v13, %v1196_v8  ;;  %v1208_v13 = vrot.slane %v11896_v38, 1 }
 0x10b   : > { %9713 = vmatpush3.bf16.msra.mxu0 %v11348_v26  ;;  %v1198_v26 = vrot.slane %v11765_v16, 1 }
 0x10c   : > { %9762 = vmatprep.subr.bf16.mxu0 %v11349_v2 }
 0x10d   : > { %v1199_v43 = vsel %vm1166_vm1, %v1196_v8, %v1198_v26 }
 0x10e   : > { %9667 = vmatmul.mubr.bf16.gmra.mrb[16].mxu0 %v1187_v14  ;;  %v1201_v14 = vsel %vm1166_vm1, %v1198_v26, %v1200_v7  ;;  %v1212_v26 = vrot.slane %v11920_v3, 1 }
 0x10f   : > { %9670 = vmatprep.mubr.bf16.mxu0 %v1189_v57  ;;  %v1202_v57 = vrot.slane %v11828_v50, 1 }
 0x111   : > { %v1203_v36 = vsel %vm1166_vm1, %v1200_v7, %v1202_v57 }
 0x116   : > { %9671 = vmatmul.mubr.bf16.gmra.mrb[20].mxu0 %v1191_v44  ;;  %v1205_v44 = vsel %vm1166_vm1, %v1202_v57, %v1204_v62  ;;  %v1575_v57 = vrot.slane %v11598_v23, 2 }
 0x117   : > { %9674 = vmatprep.mubr.bf16.mxu0 %v1193_v58  ;;  %v1206_v58 = vrot.slane %v11877_v19, 1 }
 0x119   : > { %v1207_v8 = vsel %vm1166_vm1, %v1204_v62, %v1206_v58 }
 0x11e   : > { %9675 = vmatmul.mubr.bf16.gmra.mrb[24].mxu0 %v1195_v21  ;;  %v1209_v21 = vsel %vm1166_vm1, %v1206_v58, %v1208_v13 }
 0x11f   : > { %9678 = vmatprep.mubr.bf16.mxu0 %v1197_v20  ;;  %v1210_v20 = vrot.slane %v11917_v17, 1 }
 0x121   : > { %v1211_v7 = vsel %vm1166_vm1, %v1208_v13, %v1210_v20 }
 0x126   : > { %9679 = vmatmul.mubr.bf16.gmra.mrb[28].mxu0 %v1199_v43  ;;  %v1213_v43 = vsel %vm1166_vm1, %v1210_v20, %v1212_v26  ;;  %v1583_v20 = vrot.slane %v11631_v42, 2 }
 0x127   : > { %9682 = vmatprep.mubr.bf16.mxu0 %v1201_v14  ;;  %v1574_v14 = vrot.slane %v11580_v9, 2 }
 0x129   : > { %v1576_v62 = vsel %vm1573_vm2, %v1574_v14, %v1575_v57  ;;  %v1585_v14 = vrot.slane %v11643_v49, 2 }
 0x12e   : > { %9683 = vmatmul.mubr.bf16.gmra.mrb[32].mxu0 %v1203_v36  ;;  %v1577_v36 = vrot.slane %v11607_v29, 2 }
 0x12f   : > { %9686 = vmatprep.mubr.bf16.mxu0 %v1205_v44  ;;  %v1579_v44 = vrot.slane %v11609_v30, 2 }
 0x130   : > { %v1578_v58 = vsel %vm1573_vm2, %v1575_v57, %v1577_v36  ;;  %v1587_v57 = vrot.slane %v11650_v52, 2 }
 0x131   : > { %v1580_v13 = vsel %vm1573_vm2, %v1577_v36, %v1579_v44  ;;  %v1586_v36 = vsel %vm1573_vm2, %v1583_v20, %v1585_v14 }
 0x136   : > { %9687 = vmatmul.mubr.bf16.gmra.mrb[36].mxu0 %v1207_v8  ;;  %v11350_v8 = vld [vmem:[%s14261_s2 + $0x108] sm:$0xff]  }
 0x137   : > { %9690 = vmatprep.mubr.bf16.mxu0 %v1209_v21  ;;  %v1581_v21 = vrot.slane %v11619_v35, 2 }
 0x13e   : > { %9691 = vmatmul.mubr.bf16.gmra.mrb[40].mxu0 %v1211_v7  ;;  %v1582_v7 = vsel %vm1573_vm2, %v1579_v44, %v1581_v21  ;;  %v1588_v44 = vsel %vm1573_vm2, %v1585_v14, %v1587_v57  ;;  %v12112_v14 = vld [vmem:[%s14261_s2 + $0x140] sm:$0xff]  }
 0x13f   : > { %9694 = vmatprep.mubr.bf16.mxu0 %v1213_v43  ;;  %v1584_v43 = vsel %vm1573_vm2, %v1581_v21, %v1583_v20  ;;  %v11355_v21 = vld [vmem:[%s14261_s2 + $0x130] sm:$0xff]  }
 0x146   : > { %9695 = vmatmul.mubr.bf16.gmra.mrb[44].mxu0 %v1212_v26  ;;  %v11351_v26 = vld [vmem:[%s14261_s2 + $0x110] sm:$0xff]  }
 0x147   : > { %9714 = vmatprep.mubr.bf16.mxu0 %v1576_v62  ;;  %v11353_v62 = vld [vmem:[%s14261_s2 + $0x120] sm:$0xff]  }
 0x14e   : > { %9715 = vmatmul.mubr.bf16.vlgmr.msra.gmra.mrb[0].mxu0 %v1578_v58  ;;  %v11354_v58 = vld [vmem:[%s14261_s2 + $0x128] sm:$0xff]  }
 0x14f   : > { %9763 = vmatpush3.bf16.msra.mxu0 %v11349_v2  ;;  %9718 = vmatprep.mubr.bf16.mxu0 %v1580_v13  ;;  %v11352_v2 = vld [vmem:[%s14261_s2 + $0x118] sm:$0xff]   ;;  %v1589_v13 = vrot.slane %v11652_v53, 2 }
 0x150   : > { %9764 = vmatprep.subr.bf16.mxu0 %v11350_v8 }
 0x151   : > { %v1590_v20 = vsel %vm1573_vm2, %v1587_v57, %v1589_v13 }
 0x153   : > { %9765 = vmatpush3.bf16.msra.mxu0 %v11350_v8  ;;  %v1591_v8 = vrot.slane %v11681_v5, 2 }
 0x154   : > { %9766 = vmatprep.subr.bf16.mxu0 %v11351_v26 }
 0x156   : > { %9719 = vmatmul.mubr.bf16.gmra.mrb[4].mxu0 %v1582_v7  ;;  %v11356_v7 = vld [vmem:[%s14261_s2 + $0x138] sm:$0xff]  }
 0x157   : > { %9722 = vmatprep.mubr.bf16.mxu0 %v1584_v43  ;;  %9767 = vmatpush3.bf16.msra.mxu0 %v11351_v26  ;;  %v1592_v26 = vsel %vm1573_vm2, %v1589_v13, %v1591_v8  ;;  %v1593_v43 = vrot.slane %v11705_v24, 2 }
 0x158   : > { %9768 = vmatprep.subr.bf16.mxu0 %v11352_v2 }
 0x159   : > { %v1594_v57 = vsel %vm1573_vm2, %v1591_v8, %v1593_v43  ;;  %v1603_v8 = vrot.slane %v11765_v16, 2 }
 0x15b   : > { %9769 = vmatpush3.bf16.msra.mxu0 %v11352_v2  ;;  %v1595_v2 = vrot.slane %v11715_v31, 2 }
 0x15c   : > { %9770 = vmatprep.subr.bf16.mxu0 %v11353_v62 }
 0x15e   : > { %9723 = vmatmul.mubr.bf16.gmra.mrb[8].mxu0 %v1586_v36  ;;  %v1597_v36 = vrot.slane %v11725_v39, 2 }
 0x15f   : > { %9726 = vmatprep.mubr.bf16.mxu0 %v1588_v44  ;;  %9771 = vmatpush3.bf16.msra.mxu0 %v11353_v62  ;;  %v1596_v62 = vsel %vm1573_vm2, %v1593_v43, %v1595_v2  ;;  %v1599_v44 = vrot.slane %v11731_v45, 2  ;;  %v1607_v43 = vrot.slane %v11828_v50, 2 }
 0x160   : > { %9772 = vmatprep.subr.bf16.mxu0 %v11354_v58 }
 0x161   : > { %v1600_v13 = vsel %vm1573_vm2, %v1597_v36, %v1599_v44 }
 0x163   : > { %9773 = vmatpush3.bf16.msra.mxu0 %v11354_v58  ;;  %v1598_v58 = vsel %vm1573_vm2, %v1595_v2, %v1597_v36  ;;  %v1611_v36 = vrot.slane %v11877_v19, 2 }
 0x164   : > { %9774 = vmatprep.subr.bf16.mxu0 %v11355_v21 }
 0x166   : > { %9727 = vmatmul.mubr.bf16.gmra.mrb[12].mxu0 %v1590_v20 }
 0x167   : > { %9730 = vmatprep.mubr.bf16.mxu0 %v1592_v26  ;;  %9775 = vmatpush3.bf16.msra.mxu0 %v11355_v21  ;;  %v1601_v21 = vrot.slane %v11733_v47, 2 }
 0x168   : > { %9776 = vmatprep.subr.bf16.mxu0 %v11356_v7 }
 0x169   : > { %v1602_v20 = vsel %vm1573_vm2, %v1599_v44, %v1601_v21  ;;  %v1604_v26 = vsel %vm1573_vm2, %v1601_v21, %v1603_v8  ;;  %v1615_v21 = vrot.slane %v11917_v17, 2 }
 0x16b   : > { %9777 = vmatpush3.bf16.msra.mxu0 %v11356_v7  ;;  %v1605_v7 = vrot.slane %v11778_v25, 2 }
 0x16c   : > { %9826 = vmatprep.subr.bf16.mxu0 %v12112_v14 }
 0x16d   : > { %v1606_v2 = vsel %vm1573_vm2, %v1603_v8, %v1605_v7  ;;  %v302_v8 = vld [vmem:[%s11569_s8 + $0x188] sm:$0xff] }
 0x16e   : > { %9731 = vmatmul.mubr.bf16.gmra.mrb[16].mxu0 %v1594_v57  ;;  %v1608_v57 = vsel %vm1573_vm2, %v1605_v7, %v1607_v43 }
 0x16f   : > { %9734 = vmatprep.mubr.bf16.mxu0 %v1596_v62  ;;  %v1609_v62 = vrot.slane %v11863_v54, 2 }
 0x171   : > { %v1610_v44 = vsel %vm1573_vm2, %v1607_v43, %v1609_v62  ;;  %v1617_v43 = vrot.slane %v11920_v3, 2  ;;  %v1992_v3 = vrot.slane %v11637_v46, 3 }
 0x176   : > { %9735 = vmatmul.mubr.bf16.gmra.mrb[20].mxu0 %v1598_v58  ;;  %v1612_v58 = vsel %vm1573_vm2, %v1609_v62, %v1611_v36  ;;  %v1618_v62 = vsel %vm1573_vm2, %v1615_v21, %v1617_v43 }
 0x177   : > { %9738 = vmatprep.mubr.bf16.mxu0 %v1600_v13  ;;  %v1613_v13 = vrot.slane %v11896_v38, 2  ;;  %v14400_v38 = vshll.u32 %v11580_v9, 16 }
 0x17e   : > { %9739 = vmatmul.mubr.bf16.gmra.mrb[24].mxu0 %v1602_v20  ;;  %v301_v20 = vld [vmem:[%s11569_s8 + $0x180] sm:$0xff] }
 0x17f   : > { %9742 = vmatprep.mubr.bf16.mxu0 %v1604_v26  ;;  %v1614_v26 = vsel %vm1573_vm2, %v1611_v36, %v1613_v13  ;;  %v12138_v7 = vpack.c.bf16 %v302_v8, %v301_v20  ;;  %v1981_v36 = vrot.slane %v14400_v38, 3  ;;  %v1983_v20 = vrot.slane %v11626_v40, 2 }
 0x186   : > { %9743 = vmatmul.mubr.bf16.gmra.mrb[28].mxu0 %v1606_v2  ;;  %v1616_v2 = vsel %vm1573_vm2, %v1613_v13, %v1615_v21  ;;  %v1984_v13 = vrot.slane %v11617_v34, 3  ;;  %v1988_v21 = vrot.slane %v11629_v41, 3 }
 0x187   : > { %9746 = vmatprep.mubr.bf16.mxu0 %v1608_v57  ;;  %v1619_v57 = vrot.slane %v12138_v7, 2 }
 0x18e   : > { %9747 = vmatmul.mubr.bf16.gmra.mrb[32].mxu0 %v1610_v44  ;;  %v1620_v44 = vsel %vm1573_vm2, %v1617_v43, %v1619_v57 }
 0x18f   : > { %9750 = vmatprep.mubr.bf16.mxu0 %v1612_v58  ;;  %v14399_v58 = vshrl.u32 %v11580_v9, 16 }
 0x191   : > { %v1980_v17 = vrot.slane %v14399_v58, 2  ;;  %v1991_v58 = vrot.slane %v11662_v59, 2 }
 0x193   : > { %v1982_v8 = vor.u32 %v1981_v36, %v1980_v17  ;;  %v1993_v40 = vor.u32 %v1992_v3, %v1991_v58  ;;  %v1995_v17 = vrot.slane %v11670_v63, 2 }
 0x196   : > { %9751 = vmatmul.mubr.bf16.gmra.mrb[36].mxu0 %v1614_v26  ;;  %v1985_v26 = vor.u32 %v1984_v13, %v1983_v20  ;;  %v11358_v20 = vld [vmem:[%s14261_s2 + $0x148] sm:$0xff]   ;;  %v1999_v13 = vrot.slane %v11697_v18, 2 }
 0x197   : > { %9754 = vmatprep.mubr.bf16.mxu0 %v1616_v2  ;;  %v1987_v2 = vrot.slane %v11648_v51, 2 }
 0x198   : > { %v1986_v43 = vsel %vm1979_vm3, %v1982_v8, %v1985_v26  ;;  %v2000_v8 = vrot.slane %v11665_v60, 3 }
 0x199   : > { %v1989_v38 = vor.u32 %v1988_v21, %v1987_v2  ;;  %v2003_v21 = vrot.slane %v11703_v22, 2 }
 0x19b   : > { %v1994_v36 = vsel %vm1979_vm3, %v1989_v38, %v1993_v40 }
 0x19e   : > { %9755 = vmatmul.mubr.bf16.gmra.mrb[40].mxu0 %v1618_v62  ;;  %v1990_v62 = vsel %vm1979_vm3, %v1985_v26, %v1989_v38  ;;  %v11359_v26 = vld [vmem:[%s14261_s2 + $0x150] sm:$0xff]   ;;  %v2007_v38 = vrot.slane %v11710_v27, 2 }
 0x19f   : > { %9758 = vmatprep.mubr.bf16.mxu0 %v1620_v44  ;;  %v1996_v44 = vrot.slane %v11641_v48, 3 }
 0x1a1   : > { %v1997_v3 = vor.u32 %v1996_v44, %v1995_v17  ;;  %v11361_v44 = vld [vmem:[%s14261_s2 + $0x160] sm:$0xff]  }
 0x1a3   : > { %v1998_v2 = vsel %vm1979_vm3, %v1993_v40, %v1997_v3 }
 0x1a6   : > { %9759 = vmatmul.mubr.bf16.gmra.mrb[44].mxu0 %v1619_v57  ;;  %v2001_v57 = vor.u32 %v2000_v8, %v1999_v13  ;;  %v2012_v13 = vrot.slane %v11690_v12, 3  ;;  %v14411_v12 = vld [vmem:[#allocation18_spill] sm:$0xff] }
 0x1a7   : > { %9778 = vmatprep.mubr.bf16.mxu0 %v1986_v43  ;;  %v2004_v43 = vrot.slane %v11679_v4, 3 }
 0x1a8   : > { %v2002_v58 = vsel %vm1979_vm3, %v1997_v3, %v2001_v57  ;;  %v14401_v3 = vld [vmem:[#allocation8_spill] sm:$0xff] }
 0x1a9   : > { %v2005_v17 = vor.u32 %v2004_v43, %v2003_v21  ;;  %v2016_v21 = vrot.slane %v11713_v28, 3 }
 0x1ae   : > { %9779 = vmatmul.mubr.bf16.vlgmr.msra.gmra.mrb[0].mxu0 %v1990_v62  ;;  %v11360_v62 = vld [vmem:[%s14261_s2 + $0x158] sm:$0xff]  }
 0x1af   : > { %9827 = vmatpush3.bf16.msra.mxu0 %v12112_v14  ;;  %9782 = vmatprep.mubr.bf16.mxu0 %v1994_v36  ;;  %v2008_v14 = vrot.slane %v11687_v11, 3  ;;  %v2006_v36 = vsel %vm1979_vm3, %v2001_v57, %v2005_v17 }
 0x1b0   : > { %9828 = vmatprep.subr.bf16.mxu0 %v11358_v20 }
 0x1b1   : > { %v2009_v40 = vor.u32 %v2008_v14, %v2007_v38  ;;  %v2019_v14 = vrot.slane %v11740_v55, 2 }
 0x1b3   : > { %9829 = vmatpush3.bf16.msra.mxu0 %v11358_v20  ;;  %v2011_v20 = vrot.slane %v11723_v37, 2  ;;  %v2010_v8 = vsel %vm1979_vm3, %v2005_v17, %v2009_v40 }
 0x1b4   : > { %9830 = vmatprep.subr.bf16.mxu0 %v11359_v26 }
 0x1b5   : > { %v2013_v43 = vor.u32 %v2012_v13, %v2011_v20 }
 0x1b6   : > { %9783 = vmatmul.mubr.bf16.gmra.mrb[4].mxu0 %v1998_v2  ;;  %v2015_v2 = vrot.slane %v14401_v3, 2  ;;  %v14403_v3 = vld [vmem:[#allocation15_spill] sm:$0xff] }
 0x1b7   : > { %9786 = vmatprep.mubr.bf16.mxu0 %v2002_v58  ;;  %9831 = vmatpush3.bf16.msra.mxu0 %v11359_v26  ;;  %v11362_v26 = vld [vmem:[%s14261_s2 + $0x168] sm:$0xff]   ;;  %v11363_v58 = vld [vmem:[%s14261_s2 + $0x170] sm:$0xff]   ;;  %v2014_v38 = vsel %vm1979_vm3, %v2009_v40, %v2013_v43 }
 0x1b8   : > { %9832 = vmatprep.subr.bf16.mxu0 %v11360_v62  ;;  %v2017_v57 = vor.u32 %v2016_v21, %v2015_v2  ;;  %v12205_v2 = vld [vmem:[%s14261_s2 + $0x180] sm:$0xff]  }
 0x1ba   : > { %v2018_v28 = vsel %vm1979_vm3, %v2013_v43, %v2017_v57 }
 0x1bb   : > { %9833 = vmatpush3.bf16.msra.mxu0 %v11360_v62  ;;  %v14402_v62 = vld [vmem:[#allocation9_spill] sm:$0xff] }
 0x1bc   : > { %9834 = vmatprep.subr.bf16.mxu0 %v11361_v44  ;;  %v2020_v17 = vrot.slane %v14402_v62, 3 }
 0x1be   : > { %9787 = vmatmul.mubr.bf16.gmra.mrb[8].mxu0 %v2006_v36  ;;  %v2023_v36 = vrot.slane %v14403_v3, 2  ;;  %v2021_v13 = vor.u32 %v2020_v17, %v2019_v14  ;;  %v14408_v14 = vld [vmem:[#allocation13_spill] sm:$0xff] }
 0x1bf   : > { %9790 = vmatprep.mubr.bf16.mxu0 %v2010_v8  ;;  %9835 = vmatpush3.bf16.msra.mxu0 %v11361_v44  ;;  %v14404_v8 = vld [vmem:[#allocation11_spill] sm:$0xff]  ;;  %v11364_v44 = vld [vmem:[%s14261_s2 + $0x178] sm:$0xff]  }
 0x1c0   : > { %9836 = vmatprep.subr.bf16.mxu0 %v11362_v26  ;;  %v2024_v20 = vrot.slane %v14404_v8, 3  ;;  %v2022_v21 = vsel %vm1979_vm3, %v2017_v57, %v2021_v13  ;;  %v14406_v8 = vld [vmem:[#allocation12_spill] sm:$0xff]  ;;  %v2035_v57 = vrot.slane %v11793_v10, 2 }
 0x1c1   : > { %v2028_v3 = vrot.slane %v14406_v8, 3  ;;  %v14410_v8 = vld [vmem:[#allocation19_spill] sm:$0xff] }
 0x1c2   : > { %v2025_v40 = vor.u32 %v2024_v20, %v2023_v36 }
 0x1c3   : > { %9837 = vmatpush3.bf16.msra.mxu0 %v11362_v26  ;;  %v14405_v26 = vld [vmem:[#allocation16_spill] sm:$0xff] }
 0x1c4   : > { %9838 = vmatprep.subr.bf16.mxu0 %v11363_v58  ;;  %v2027_v43 = vrot.slane %v14405_v26, 2  ;;  %v2026_v62 = vsel %vm1979_vm3, %v2021_v13, %v2025_v40  ;;  %v14409_v26 = vld [vmem:[#allocation14_spill] sm:$0xff]  ;;  %v2039_v13 = vrot.slane %v14410_v8, 2 }
 0x1c5   : > { %v2036_v55 = vrot.slane %v14409_v26, 3  ;;  %v14414_v26 = vld [vmem:[#allocation22_spill] sm:$0xff] }
 0x1c6   : > { %9791 = vmatmul.mubr.bf16.gmra.mrb[12].mxu0 %v2014_v38  ;;  %v14407_v38 = vld [vmem:[#allocation17_spill] sm:$0xff]  ;;  %v2029_v17 = vor.u32 %v2028_v3, %v2027_v43  ;;  %v14413_v43 = vld [vmem:[#allocation20_spill] sm:$0xff] }
 0x1c7   : > { %9794 = vmatprep.mubr.bf16.mxu0 %v2018_v28  ;;  %9839 = vmatpush3.bf16.msra.mxu0 %v11363_v58  ;;  %v2031_v28 = vrot.slane %v14407_v38, 2  ;;  %v2032_v58 = vrot.slane %v14408_v14, 3  ;;  %v2040_v38 = vrot.slane %v14411_v12, 3  ;;  %v2037_v14 = vor.u32 %v2036_v55, %v2035_v57  ;;  %v14412_v3 = vld [vmem:[#allocation21_spill] sm:$0xff] }
 0x1c8   : > { %9840 = vmatprep.subr.bf16.mxu0 %v11364_v44  ;;  %v2030_v20 = vsel %vm1979_vm3, %v2025_v40, %v2029_v17  ;;  %v2044_v40 = vrot.slane %v14413_v43, 3  ;;  %v2051_v55 = vrot.slane %v11884_v0, 2 }
 0x1c9   : > { %v2033_v36 = vor.u32 %v2032_v58, %v2031_v28  ;;  %v2041_v37 = vor.u32 %v2040_v38, %v2039_v13  ;;  %v2047_v58 = vrot.slane %v11870_v61, 2  ;;  %v14415_v38 = vld [vmem:[#allocation24_spill] sm:$0xff]  ;;  %v14416_v13 = vld [vmem:[#allocation25_spill] sm:$0xff] }
 0x1cb   : > { %9841 = vmatpush3.bf16.msra.mxu0 %v11364_v44  ;;  %v2034_v44 = vsel %vm1979_vm3, %v2029_v17, %v2033_v36  ;;  %v2042_v28 = vsel %vm1979_vm3, %v2037_v14, %v2041_v37  ;;  %v2048_v17 = vrot.slane %v14414_v26, 3 }
 0x1cc   : > { %9890 = vmatprep.subr.bf16.mxu0 %v12205_v2 }
 0x1cd   : > { %v2049_v12 = vor.u32 %v2048_v17, %v2047_v58  ;;  %v2064_v58 = vrot.slane %v11925_v32, 3 }
 0x1ce   : > { %9795 = vmatmul.mubr.bf16.gmra.mrb[16].mxu0 %v2022_v21  ;;  %v2043_v21 = vrot.slane %v14412_v3, 2 }
 0x1cf   : > { %9798 = vmatprep.mubr.bf16.mxu0 %v2026_v62  ;;  %v2038_v62 = vsel %vm1979_vm3, %v2033_v36, %v2037_v14  ;;  %v2052_v36 = vrot.slane %v14415_v38, 3  ;;  %v2056_v14 = vrot.slane %v14416_v13, 3 }
 0x1d0   : > { %v2045_v8 = vor.u32 %v2044_v40, %v2043_v21  ;;  %v2059_v21 = vrot.slane %v11914_v33, 2  ;;  %v14417_v40 = vld [vmem:[#allocation27_spill] sm:$0xff]  ;;  %v3744_v33 = vrot.slane %v11705_v24, 5 }
 0x1d1   : > { %v2053_v61 = vor.u32 %v2052_v36, %v2051_v55  ;;  %v14315_v55 = vshrl.u32 %v12138_v7, 16 }
 0x1d2   : > { %v2050_v57 = vsel %vm1979_vm3, %v2045_v8, %v2049_v12 }
 0x1d6   : > { %9799 = vmatmul.mubr.bf16.gmra.mrb[20].mxu0 %v2030_v20  ;;  %v2046_v20 = vsel %vm1979_vm3, %v2041_v37, %v2045_v8  ;;  %v2060_v37 = vrot.slane %v14417_v40, 3  ;;  %v2063_v8 = vrot.slane %v11929_v6, 2  ;;  %v3742_v6 = vrot.slane %v11681_v5, 5 }
 0x1d7   : > { %9802 = vmatprep.mubr.bf16.mxu0 %v2034_v44  ;;  %v2055_v44 = vrot.slane %v11905_v15, 2 }
 0x1d8   : > { %v2061_v17 = vor.u32 %v2060_v37, %v2059_v21  ;;  %v303_v21 = vld [vmem:[%s11569_s8 + $0x190] sm:$0xff]  ;;  %v304_v37 = vld [vmem:[%s11569_s8 + $0x198] sm:$0xff] }
 0x1d9   : > { %v2057_v26 = vor.u32 %v2056_v14, %v2055_v44  ;;  %v2068_v44 = vrot.slane %v11932_v1, 3  ;;  %v2074_v14 = vrot.slane %v14315_v55, 2 }
 0x1db   : > { %v2062_v36 = vsel %vm1979_vm3, %v2057_v26, %v2061_v17 }
 0x1de   : > { %9803 = vmatmul.mubr.bf16.gmra.mrb[24].mxu0 %v2038_v62  ;;  %v2054_v62 = vsel %vm1979_vm3, %v2049_v12, %v2053_v61  ;;  %v14316_v12 = vshll.u32 %v12138_v7, 16 }
 0x1df   : > { %9806 = vmatprep.mubr.bf16.mxu0 %v2042_v28  ;;  %v2058_v28 = vsel %vm1979_vm3, %v2053_v61, %v2057_v26 }
 0x1e6   : > { %9807 = vmatmul.mubr.bf16.gmra.mrb[28].mxu0 %v2046_v20  ;;  %v2065_v20 = vor.u32 %v2064_v58, %v2063_v8  ;;  %v12250_v8 = vpack.c.bf16 %v304_v37, %v303_v21  ;;  %v11367_v21 = vld [vmem:[%s14261_s2 + $0x190] sm:$0xff]  }
 0x1e7   : > { %9810 = vmatprep.mubr.bf16.mxu0 %v2050_v57  ;;  %v2067_v57 = vrot.slane %v11944_v56, 2  ;;  %v2854_v56 = vrot.slane %v11598_v23, 4 }
 0x1e8   : > { %v2066_v61 = vsel %vm1979_vm3, %v2061_v17, %v2065_v20  ;;  %v14317_v1 = vshll.u32 %v12250_v8, 16 }
 0x1ea   : > { %v2083_v55 = vrot.slane %v14317_v1, 3  ;;  %v3740_v1 = vrot.slane %v11652_v53, 5 }
 0x1ee   : > { %9811 = vmatmul.mubr.bf16.gmra.mrb[32].mxu0 %v2054_v62  ;;  %v2077_v62 = vrot.slane %v14316_v12, 3  ;;  %v2445_v12 = vrot.slane %v11580_v9, 3  ;;  %v11366_v9 = vld [vmem:[%s14261_s2 + $0x188] sm:$0xff]  }
 0x1ef   : > { %9814 = vmatprep.mubr.bf16.mxu0 %v2058_v28  ;;  %v2069_v28 = vor.u32 %v2068_v44, %v2067_v57 }
 0x1f0   : > { %v2078_v26 = vor.u32 %v2077_v62, %v2074_v14 }
 0x1f1   : > { %v2070_v58 = vsel %vm1979_vm3, %v2065_v20, %v2069_v28  ;;  %v2448_v20 = vrot.slane %v11607_v29, 3 }
 0x1f2   : > { %v2079_v17 = vsel %vm1979_vm3, %v2069_v28, %v2078_v26  ;;  %v2084_v57 = vsel %vm1979_vm3, %v2078_v26, %v2083_v55  ;;  %v2452_v55 = vrot.slane %v11619_v35, 3  ;;  %v2456_v26 = vrot.slane %v11643_v49, 3 }
 0x1f6   : > { %9815 = vmatmul.mubr.bf16.gmra.mrb[36].mxu0 %v2062_v36  ;;  %v2446_v36 = vrot.slane %v11598_v23, 3  ;;  %v3743_v23 = vsel %vm3726_vm5, %v3740_v1, %v3742_v6 }
 0x1f7   : > { %9818 = vmatprep.mubr.bf16.mxu0 %v2066_v61  ;;  %v2450_v61 = vrot.slane %v11609_v30, 3 }
 0x1f8   : > { %v2447_v44 = vsel %vm2444_vm4, %v2445_v12, %v2446_v36  ;;  %v2449_v14 = vsel %vm2444_vm4, %v2446_v36, %v2448_v20  ;;  %v2454_v12 = vrot.slane %v11631_v42, 3 }
 0x1f9   : > { %v2451_v62 = vsel %vm2444_vm4, %v2448_v20, %v2450_v61  ;;  %v2453_v37 = vsel %vm2444_vm4, %v2450_v61, %v2452_v55  ;;  %v2460_v20 = vrot.slane %v11652_v53, 3  ;;  %v2462_v61 = vrot.slane %v11681_v5, 3 }
 0x1fa   : > { %v2455_v28 = vsel %vm2444_vm4, %v2452_v55, %v2454_v12  ;;  %v2457_v36 = vsel %vm2444_vm4, %v2454_v12, %v2456_v26  ;;  %v11372_v55 = vld [vmem:[%s14261_s2 + $0x1b8] sm:$0xff]   ;;  %v2464_v12 = vrot.slane %v11705_v24, 3 }
 0x1fe   : > { %9819 = vmatmul.mubr.bf16.gmra.mrb[40].mxu0 %v2070_v58  ;;  %v2458_v58 = vrot.slane %v11650_v52, 3 }
 0x1ff   : > { %9822 = vmatprep.mubr.bf16.mxu0 %v2079_v17  ;;  %v11369_v17 = vld [vmem:[%s14261_s2 + $0x1a0] sm:$0xff]  }
 0x206   : > { %9823 = vmatmul.mubr.bf16.gmra.mrb[44].mxu0 %v2084_v57  ;;  %v2459_v57 = vsel %vm2444_vm4, %v2456_v26, %v2458_v58  ;;  %v2468_v26 = vrot.slane %v11725_v39, 3 }
 0x207   : > { %9842 = vmatprep.mubr.bf16.mxu0 %v2447_v44  ;;  %v11370_v44 = vld [vmem:[%s14261_s2 + $0x1a8] sm:$0xff]  }
 0x20e   : > { %9843 = vmatmul.mubr.bf16.vlgmr.msra.gmra.mrb[0].mxu0 %v2449_v14  ;;  %v11371_v14 = vld [vmem:[%s14261_s2 + $0x1b0] sm:$0xff]  }
 0x20f   : > { %9891 = vmatpush3.bf16.msra.mxu0 %v12205_v2  ;;  %9846 = vmatprep.mubr.bf16.mxu0 %v2451_v62  ;;  %v11368_v2 = vld [vmem:[%s14261_s2 + $0x198] sm:$0xff]   ;;  %v2461_v62 = vsel %vm2444_vm4, %v2458_v58, %v2460_v20  ;;  %v2470_v58 = vrot.slane %v11731_v45, 3 }
 0x210   : > { %9892 = vmatprep.subr.bf16.mxu0 %v11366_v9 }
 0x213   : > { %9893 = vmatpush3.bf16.msra.mxu0 %v11366_v9  ;;  %v2463_v9 = vsel %vm2444_vm4, %v2460_v20, %v2462_v61 }
 0x214   : > { %9894 = vmatprep.subr.bf16.mxu0 %v11367_v21 }
 0x216   : > { %9847 = vmatmul.mubr.bf16.gmra.mrb[4].mxu0 %v2453_v37  ;;  %v12304_v37 = vld [vmem:[%s14261_s2 + $0x1c0] sm:$0xff]  }
 0x217   : > { %9850 = vmatprep.mubr.bf16.mxu0 %v2455_v28  ;;  %9895 = vmatpush3.bf16.msra.mxu0 %v11367_v21  ;;  %v2466_v21 = vrot.slane %v11715_v31, 3  ;;  %v2465_v28 = vsel %vm2444_vm4, %v2462_v61, %v2464_v12 }
 0x218   : > { %9896 = vmatprep.subr.bf16.mxu0 %v11368_v2 }
 0x21b   : > { %9897 = vmatpush3.bf16.msra.mxu0 %v11368_v2  ;;  %v2467_v2 = vsel %vm2444_vm4, %v2464_v12, %v2466_v21  ;;  %v12324_v12 = vld [vmem:[%s14261_s2 + $0x200] sm:$0xff]  }
 0x21c   : > { %9898 = vmatprep.subr.bf16.mxu0 %v11369_v17  ;;  %10586 = vmatprep.subr.bf16.mxu1 %v12324_v12 }
 0x21d   : > { %10594 = vmatpush3.bf16.msra.mxu1 %v12324_v12 }
 0x21e   : > { %9851 = vmatmul.mubr.bf16.gmra.mrb[8].mxu0 %v2457_v36  ;;  %v2471_v36 = vsel %vm2444_vm4, %v2468_v26, %v2470_v58 }
 0x21f   : > { %9854 = vmatprep.mubr.bf16.mxu0 %v2459_v57  ;;  %9899 = vmatpush3.bf16.msra.mxu0 %v11369_v17  ;;  %v2469_v17 = vsel %vm2444_vm4, %v2466_v21, %v2468_v26  ;;  %v2472_v57 = vrot.slane %v11733_v47, 3  ;;  %v12330_v21 = vld [vmem:[%s14261_s2 + $0x208] sm:$0xff]  }
 0x220   : > { %9900 = vmatprep.subr.bf16.mxu0 %v11370_v44  ;;  %10587 = vmatprep.subr.bf16.mxu1 %v12330_v21 }
 0x221   : > { %v2473_v20 = vsel %vm2444_vm4, %v2470_v58, %v2472_v57  ;;  %10595 = vmatpush3.bf16.msra.mxu1 %v12330_v21 }
 0x223   : > { %9901 = vmatpush3.bf16.msra.mxu0 %v11370_v44  ;;  %v2474_v44 = vrot.slane %v11765_v16, 3 }
 0x224   : > { %9902 = vmatprep.subr.bf16.mxu0 %v11371_v14 }
 0x225   : > { %v2475_v61 = vsel %vm2444_vm4, %v2472_v57, %v2474_v44 }
 0x226   : > { %9855 = vmatmul.mubr.bf16.gmra.mrb[12].mxu0 %v2461_v62  ;;  %v2478_v62 = vrot.slane %v11828_v50, 3 }
 0x227   : > { %9858 = vmatprep.mubr.bf16.mxu0 %v2463_v9  ;;  %9903 = vmatpush3.bf16.msra.mxu0 %v11371_v14  ;;  %v2476_v14 = vrot.slane %v11778_v25, 3 }
 0x228   : > { %9904 = vmatprep.subr.bf16.mxu0 %v11372_v55 }
 0x229   : > { %v2477_v9 = vsel %vm2444_vm4, %v2474_v44, %v2476_v14  ;;  %v12350_v44 = vld [vmem:[%s14261_s2 + $0x218] sm:$0xff]  }
 0x22b   : > { %9905 = vmatpush3.bf16.msra.mxu0 %v11372_v55  ;;  %v2479_v55 = vsel %vm2444_vm4, %v2476_v14, %v2478_v62 }
 0x22c   : > { %9954 = vmatprep.subr.bf16.mxu0 %v12304_v37 }
 0x22e   : > { %9859 = vmatmul.mubr.bf16.gmra.mrb[16].mxu0 %v2465_v28  ;;  %v2480_v28 = vrot.slane %v11863_v54, 3 }
 0x22f   : > { %9862 = vmatprep.mubr.bf16.mxu0 %v2467_v2  ;;  %v2482_v2 = vrot.slane %v11877_v19, 3 }
 0x230   : > { %v2481_v26 = vsel %vm2444_vm4, %v2478_v62, %v2480_v28 }
 0x231   : > { %v2483_v58 = vsel %vm2444_vm4, %v2480_v28, %v2482_v2  ;;  %v14420_v28 = vld [vmem:[#allocation30_spill] sm:$0xff] }
 0x236   : > { %9863 = vmatmul.mubr.bf16.gmra.mrb[20].mxu0 %v2469_v17  ;;  %v12342_v17 = vld [vmem:[%s14261_s2 + $0x210] sm:$0xff]  }
 0x237   : > { %9866 = vmatprep.mubr.bf16.mxu0 %v2471_v36  ;;  %10588 = vmatprep.subr.bf16.mxu1 %v12342_v17  ;;  %v14418_v36 = vld [vmem:[#allocation26_spill] sm:$0xff] }
 0x238   : > { %v2484_v57 = vrot.slane %v14418_v36, 3  ;;  %10596 = vmatpush3.bf16.msra.mxu1 %v12342_v17 }
 0x239   : > { %10589 = vmatprep.subr.bf16.mxu1 %v12350_v44 }
 0x23a   : > { %v2485_v14 = vsel %vm2444_vm4, %v2482_v2, %v2484_v57  ;;  %v2488_v2 = vrot.slane %v14420_v28, 3 }
 0x23c   : > { %10597 = vmatpush3.bf16.msra.mxu1 %v12350_v44 }
 0x23e   : > { %9867 = vmatmul.mubr.bf16.gmra.mrb[24].mxu0 %v2473_v20  ;;  %v14419_v20 = vld [vmem:[#allocation29_spill] sm:$0xff] }
 0x23f   : > { %9870 = vmatprep.mubr.bf16.mxu0 %v2475_v61  ;;  %v2486_v61 = vrot.slane %v14419_v20, 3 }
 0x241   : > { %v2487_v62 = vsel %vm2444_vm4, %v2484_v57, %v2486_v61 }
 0x246   : > { %9871 = vmatmul.mubr.bf16.gmra.mrb[28].mxu0 %v2477_v9  ;;  %v12360_v9 = vld [vmem:[%s14261_s2 + $0x220] sm:$0xff]  }
 0x247   : > { %9874 = vmatprep.mubr.bf16.mxu0 %v2479_v55  ;;  %10590 = vmatprep.subr.bf16.mxu1 %v12360_v9  ;;  %v12366_v55 = vld [vmem:[%s14261_s2 + $0x228] sm:$0xff]  }
 0x248   : > { %10598 = vmatpush3.bf16.msra.mxu1 %v12360_v9 }
 0x249   : > { %10591 = vmatprep.subr.bf16.mxu1 %v12366_v55 }
 0x24c   : > { %10599 = vmatpush3.bf16.msra.mxu1 %v12366_v55 }
 0x24e   : > { %9875 = vmatmul.mubr.bf16.gmra.mrb[32].mxu0 %v2481_v26  ;;  %v2490_v26 = vrot.slane %v12138_v7, 3 }
 0x24f   : > { %9878 = vmatprep.mubr.bf16.mxu0 %v2483_v58  ;;  %v2489_v58 = vsel %vm2444_vm4, %v2486_v61, %v2488_v2  ;;  %v2492_v61 = vrot.slane %v12250_v8, 3 }
 0x250   : > { %v2491_v57 = vsel %vm2444_vm4, %v2488_v2, %v2490_v26  ;;  %v14324_v2 = vrot.slane %v11650_v52, 5 }
 0x251   : > { %v2493_v32 = vsel %vm2444_vm4, %v2490_v26, %v2492_v61  ;;  %v3746_v61 = vrot.slane %v11715_v31, 5 }
 0x256   : > { %9879 = vmatmul.mubr.bf16.gmra.mrb[36].mxu0 %v2485_v14  ;;  %v12378_v14 = vld [vmem:[%s14261_s2 + $0x230] sm:$0xff]  }
 0x257   : > { %9882 = vmatprep.mubr.bf16.mxu0 %v2487_v62  ;;  %10592 = vmatprep.subr.bf16.mxu1 %v12378_v14  ;;  %v12384_v62 = vld [vmem:[%s14261_s2 + $0x238] sm:$0xff]  }
 0x258   : > { %10600 = vmatpush3.bf16.msra.mxu1 %v12378_v14 }
 0x259   : > { %10593 = vmatprep.subr.bf16.mxu1 %v12384_v62 }
 0x25c   : > { %10601 = vmatpush3.bf16.msra.mxu1 %v12384_v62 }
 0x25e   : > { %9883 = vmatmul.mubr.bf16.gmra.mrb[40].mxu0 %v2489_v58  ;;  %v2855_v58 = vrot.slane %v11607_v29, 4  ;;  %v2857_v29 = vrot.slane %v11609_v30, 4 }
 0x25f   : > { %9886 = vmatprep.mubr.bf16.mxu0 %v2491_v57  ;;  %v3741_v57 = vsel %vm3726_vm5, %v14324_v2, %v3740_v1  ;;  %v2859_v2 = vrot.slane %v11619_v35, 4  ;;  %v3748_v1 = vrot.slane %v11725_v39, 5 }
 0x260   : > { %10046 = vmatprep.mubr.bf16.mxu1 %v3741_v57  ;;  %v2856_v40 = vsel %vm2853_vm6, %v2854_v56, %v2855_v58  ;;  %v3745_v57 = vsel %vm3726_vm5, %v3742_v6, %v3744_v33  ;;  %v2858_v26 = vsel %vm2853_vm6, %v2855_v58, %v2857_v29  ;;  %v2861_v6 = vrot.slane %v11631_v42, 4 }
 0x261   : > { %10047 = vmatmul.mubr.bf16.vlgmr.msra.gmra.mrb[0].mxu1 %v3743_v23  ;;  %v2860_v56 = vsel %vm2853_vm6, %v2857_v29, %v2859_v2  ;;  %v11374_v23 = vld [vmem:[%s14261_s2 + $0x1c8] sm:$0xff]   ;;  %v11375_v29 = vld [vmem:[%s14261_s2 + $0x1d0] sm:$0xff]   ;;  %v3749_v58 = vsel %vm3726_vm5, %v3746_v61, %v3748_v1 }
 0x262   : > { %10050 = vmatprep.mubr.bf16.mxu1 %v3745_v57 }
 0x266   : > { %9887 = vmatmul.mubr.bf16.gmra.mrb[44].mxu0 %v2493_v32  ;;  %v3747_v32 = vsel %vm3726_vm5, %v3744_v33, %v3746_v61  ;;  %v2862_v33 = vsel %vm2853_vm6, %v2859_v2, %v2861_v6  ;;  %v2865_v61 = vrot.slane %v11650_v52, 4  ;;  %v3752_v2 = vrot.slane %v11733_v47, 5 }
 0x267   : > { %9906 = vmatprep.mubr.bf16.mxu0 %v2856_v40  ;;  %v2863_v40 = vrot.slane %v11643_v49, 4 }
 0x269   : > { %10051 = vmatmul.mubr.bf16.gmra.mrb[4].mxu1 %v3747_v32  ;;  %v2864_v57 = vsel %vm2853_vm6, %v2861_v6, %v2863_v40  ;;  %v11377_v32 = vld [vmem:[%s14261_s2 + $0x1e0] sm:$0xff]  }
 0x26a   : > { %10054 = vmatprep.mubr.bf16.mxu1 %v3749_v58  ;;  %v3754_v58 = vrot.slane %v11765_v16, 5 }
 0x26e   : > { %9907 = vmatmul.mubr.bf16.vlgmr.msra.gmra.mrb[0].mxu0 %v2858_v26  ;;  %v11376_v26 = vld [vmem:[%s14261_s2 + $0x1d8] sm:$0xff]  }
 0x26f   : > { %9955 = vmatpush3.bf16.msra.mxu0 %v12304_v37  ;;  %9910 = vmatprep.mubr.bf16.mxu0 %v2860_v56  ;;  %v3750_v37 = vrot.slane %v11731_v45, 5 }
 0x270   : > { %9956 = vmatprep.subr.bf16.mxu0 %v11374_v23 }
 0x271   : > { %v3751_v56 = vsel %vm3726_vm5, %v3748_v1, %v3750_v37  ;;  %v3753_v6 = vsel %vm3726_vm5, %v3750_v37, %v3752_v2  ;;  %v2866_v1 = vsel %vm2853_vm6, %v2863_v40, %v2865_v61  ;;  %v2869_v37 = vrot.slane %v11681_v5, 4 }
 0x272   : > { %10055 = vmatmul.mubr.bf16.gmra.mrb[8].mxu1 %v3751_v56  ;;  %v3756_v40 = vrot.slane %v11778_v25, 5 }
 0x273   : > { %9957 = vmatpush3.bf16.msra.mxu0 %v11374_v23  ;;  %v2867_v23 = vrot.slane %v11652_v53, 4  ;;  %10058 = vmatprep.mubr.bf16.mxu1 %v3753_v6  ;;  %v11378_v53 = vld [vmem:[%s14261_s2 + $0x1e8] sm:$0xff]   ;;  %v2873_v6 = vrot.slane %v11715_v31, 4 }
 0x274   : > { %9958 = vmatprep.subr.bf16.mxu0 %v11375_v29  ;;  %v3757_v56 = vsel %vm3726_vm5, %v3754_v58, %v3756_v40 }
 0x276   : > { %9911 = vmatmul.mubr.bf16.gmra.mrb[4].mxu0 %v2862_v33  ;;  %v2868_v33 = vsel %vm2853_vm6, %v2865_v61, %v2867_v23  ;;  %v2870_v61 = vsel %vm2853_vm6, %v2867_v23, %v2869_v37  ;;  %v3760_v23 = vrot.slane %v11863_v54, 5 }
 0x277   : > { %9914 = vmatprep.mubr.bf16.mxu0 %v2864_v57  ;;  %9959 = vmatpush3.bf16.msra.mxu0 %v11375_v29  ;;  %v3755_v29 = vsel %vm3726_vm5, %v3752_v2, %v3754_v58  ;;  %v2871_v57 = vrot.slane %v11705_v24, 4  ;;  %v3758_v2 = vrot.slane %v11828_v50, 5  ;;  %v11380_v24 = vld [vmem:[%s14261_s2 + $0x1f8] sm:$0xff]  }
 0x278   : > { %9960 = vmatprep.subr.bf16.mxu0 %v11376_v26 }
 0x279   : > { %v2872_v5 = vsel %vm2853_vm6, %v2869_v37, %v2871_v57  ;;  %v3761_v58 = vsel %vm3726_vm5, %v3758_v2, %v3760_v23  ;;  %v3764_v37 = vrot.slane %v14418_v36, 5 }
 0x27a   : > { %10059 = vmatmul.mubr.bf16.gmra.mrb[12].mxu1 %v3755_v29 }
 0x27b   : > { %9961 = vmatpush3.bf16.msra.mxu0 %v11376_v26  ;;  %v11379_v26 = vld [vmem:[%s14261_s2 + $0x1f0] sm:$0xff]   ;;  %10062 = vmatprep.mubr.bf16.mxu1 %v3757_v56  ;;  %v3766_v56 = vrot.slane %v14419_v20, 5 }
 0x27c   : > { %9962 = vmatprep.subr.bf16.mxu0 %v11377_v32 }
 0x27e   : > { %9915 = vmatmul.mubr.bf16.gmra.mrb[8].mxu0 %v2866_v1  ;;  %v2875_v1 = vrot.slane %v11725_v39, 4  ;;  %v2877_v39 = vrot.slane %v11731_v45, 4  ;;  %v2881_v45 = vrot.slane %v11765_v16, 4  ;;  %v2885_v16 = vrot.slane %v11828_v50, 4 }
 0x27f   : > { %9918 = vmatprep.mubr.bf16.mxu0 %v2868_v33  ;;  %9963 = vmatpush3.bf16.msra.mxu0 %v11377_v32  ;;  %v3759_v32 = vsel %vm3726_vm5, %v3756_v40, %v3758_v2  ;;  %v2874_v33 = vsel %vm2853_vm6, %v2871_v57, %v2873_v6  ;;  %v2879_v40 = vrot.slane %v11733_v47, 4  ;;  %v3767_v2 = vsel %vm3726_vm5, %v3764_v37, %v3766_v56 }
 0x280   : > { %9964 = vmatprep.subr.bf16.mxu0 %v11378_v53  ;;  %v2876_v29 = vsel %vm2853_vm6, %v2873_v6, %v2875_v1  ;;  %v3768_v47 = vrot.slane %v14420_v28, 5  ;;  %v3770_v6 = vrot.slane %v12138_v7, 5 }
 0x282   : > { %10063 = vmatmul.mubr.bf16.gmra.mrb[16].mxu1 %v3759_v32  ;;  %v2882_v32 = vsel %vm2853_vm6, %v2879_v40, %v2881_v45 }
 0x283   : > { %9965 = vmatpush3.bf16.msra.mxu0 %v11378_v53  ;;  %10066 = vmatprep.mubr.bf16.mxu1 %v3761_v58  ;;  %v3762_v53 = vrot.slane %v11877_v19, 5  ;;  %v305_v58 = vld [vmem:[%s11569_s8 + $0x1a0] sm:$0xff] }
 0x284   : > { %9966 = vmatprep.subr.bf16.mxu0 %v11379_v26 }
 0x285   : > { %v3763_v31 = vsel %vm3726_vm5, %v3760_v23, %v3762_v53  ;;  %v3765_v57 = vsel %vm3726_vm5, %v3762_v53, %v3764_v37  ;;  %v2887_v53 = vrot.slane %v11863_v54, 4  ;;  %v4362_v54 = vld [vmem:[%s14260_s1] sm:$0xff] }
 0x286   : > { %9919 = vmatmul.mubr.bf16.gmra.mrb[12].mxu0 %v2870_v61  ;;  %v2880_v61 = vsel %vm2853_vm6, %v2877_v39, %v2879_v40 }
 0x287   : > { %9922 = vmatprep.mubr.bf16.mxu0 %v2872_v5  ;;  %9967 = vmatpush3.bf16.msra.mxu0 %v11379_v26  ;;  %v2878_v26 = vsel %vm2853_vm6, %v2875_v1, %v2877_v39  ;;  %v2883_v5 = vrot.slane %v11778_v25, 4  ;;  %v3771_v1 = vsel %vm3726_vm5, %v3768_v47, %v3770_v6  ;;  %v3772_v25 = vrot.slane %v12250_v8, 5 }
 0x288   : > { %9968 = vmatprep.subr.bf16.mxu0 %v11380_v24 }
 0x289   : > { %v2884_v23 = vsel %vm2853_vm6, %v2881_v45, %v2883_v5  ;;  %v3773_v39 = vsel %vm3726_vm5, %v3770_v6, %v3772_v25  ;;  %v2886_v37 = vsel %vm2853_vm6, %v2883_v5, %v2885_v16  ;;  %v4365_v45 = vld [vmem:[%s14260_s1 + $0x18] sm:$0xff]  ;;  %v4368_v6 = vld [vmem:[%s14260_s1 + $0x30] sm:$0xff] }
 0x28a   : > { %10067 = vmatmul.mubr.bf16.gmra.mrb[20].mxu1 %v3763_v31 }
 0x28b   : > { %9969 = vmatpush3.bf16.msra.mxu0 %v11380_v24  ;;  %10070 = vmatprep.mubr.bf16.mxu1 %v3765_v57  ;;  %v3769_v24 = vsel %vm3726_vm5, %v3766_v56, %v3768_v47  ;;  %v2888_v57 = vsel %vm2853_vm6, %v2885_v16, %v2887_v53  ;;  %v2889_v56 = vrot.slane %v11877_v19, 4  ;;  %v4366_v19 = vld [vmem:[%s14260_s1 + $0x20] sm:$0xff]  ;;  %v2899_v16 = vrot.slane %v12250_v8, 4 }
 0x28c   : > { %10018 = vmatprep.subr.bf16.mxu0 %v12324_v12 }
 0x28d   : > { %v2890_v47 = vsel %vm2853_vm6, %v2887_v53, %v2889_v56  ;;  %v4373_v53 = vld [vmem:[%s14260_s1 + $0x58] sm:$0xff] }
 0x28e   : > { %9923 = vmatmul.mubr.bf16.gmra.mrb[16].mxu0 %v2874_v33  ;;  %v306_v33 = vld [vmem:[%s11569_s8 + $0x1a8] sm:$0xff] }
 0x28f   : > { %9926 = vmatprep.mubr.bf16.mxu0 %v2876_v29  ;;  %v11510_v29 = vmov 0   ;;  %v12485_v31 = vpack.c.bf16 %v306_v33, %v305_v58  ;;  %v2897_v33 = vrot.slane %v12138_v7, 4 }
 0x290   : > { %11315 = vset.pattern.permute.xlu0 %v11510_v29  ;;  %11316 = vset.pattern.permute.xlu1 %v11510_v29 }
 0x291   : > { %v3774_v40 = vrot.slane %v12485_v31, 5  ;;  %4410 = vperm.xlu0 %11315, %v4362_v54   ;;  %v3266_v54 = vrot.slane %v11629_v41, 5  ;;  %v4376_v41 = vld [vmem:[%s14260_s1 + $0x70] sm:$0xff] }
 0x292   : > { %10071 = vmatmul.mubr.bf16.gmra.mrb[24].mxu1 %v3767_v2  ;;  %v4363_v2 = vld [vmem:[%s14260_s1 + $0x8] sm:$0xff] }
 0x293   : > { %10074 = vmatprep.mubr.bf16.mxu1 %v3769_v24  ;;  %v3775_v50 = vsel %vm3726_vm5, %v3772_v25, %v3774_v40  ;;  %v2893_v24 = vrot.slane %v14419_v20, 4  ;;  %v4370_v20 = vld [vmem:[%s14260_s1 + $0x40] sm:$0xff]  ;;  %v4372_v25 = vld [vmem:[%s14260_s1 + $0x50] sm:$0xff] }
 0x295   : > { %4415 = vperm.xlu0 %11315, %v4363_v2  }
 0x296   : > { %9927 = vmatmul.mubr.bf16.gmra.mrb[20].mxu0 %v2878_v26  ;;  %v4364_v26 = vld [vmem:[%s14260_s1 + $0x10] sm:$0xff] }
 0x297   : > { %9930 = vmatprep.mubr.bf16.mxu0 %v2880_v61  ;;  %v2891_v61 = vrot.slane %v14418_v36, 4  ;;  %4420 = vperm.xlu1 %11316, %v4364_v26   ;;  %v4367_v36 = vld [vmem:[%s14260_s1 + $0x28] sm:$0xff]  ;;  %v4374_v26 = vld [vmem:[%s14260_s1 + $0x60] sm:$0xff] }
 0x299   : > { %v2892_v5 = vsel %vm2853_vm6, %v2889_v56, %v2891_v61  ;;  %4430 = vperm.xlu0 %11315, %v4366_v19   ;;  %v4375_v56 = vld [vmem:[%s14260_s1 + $0x68] sm:$0xff] }
 0x29a   : > { %10075 = vmatmul.mubr.bf16.gmra.mrb[28].mxu1 %v3771_v1  ;;  %v2894_v1 = vsel %vm2853_vm6, %v2891_v61, %v2893_v24  ;;  %v2901_v61 = vrot.slane %v12485_v31, 4 }
 0x29b   : > { %10078 = vmatprep.mubr.bf16.mxu1 %v3773_v39  ;;  %4425 = vperm.xlu1 %11316, %v4365_v45   ;;  %v2900_v39 = vsel %vm2853_vm6, %v2897_v33, %v2899_v16 }
 0x29c   : > { %v2902_v45 = vsel %vm2853_vm6, %v2899_v16, %v2901_v61  ;;  %v4382_v16 = vld [vmem:[%s14260_s1 + $0xa0] sm:$0xff] }
 0x29d   : > { %4440 = vperm.xlu0 %11315, %v4368_v6   ;;  %v4379_v6 = vld [vmem:[%s14260_s1 + $0x88] sm:$0xff] }
 0x29e   : > { %9931 = vmatmul.mubr.bf16.gmra.mrb[24].mxu0 %v2882_v32  ;;  %v2895_v32 = vrot.slane %v14420_v28, 4  ;;  %v4371_v28 = vld [vmem:[%s14260_s1 + $0x48] sm:$0xff] }
 0x29f   : > { %9934 = vmatprep.mubr.bf16.mxu0 %v2884_v23  ;;  %4435 = vperm.xlu1 %11316, %v4367_v36   ;;  %v4369_v23 = vld [vmem:[%s14260_s1 + $0x38] sm:$0xff]  ;;  %v3273_v36 = vrot.slane %v11670_v63, 4  ;;  %v4380_v63 = vld [vmem:[%s14260_s1 + $0x90] sm:$0xff] }
 0x2a0   : > { %v2896_v58 = vsel %vm2853_vm6, %v2893_v24, %v2895_v32  ;;  %v2898_v29 = vsel %vm2853_vm6, %v2895_v32, %v2897_v33  ;;  %v3274_v24 = vrot.slane %v11641_v48, 5  ;;  %v4378_v32 = vld [vmem:[%s14260_s1 + $0x80] sm:$0xff]  ;;  %v4381_v48 = vld [vmem:[%s14260_s1 + $0x98] sm:$0xff]  ;;  %v3282_v33 = vrot.slane %v11679_v4, 5  ;;  %v4384_v4 = vld [vmem:[%s14260_s1 + $0xb0] sm:$0xff] }
 0x2a1   : > { %4450 = vperm.xlu0 %11315, %v4370_v20  }
 0x2a2   : > { %10079 = vmatmul.mubr.bf16.gmra.mrb[32].mxu1 %v3775_v50  ;;  %v3265_v50 = vrot.slane %v11648_v51, 4  ;;  %v4377_v51 = vld [vmem:[%s14260_s1 + $0x78] sm:$0xff] }
 0x2a3   : > { %4445 = vperm.xlu1 %11316, %v4369_v23  }
 0x2a5   : > { %4460 = vperm.xlu0 %11315, %v4372_v25   ;;  %v4383_v25 = vld [vmem:[%s14260_s1 + $0xa8] sm:$0xff] }
 0x2a6   : > { %9935 = vmatmul.mubr.bf16.gmra.mrb[28].mxu0 %v2886_v37  ;;  %v14421_v37 = vld [vmem:[#allocation4_spill] sm:$0xff] }
 0x2a7   : > { %9938 = vmatprep.mubr.bf16.mxu0 %v2888_v57  ;;  %4455 = vperm.xlu1 %11316, %v4371_v28   ;;  %v3262_v40 = vrot.slane %v14421_v37, 4  ;;  %v3263_v57 = vrot.slane %v11617_v34, 5  ;;  %v3267_v34 = vor.u32 %v3266_v54, %v3265_v50  ;;  %v3281_v28 = vrot.slane %v11703_v22, 4  ;;  %v4385_v22 = vld [vmem:[%s14260_s1 + $0xb8] sm:$0xff]  ;;  %v14422_v37 = vld [vmem:[#allocation7_spill] sm:$0xff]  ;;  %v4386_v54 = vld [vmem:[%s14260_s1 + $0xc0] sm:$0xff] }
 0x2a9   : > { %4470 = vperm.xlu0 %11315, %v4374_v26   ;;  %v3264_v2 = vor.u32 %v3263_v57, %v3262_v40  ;;  %v3289_v40 = vrot.slane %v14422_v37, 4  ;;  %v14423_v57 = vld [vmem:[#allocation5_spill] sm:$0xff]  ;;  %v4388_v26 = vld [vmem:[%s14260_s1 + $0xd0] sm:$0xff]  ;;  %v3313_v37 = vrot.slane %v11793_v10, 4 }
 0x2aa   : > { %v3290_v50 = vrot.slane %v14423_v57, 5  ;;  %v4400_v10 = vld [vmem:[%s14260_s1 + $0x130] sm:$0xff] }
 0x2ab   : > { %4465 = vperm.xlu1 %11316, %v4373_v53   ;;  %v3268_v19 = vsel %vm3261_vm7, %v3264_v2, %v3267_v34  ;;  %v14424_v2 = vld [vmem:[#allocation8_spill] sm:$0xff] }
 0x2ad   : > { %4480 = vperm.xlu0 %11315, %v4376_v41   ;;  %v14425_v41 = vld [vmem:[#allocation6_spill] sm:$0xff] }
 0x2ae   : > { %9939 = vmatmul.mubr.bf16.gmra.mrb[32].mxu0 %v2890_v47  ;;  %v3269_v47 = vrot.slane %v11662_v59, 4 }
 0x2af   : > { %9942 = vmatprep.mubr.bf16.mxu0 %v2892_v5  ;;  %4475 = vperm.xlu1 %11316, %v4375_v56   ;;  %v3270_v5 = vrot.slane %v11637_v46, 5  ;;  %v3275_v46 = vor.u32 %v3274_v24, %v3273_v36  ;;  %v4389_v56 = vld [vmem:[%s14260_s1 + $0xd8] sm:$0xff]  ;;  %v4390_v36 = vld [vmem:[%s14260_s1 + $0xe0] sm:$0xff]  ;;  %v4391_v24 = vld [vmem:[%s14260_s1 + $0xe8] sm:$0xff] }
 0x2b1   : > { %v3271_v59 = vor.u32 %v3270_v5, %v3269_v47  ;;  %4490 = vperm.xlu0 %11315, %v4378_v32   ;;  %v14427_v5 = vld [vmem:[#allocation9_spill] sm:$0xff] }
 0x2b3   : > { %4485 = vperm.xlu1 %11316, %v4377_v51   ;;  %v3272_v23 = vsel %vm3261_vm7, %v3267_v34, %v3271_v59  ;;  %v3276_v20 = vsel %vm3261_vm7, %v3271_v59, %v3275_v46  ;;  %v3293_v34 = vrot.slane %v14424_v2, 4  ;;  %v3294_v51 = vrot.slane %v14425_v41, 5  ;;  %v4393_v59 = vld [vmem:[%s14260_s1 + $0xf8] sm:$0xff] }
 0x2b4   : > { %v3321_v41 = vrot.slane %v14412_v3, 4  ;;  %v4404_v3 = vld [vmem:[%s14260_s1 + $0x150] sm:$0xff] }
 0x2b5   : > { %4500 = vperm.xlu0 %11315, %v4380_v63   ;;  %v14428_v63 = vld [vmem:[#allocation15_spill] sm:$0xff] }
 0x2b6   : > { %9943 = vmatmul.mubr.bf16.gmra.mrb[36].mxu0 %v2894_v1  ;;  %v3277_v1 = vrot.slane %v11697_v18, 4  ;;  %v3283_v18 = vor.u32 %v3282_v33, %v3281_v28  ;;  %v14431_v28 = vld [vmem:[#allocation12_spill] sm:$0xff] }
 0x2b7   : > { %9946 = vmatprep.mubr.bf16.mxu0 %v2896_v58  ;;  %4495 = vperm.xlu1 %11316, %v4379_v6   ;;  %v3278_v58 = vrot.slane %v11665_v60, 5  ;;  %v4392_v6 = vld [vmem:[%s14260_s1 + $0xf0] sm:$0xff]  ;;  %v3306_v33 = vrot.slane %v14431_v28, 5 }
 0x2b9   : > { %v3279_v60 = vor.u32 %v3278_v58, %v3277_v1  ;;  %4510 = vperm.xlu0 %11315, %v4382_v16   ;;  %v14430_v58 = vld [vmem:[#allocation16_spill] sm:$0xff]  ;;  %v4394_v16 = vld [vmem:[%s14260_s1 + $0x100] sm:$0xff] }
 0x2bb   : > { %4505 = vperm.xlu1 %11316, %v4381_v48   ;;  %v3280_v53 = vsel %vm3261_vm7, %v3275_v46, %v3279_v60  ;;  %v3301_v48 = vrot.slane %v14428_v63, 4  ;;  %v4406_v63 = vld [vmem:[%s14260_s1 + $0x160] sm:$0xff] }
 0x2bd   : > { %4520 = vperm.xlu0 %11315, %v4384_v4   ;;  %v4397_v4 = vld [vmem:[%s14260_s1 + $0x118] sm:$0xff] }
 0x2be   : > { %9947 = vmatmul.mubr.bf16.gmra.mrb[40].mxu0 %v2898_v29  ;;  %v3286_v29 = vrot.slane %v11687_v11, 5 }
 0x2bf   : > { %9950 = vmatprep.mubr.bf16.mxu0 %v2900_v39  ;;  %4515 = vperm.xlu1 %11316, %v4383_v25   ;;  %v3284_v39 = vsel %vm3261_vm7, %v3279_v60, %v3283_v18  ;;  %v4395_v25 = vld [vmem:[%s14260_s1 + $0x108] sm:$0xff] }
 0x2c1   : > { %4530 = vperm.xlu0 %11315, %v4386_v54   ;;  %v4399_v54 = vld [vmem:[%s14260_s1 + $0x128] sm:$0xff] }
 0x2c3   : > { %4525 = vperm.xlu1 %11316, %v4385_v22  }
 0x2c5   : > { %4540 = vperm.xlu0 %11315, %v4388_v26   ;;  %v14435_v26 = vld [vmem:[#allocation19_spill] sm:$0xff] }
 0x2c6   : > { %9951 = vmatmul.mubr.bf16.gmra.mrb[44].mxu0 %v2902_v45  ;;  %v14426_v45 = vld [vmem:[#allocation10_spill] sm:$0xff] }
 0x2c7   : > { %9970 = vmatprep.mubr.bf16.mxu0 %v3268_v19  ;;  %v3297_v47 = vrot.slane %v14426_v45, 4  ;;  %v3298_v19 = vrot.slane %v14427_v5, 5  ;;  %v4403_v45 = vld [vmem:[%s14260_s1 + $0x148] sm:$0xff] }
 0x2c9   : > { %v3299_v32 = vor.u32 %v3298_v19, %v3297_v47  ;;  %4550 = vperm.xlu0 %11315, %v4390_v36   ;;  %v14437_v36 = vld [vmem:[#allocation23_spill] sm:$0xff] }
 0x2cd   : > { %4560 = vperm.xlu0 %11315, %v4392_v6  }
 0x2ce   : > { %9971 = vmatmul.mubr.bf16.vlgmr.msra.gmra.mrb[0].mxu0 %v3272_v23  ;;  %v14429_v23 = vld [vmem:[#allocation11_spill] sm:$0xff] }
 0x2cf   : > { %10019 = vmatpush3.bf16.msra.mxu0 %v12324_v12  ;;  %9974 = vmatprep.mubr.bf16.mxu0 %v3276_v20  ;;  %v3285_v12 = vrot.slane %v11710_v27, 4  ;;  %v4387_v27 = vld [vmem:[%s14260_s1 + $0xc8] sm:$0xff]  ;;  %v3302_v1 = vrot.slane %v14429_v23, 5  ;;  %v3305_v20 = vrot.slane %v14430_v58, 4 }
 0x2d0   : > { %10020 = vmatprep.subr.bf16.mxu0 %v12330_v21  ;;  %4535 = vperm.xlu1 %11316, %v4387_v27  }
 0x2d1   : > { %v3287_v11 = vor.u32 %v3286_v29, %v3285_v12  ;;  %v3307_v60 = vor.u32 %v3306_v33, %v3305_v20  ;;  %4570 = vperm.xlu0 %11315, %v4394_v16   ;;  %v14433_v29 = vld [vmem:[#allocation13_spill] sm:$0xff]  ;;  %v14439_v20 = vld [vmem:[#allocation28_spill] sm:$0xff]  ;;  %v14440_v33 = vld [vmem:[#allocation27_spill] sm:$0xff] }
 0x2d2   : > { %v3337_v28 = vrot.slane %v14439_v20, 4  ;;  %v3338_v16 = vrot.slane %v14440_v33, 5 }
 0x2d3   : > { %10021 = vmatpush3.bf16.msra.mxu0 %v12330_v21  ;;  %v3291_v21 = vor.u32 %v3290_v50, %v3289_v40  ;;  %v3288_v61 = vsel %vm3261_vm7, %v3283_v18, %v3287_v11  ;;  %v4396_v18 = vld [vmem:[%s14260_s1 + $0x110] sm:$0xff]  ;;  %v14434_v40 = vld [vmem:[#allocation14_spill] sm:$0xff] }
 0x2d4   : > { %10022 = vmatprep.subr.bf16.mxu0 %v12342_v17  ;;  %4545 = vperm.xlu1 %11316, %v4389_v56   ;;  %v3314_v57 = vrot.slane %v14434_v40, 5  ;;  %v4398_v50 = vld [vmem:[%s14260_s1 + $0x120] sm:$0xff]  ;;  %v3317_v56 = vrot.slane %v14435_v26, 4  ;;  %v3353_v40 = vshrl.u32 %v12250_v8, 16 }
 0x2d5   : > { %4580 = vperm.xlu0 %11315, %v4396_v18   ;;  %v14441_v18 = vld [vmem:[#allocation32_spill] sm:$0xff] }
 0x2d6   : > { %9975 = vmatmul.mubr.bf16.gmra.mrb[4].mxu0 %v3280_v53  ;;  %v14432_v53 = vld [vmem:[#allocation17_spill] sm:$0xff] }
 0x2d7   : > { %9978 = vmatprep.mubr.bf16.mxu0 %v3284_v39  ;;  %10023 = vmatpush3.bf16.msra.mxu0 %v12342_v17  ;;  %v3292_v17 = vsel %vm3261_vm7, %v3287_v11, %v3291_v21  ;;  %v3309_v12 = vrot.slane %v14432_v53, 4  ;;  %v3310_v39 = vrot.slane %v14433_v29, 5  ;;  %v4401_v11 = vld [vmem:[%s14260_s1 + $0x138] sm:$0xff] }
 0x2d8   : > { %10024 = vmatprep.subr.bf16.mxu0 %v12350_v44  ;;  %4555 = vperm.xlu1 %11316, %v4391_v24   ;;  %v3325_v24 = vrot.slane %v14437_v36, 4  ;;  %v14444_v29 = vld [vmem:[#allocation33_spill] sm:$0xff]  ;;  %v3732_v36 = vrot.slane %v11619_v35, 5  ;;  %v14450_v35 = vrot.slane %v11650_v52, 5 }
 0x2d9   : > { %v3311_v27 = vor.u32 %v3310_v39, %v3309_v12  ;;  %4590 = vperm.xlu0 %11315, %v4398_v50   ;;  %v14443_v12 = vld [vmem:[#allocation34_spill] sm:$0xff]  ;;  %v3346_v39 = vrot.slane %v14444_v29, 5  ;;  %v14445_v50 = vshrl.u32 %v12138_v7, 16 }
 0x2db   : > { %10025 = vmatpush3.bf16.msra.mxu0 %v12350_v44  ;;  %v3295_v44 = vor.u32 %v3294_v51, %v3293_v34  ;;  %v3322_v51 = vrot.slane %v14413_v43, 5  ;;  %v4405_v43 = vld [vmem:[%s14260_s1 + $0x158] sm:$0xff] }
 0x2dc   : > { %10026 = vmatprep.subr.bf16.mxu0 %v12360_v9  ;;  %4565 = vperm.xlu1 %11316, %v4393_v59   ;;  %v3329_v59 = vrot.slane %v11884_v0, 4 }
 0x2dd   : > { %v3296_v46 = vsel %vm3261_vm7, %v3291_v21, %v3295_v44  ;;  %v3312_v21 = vsel %vm3261_vm7, %v3307_v60, %v3311_v27  ;;  %4600 = vperm.xlu0 %11315, %v4400_v10   ;;  %v3323_v5 = vor.u32 %v3322_v51, %v3321_v41 }
 0x2de   : > { %9979 = vmatmul.mubr.bf16.gmra.mrb[8].mxu0 %v3288_v61  ;;  %v14436_v61 = vld [vmem:[#allocation18_spill] sm:$0xff] }
 0x2df   : > { %9982 = vmatprep.mubr.bf16.mxu0 %v3292_v17  ;;  %10027 = vmatpush3.bf16.msra.mxu0 %v12360_v9  ;;  %v3300_v9 = vsel %vm3261_vm7, %v3295_v44, %v3299_v32  ;;  %v3318_v2 = vrot.slane %v14436_v61, 5  ;;  %v4402_v17 = vld [vmem:[%s14260_s1 + $0x140] sm:$0xff]  ;;  %v3360_v61 = vshrl.u32 %v12485_v31, 16 }
 0x2e0   : > { %10028 = vmatprep.subr.bf16.mxu0 %v12366_v55  ;;  %4575 = vperm.xlu1 %11316, %v4395_v25   ;;  %v14438_v44 = vld [vmem:[#allocation22_spill] sm:$0xff] }
 0x2e1   : > { %v3319_v47 = vor.u32 %v3318_v2, %v3317_v56  ;;  %4610 = vperm.xlu0 %11315, %v4402_v17   ;;  %v3363_v2 = vshll.u32 %v12485_v31, 16  ;;  %v3362_v51 = vrot.slane %v3360_v61, 4  ;;  %v3730_v31 = vrot.slane %v11609_v30, 5 }
 0x2e3   : > { %10029 = vmatpush3.bf16.msra.mxu0 %v12366_v55  ;;  %v3303_v55 = vor.u32 %v3302_v1, %v3301_v48  ;;  %v3324_v6 = vsel %vm3261_vm7, %v3319_v47, %v3323_v5  ;;  %v4407_v48 = vld [vmem:[%s14260_s1 + $0x168] sm:$0xff]  ;;  %v3365_v17 = vrot.slane %v3363_v2, 5 }
 0x2e4   : > { %10030 = vmatprep.subr.bf16.mxu0 %v12378_v14  ;;  %4585 = vperm.xlu1 %11316, %v4397_v4   ;;  %v3341_v4 = vrot.slane %v14441_v18, 4 }
 0x2e5   : > { %v3304_v22 = vsel %vm3261_vm7, %v3299_v32, %v3303_v55  ;;  %v3326_v32 = vrot.slane %v14438_v44, 5  ;;  %4620 = vperm.xlu0 %11315, %v4404_v3   ;;  %v3733_v44 = vsel %vm3726_vm5, %v3730_v31, %v3732_v36 }
 0x2e6   : > { %9983 = vmatmul.mubr.bf16.gmra.mrb[12].mxu0 %v3296_v46  ;;  %v3330_v46 = vrot.slane %v14415_v38, 5  ;;  %v3333_v38 = vrot.slane %v11905_v15, 4 }
 0x2e7   : > { %9986 = vmatprep.mubr.bf16.mxu0 %v3300_v9  ;;  %10031 = vmatpush3.bf16.msra.mxu0 %v12378_v14  ;;  %v3308_v14 = vsel %vm3261_vm7, %v3303_v55, %v3307_v60  ;;  %v3327_v23 = vor.u32 %v3326_v32, %v3325_v24  ;;  %v3334_v9 = vrot.slane %v14416_v13, 5  ;;  %v3339_v55 = vor.u32 %v3338_v16, %v3337_v28 }
 0x2e8   : > { %10032 = vmatprep.subr.bf16.mxu0 %v12384_v62  ;;  %4595 = vperm.xlu1 %11316, %v4399_v54   ;;  %v3331_v1 = vor.u32 %v3330_v46, %v3329_v59  ;;  %v3345_v13 = vrot.slane %v14443_v12, 4  ;;  %v3349_v54 = vrot.slane %v14445_v50, 4  ;;  %v3734_v32 = vrot.slane %v11631_v42, 5 }
 0x2e9   : > { %4630 = vperm.xlu0 %11315, %v4406_v63   ;;  %v3328_v0 = vsel %vm3261_vm7, %v3323_v5, %v3327_v23  ;;  %v3335_v25 = vor.u32 %v3334_v9, %v3333_v38  ;;  %v14449_v5 = vld [vmem:[#allocation3_spill] sm:$0xff] }
 0x2ea   : > { %v3332_v58 = vsel %vm3261_vm7, %v3327_v23, %v3331_v1  ;;  %v3728_v3 = vrot.slane %v14449_v5, 5  ;;  %v3735_v59 = vsel %vm3726_vm5, %v3732_v36, %v3734_v32 }
 0x2eb   : > { %10033 = vmatpush3.bf16.msra.mxu0 %v12384_v62  ;;  %v3315_v62 = vor.u32 %v3314_v57, %v3313_v37  ;;  %v3336_v60 = vsel %vm3261_vm7, %v3331_v1, %v3335_v25  ;;  %v3340_v15 = vsel %vm3261_vm7, %v3335_v25, %v3339_v55  ;;  %v3347_v37 = vor.u32 %v3346_v39, %v3345_v13  ;;  %v11391_v39 = vld [vmem:[%s14263_s4 + $0x50] sm:$0xff]  }
 0x2ec   : > { %4605 = vperm.xlu1 %11316, %v4401_v11   ;;  %v3355_v11 = vrot.slane %v3353_v40, 4  ;;  %v3731_v24 = vsel %vm3726_vm5, %v3728_v3, %v3730_v31 }
 0x2ed   : > { %v3316_v34 = vsel %vm3261_vm7, %v3311_v27, %v3315_v62  ;;  %v3320_v19 = vsel %vm3261_vm7, %v3315_v62, %v3319_v47  ;;  %v14446_v27 = vshll.u32 %v12138_v7, 16  ;;  %v14448_v47 = vld [vmem:[#allocation2_spill] sm:$0xff] }
 0x2ee   : > { %9987 = vmatmul.mubr.bf16.gmra.mrb[16].mxu0 %v3304_v22  ;;  %v14442_v22 = vld [vmem:[#allocation31_spill] sm:$0xff] }
 0x2ef   : > { %9990 = vmatprep.mubr.bf16.mxu0 %v3308_v14  ;;  %v3342_v53 = vrot.slane %v14442_v22, 5  ;;  %v3350_v62 = vrot.slane %v14446_v27, 5 }
 0x2f0   : > { %4615 = vperm.xlu1 %11316, %v4403_v45   ;;  %v3366_v45 = vor.u32 %v3365_v17, %v3362_v51 }
 0x2f1   : > { %v3343_v14 = vor.u32 %v3342_v53, %v3341_v4  ;;  %v3351_v56 = vor.u32 %v3350_v62, %v3349_v54  ;;  %v11390_v53 = vld [vmem:[%s14263_s4 + $0x48] sm:$0xff]  }
 0x2f3   : > { %v3344_v57 = vsel %vm3261_vm7, %v3339_v55, %v3343_v14  ;;  %v3348_v10 = vsel %vm3261_vm7, %v3343_v14, %v3347_v37  ;;  %v3352_v41 = vsel %vm3261_vm7, %v3347_v37, %v3351_v56  ;;  %v11389_v55 = vld [vmem:[%s14263_s4 + $0x40] sm:$0xff]  }
 0x2f4   : > { %4625 = vperm.xlu1 %11316, %v4405_v43   ;;  %10082 = vmatprep.subr.bf16.mxu1 %v11389_v55 }
 0x2f5   : > { %10083 = vmatpush3.bf16.msra.mxu1 %v11389_v55 }
 0x2f6   : > { %9991 = vmatmul.mubr.bf16.gmra.mrb[20].mxu0 %v3312_v21  ;;  %v14447_v21 = vshll.u32 %v12250_v8, 16  ;;  %v3727_v8 = vrot.slane %v14448_v47, 5  ;;  %10084 = vmatprep.subr.bf16.mxu1 %v11390_v53 }
 0x2f7   : > { %9994 = vmatprep.mubr.bf16.mxu0 %v3316_v34 }
 0x2f8   : > { %4635 = vperm.xlu1 %11316, %v4407_v48   ;;  %v3356_v26 = vrot.slane %v14447_v21, 5 }
 0x2f9   : > { %10085 = vmatpush3.bf16.msra.mxu1 %v11390_v53 }
 0x2fa   : > { %v3357_v34 = vor.u32 %v3356_v26, %v3355_v11  ;;  %10086 = vmatprep.subr.bf16.mxu1 %v11391_v39 }
 0x2fc   : > { %v3358_v7 = vsel %vm3261_vm7, %v3351_v56, %v3357_v34  ;;  %v3367_v43 = vsel %vm3261_vm7, %v3357_v34, %v3366_v45  ;;  %v11393_v34 = vld [vmem:[%s14263_s4 + $0x60] sm:$0xff]   ;;  %v11394_v45 = vld [vmem:[%s14263_s4 + $0x68] sm:$0xff]  }
 0x2fd   : > { %10087 = vmatpush3.bf16.msra.mxu1 %v11391_v39  ;;  %v12883_v39 = vld [vmem:[%s14262_s3] ss:$0 sm:$0xff] }
 0x2fe   : > { %9995 = vmatmul.mubr.bf16.gmra.mrb[24].mxu0 %v3320_v19  ;;  %v3729_v19 = vsel %vm3726_vm5, %v3727_v8, %v3728_v3  ;;  %v11395_v3 = vld [vmem:[%s14263_s4 + $0x70] sm:$0xff]  }
 0x2ff   : > { %9998 = vmatprep.mubr.bf16.mxu0 %v3324_v6  ;;  %v3736_v6 = vrot.slane %v11643_v49, 5 }
 0x301   : > { %v3737_v46 = vsel %vm3726_vm5, %v3734_v32, %v3736_v6  ;;  %v3739_v48 = vsel %vm3726_vm5, %v3736_v6, %v14450_v35 }
 0x306   : > { %9999 = vmatmul.mubr.bf16.gmra.mrb[28].mxu0 %v3328_v0 }
 0x307   : > { %10002 = vmatprep.mubr.bf16.mxu0 %v3332_v58 }
 0x30e   : > { %10003 = vmatmul.mubr.bf16.gmra.mrb[32].mxu0 %v3336_v60 }
 0x30f   : > { %10006 = vmatprep.mubr.bf16.mxu0 %v3340_v15 }
 0x310   : > { %v12826_v21 = vpop.permute.xlu0 %4410 }
 0x311   : > { %14451 = vst [vmem:[#allocation21_spill] sm:$0xff] %v12826_v21 }
 0x316   : > { %10007 = vmatmul.mubr.bf16.gmra.mrb[36].mxu0 %v3344_v57  ;;  %v12830_v56 = vpop.permute.xlu1 %4420 }
 0x317   : > { %10010 = vmatprep.mubr.bf16.mxu0 %v3348_v10  ;;  %v11392_v10 = vld [vmem:[%s14263_s4 + $0x58] sm:$0xff]   ;;  %14453 = vst [vmem:[#allocation24_spill] sm:$0xff] %v12830_v56 }
 0x318   : > { %10088 = vmatprep.subr.bf16.mxu1 %v11392_v10 }
 0x319   : > { %10089 = vmatpush3.bf16.msra.mxu1 %v11392_v10 }
 0x31a   : > { %10090 = vmatprep.subr.bf16.mxu1 %v11393_v34  ;;  %v12839_v51 = vpop.permute.xlu1 %4425 }
 0x31b   : > { %14456 = vst [vmem:[#allocation29_spill] sm:$0xff] %v12839_v51 }
 0x31d   : > { %10091 = vmatpush3.bf16.msra.mxu1 %v11393_v34 }
 0x31e   : > { %10011 = vmatmul.mubr.bf16.gmra.mrb[40].mxu0 %v3352_v41  ;;  %v12837_v41 = vpop.permute.xlu0 %4415  ;;  %10092 = vmatprep.subr.bf16.mxu1 %v11394_v45 }
 0x31f   : > { %10014 = vmatprep.mubr.bf16.mxu0 %v3358_v7  ;;  %14455 = vst [vmem:[#allocation26_spill] sm:$0xff] %v12837_v41  ;;  %v12843_v7 = vpop.permute.xlu1 %4435 }
 0x320   : > { %14458 = vst [vmem:[#allocation4_spill] sm:$0xff] %v12843_v7 }
 0x321   : > { %10093 = vmatpush3.bf16.msra.mxu1 %v11394_v45  ;;  %v12893_v45 = vld [vmem:[%s14262_s3 + $0x1] ss:$0 sm:$0xff] }
 0x322   : > { %v12841_v17 = vpop.permute.xlu0 %4430  ;;  %10094 = vmatprep.subr.bf16.mxu1 %v11395_v3 }
 0x323   : > { %14457 = vst [vmem:[#allocation30_spill] sm:$0xff] %v12841_v17  ;;  %v12850_v8 = vpop.permute.xlu1 %4445 }
 0x324   : > { %14460 = vst [vmem:[#allocation5_spill] sm:$0xff] %v12850_v8 }
 0x325   : > { %10095 = vmatpush3.bf16.msra.mxu1 %v11395_v3 }
 0x326   : > { %10015 = vmatmul.mubr.bf16.gmra.mrb[44].mxu0 %v3367_v43  ;;  %v12848_v47 = vpop.permute.xlu0 %4440 }
 0x327   : > { %10034 = vmatprep.mubr.bf16.mxu0 %v3729_v19  ;;  %14459 = vst [vmem:[#allocation7_spill] sm:$0xff] %v12848_v47  ;;  %v12857_v43 = vpop.permute.xlu1 %4455  ;;  %v11396_v19 = vld [vmem:[%s14263_s4 + $0x78] sm:$0xff]  }
 0x328   : > { %14462 = vst [vmem:[#allocation6_spill] sm:$0xff] %v12857_v43  ;;  %10096 = vmatprep.subr.bf16.mxu1 %v11396_v19 }
 0x329   : > { %10097 = vmatpush3.bf16.msra.mxu1 %v11396_v19 }
 0x32a   : > { %v12852_v5 = vpop.permute.xlu0 %4450 }
 0x32b   : > { %14461 = vst [vmem:[#allocation8_spill] sm:$0xff] %v12852_v5  ;;  %v12864_v36 = vpop.permute.xlu1 %4465 }
 0x32c   : > { %14464 = vst [vmem:[#allocation9_spill] sm:$0xff] %v12864_v36 }
 0x32e   : > { %10035 = vmatmul.mubr.bf16.vlgmr.msra.gmra.mrb[0].mxu0 %v3731_v24  ;;  %v12862_v31 = vpop.permute.xlu0 %4460  ;;  %v12869_v24 = vld [vmem:[%s14263_s4] sm:$0xff]  }
 0x32f   : > { %10038 = vmatprep.mubr.bf16.mxu0 %v3733_v44  ;;  %14463 = vst [vmem:[#allocation10_spill] sm:$0xff] %v12862_v31  ;;  %14465 = vst [vmem:[#allocation15_spill] sm:$0xff] %v12869_v24  ;;  %10138 = vmatprep.subr.bf16.mxu1 %v12869_v24  ;;  %v4476_v32 = vpop.permute.xlu1 %4475 }
 0x332   : > { %v4471_v44 = vpop.permute.xlu0 %4470 }
 0x334   : > { %v12747_v63 = vpop.f32.mrb[0].mxu1 }
 0x335   : > { %v12749_v30 = vpop.f32.mrb[1].mxu1 }
 0x336   : > { %10039 = vmatmul.mubr.bf16.gmra.mrb[4].mxu0 %v3735_v59  ;;  %v12754_v23 = vpop.f32.mrb[2].mxu1  ;;  %v4481_v6 = vpop.permute.xlu0 %4480 }
 0x337   : > { %10042 = vmatprep.mubr.bf16.mxu0 %v3737_v46  ;;  %v12756_v1 = vpop.f32.mrb[3].mxu1  ;;  %v4486_v59 = vpop.permute.xlu1 %4485 }
 0x33a   : > { %v12872_v46 = vpop.permute.xlu0 %4490 }
 0x33b   : > { %v12874_v35 = vpop.permute.xlu1 %4495 }
 0x33c   : > { %v12758_v42 = vpop.f32.mrb[4].mxu1 }
 0x33d   : > { %v12760_v49 = vpop.f32.mrb[5].mxu1 }
 0x33e   : > { %10043 = vmatmul.mubr.bf16.gmra.mrb[8].mxu0 %v3739_v48  ;;  %v12762_v0 = vpop.f32.mrb[6].mxu1  ;;  %v12876_v48 = vpop.permute.xlu0 %4500 }
 0x33f   : > { %v12764_v38 = vpop.f32.mrb[7].mxu1  ;;  %v12878_v55 = vpop.permute.xlu1 %4505 }
 0x342   : > { %v12885_v10 = vpop.permute.xlu0 %4510 }
 0x343   : > { %v12888_v34 = vpop.permute.xlu1 %4515 }
 0x345   : > { %v12766_v9 = vpop.f32.mrb[8].mxu1 }
 0x346   : > { %v12768_v58 = vpop.f32.mrb[9].mxu1  ;;  %v12904_v17 = vpop.permute.xlu0 %4520 }
 0x347   : > { %v12770_v52 = vpop.f32.mrb[10].mxu1 }
 0x348   : > { %v12772_v20 = vpop.f32.mrb[11].mxu1 }
 0x34d   : > { %v12774_v28 = vpop.f32.mrb[12].mxu1 }
 0x34e   : > { %v12776_v33 = vpop.f32.mrb[13].mxu1 }
 0x34f   : > { %v12778_v16 = vpop.f32.mrb[14].mxu1 }
 0x350   : > { %v12780_v25 = vpop.f32.mrb[15].mxu1 }
 0x355   : > { %v12785_v60 = vpop.f32.mrb[16].mxu1 }
 0x356   : > { %v12787_v18 = vpop.f32.mrb[17].mxu1 }
 0x357   : > { %v12789_v4 = vpop.f32.mrb[18].mxu1 }
 0x358   : > { %v12791_v22 = vpop.f32.mrb[19].mxu1 }
 0x35d   : > { %v12796_v15 = vpop.f32.mrb[20].mxu1 }
 0x35e   : > { %v12798_v12 = vpop.f32.mrb[21].mxu1 }
 0x35f   : > { %v12800_v13 = vpop.f32.mrb[22].mxu1 }
 0x360   : > { %v12802_v29 = vpop.f32.mrb[23].mxu1 }
 0x365   : > { %v12807_v14 = vpop.f32.mrb[24].mxu1 }
 0x366   : > { %v12809_v37 = vpop.f32.mrb[25].mxu1 }
 0x367   : > { %v12811_v40 = vpop.f32.mrb[26].mxu1 }
 0x368   : > { %v12813_v57 = vpop.f32.mrb[27].mxu1 }
 0x36d   : > { %v12815_v50 = vpop.f32.mrb[28].mxu1 }
 0x36e   : > { %v12817_v54 = vpop.f32.mrb[29].mxu1 }
 0x36f   : > { %v12819_v27 = vpop.f32.mrb[30].mxu1 }
 0x370   : > { %v12821_v62 = vpop.f32.mrb[31].mxu1 }
 0x375   : > { %v10080_v11 = vpop.f32.mrb[32].mxu1 }
 0x376   : > { %v12828_v26 = vpop.f32.mrb[33].mxu1 }
 0x377   : > { %14452 = vst [vmem:[#allocation20_spill] sm:$0xff] %v12828_v26  ;;  %v10081_v61 = vpop.f32.mrb[34].mxu1 }
 0x378   : > { %v12832_v2 = vpop.f32.mrb[35].mxu1 }
 0x379   : > { %14454 = vst [vmem:[#allocation25_spill] sm:$0xff] %v12832_v2 }
 0x3b9   : > { %v9984_v53 = vpop.f32.mrb[12].mxu0 }
 0x3ba   : > { %v10602_v11 = vadd.f32 %v12747_v63, %v9984_v53  ;;  %v3522_v61 = vpop.f32.mrb[13].mxu0 }
 0x3bb   : > { %v10603_v3 = vadd.f32 %v12749_v30, %v3522_v61  ;;  %v9985_v19 = vpop.f32.mrb[14].mxu0  ;;  %v12907_v61 = vpop.permute.xlu1 %4525 }
 0x3bc   : > { %v4138_v24 = vmul.f32 %v10602_v11, %v12883_v39  ;;  %v10604_v43 = vadd.f32 %v12754_v23, %v9985_v19  ;;  %v3525_v5 = vpop.f32.mrb[15].mxu0 }
 0x3bd   : > { %v4136_v36 = vmul.f32 %v10603_v3, %v12883_v39  ;;  %v10605_v63 = vadd.f32 %v12756_v1, %v3525_v5 }
 0x3be   : > { %v4192_v53 = vadd.f32 %v12893_v45, %v4138_v24  ;;  %v4139_v31 = vmul.f32 %v10604_v43, %v12883_v39 }
 0x3bf   : > { %v4190_v7 = vadd.f32 %v12893_v45, %v4136_v36  ;;  %v4137_v8 = vmul.f32 %v10605_v63, %v12883_v39 }
 0x3c0   : > { %v4193_v30 = vadd.f32 %v12893_v45, %v4139_v31  ;;  %v4284_v11 = vmul.f32 0.2, %v4192_v53  ;;  %vm4238_vm9 = vcmp.gt.f32.partialorder %v4192_v53, 0.0 }
 0x3c1   : > { %v4191_v23 = vadd.f32 %v12893_v45, %v4137_v8  ;;  %vm4236_vm8 = vcmp.gt.f32.partialorder %v4190_v7, 0.0  ;;  %v4282_v3 = vmul.f32 0.2, %v4190_v7  ;;  %v9988_v1 = vpop.f32.mrb[16].mxu0 }
 0x3c2   : > { %v10606_v5 = vadd.f32 %v12758_v42, %v9988_v1  ;;  %v3538_v43 = vpop.f32.mrb[17].mxu0  ;;  %vm4239_vm10 = vcmp.gt.f32.partialorder %v4193_v30, 0.0  ;;  %v4285_v36 = vmul.f32 0.2, %v4193_v30  ;;  %v4330_v47 = vsel %vm4238_vm9, %v4192_v53, %v4284_v11  ;;  %v12915_v1 = vpop.permute.xlu0 %4530 }
 0x3c3   : > { %v4328_v24 = vsel %vm4236_vm8, %v4190_v7, %v4282_v3  ;;  %vm4237_vm11 = vcmp.gt.f32.partialorder %v4191_v23, 0.0  ;;  %v4283_v19 = vmul.f32 0.2, %v4191_v23  ;;  %v9989_v63 = vpop.f32.mrb[18].mxu0  ;;  %v10607_v41 = vadd.f32 %v12760_v49, %v3538_v43  ;;  %v12920_v53 = vpop.permute.xlu1 %4535 }
 0x3c4   : > { %v4142_v31 = vmul.f32 %v10606_v5, %v12883_v39  ;;  %v10608_v8 = vadd.f32 %v12762_v0, %v9989_v63  ;;  %v3541_v21 = vpop.f32.mrb[19].mxu0  ;;  %v4650_v51 = vmul.f32 %v4471_v44, %v4328_v24  ;;  %v4331_v2 = vsel %vm4239_vm10, %v4193_v30, %v4285_v36 }
 0x3c5   : > { %v4329_v56 = vsel %vm4237_vm11, %v4191_v23, %v4283_v19  ;;  %v10609_v42 = vadd.f32 %v12764_v38, %v3541_v21  ;;  %v4140_v3 = vmul.f32 %v10607_v41, %v12883_v39  ;;  %v4652_v49 = vmul.f32 %v4481_v6, %v4330_v47 }
 0x3c6   : > { %v4651_v26 = vmul.f32 %v4476_v32, %v4329_v56  ;;  %v4196_v7 = vadd.f32 %v12893_v45, %v4142_v31  ;;  %v4143_v5 = vmul.f32 %v10608_v8, %v12883_v39  ;;  %v4653_v11 = vmul.f32 %v4486_v59, %v4331_v2  ;;  %v12932_v59 = vpop.permute.xlu0 %4540 }
 0x3c7   : > { %v4141_v0 = vmul.f32 %v10609_v42, %v12883_v39  ;;  %v4194_v30 = vadd.f32 %v12893_v45, %v4140_v3  ;;  %v12936_v31 = vpop.permute.xlu1 %4545 }
 0x3c8   : > { %v12923_v44 = vpack.c.bf16 %v4651_v26, %v4650_v51  ;;  %v4197_v38 = vadd.f32 %v12893_v45, %v4143_v5  ;;  %v12927_v21 = vpack.c.bf16 %v4653_v11, %v4652_v49  ;;  %vm4242_vm12 = vcmp.gt.f32.partialorder %v4196_v7, 0.0 }
 0x3c9   : > { %v4195_v56 = vadd.f32 %v12893_v45, %v4141_v0  ;;  %v9992_v32 = vpop.f32.mrb[20].mxu0  ;;  %v4288_v41 = vmul.f32 0.2, %v4196_v7  ;;  %vm4240_vm13 = vcmp.gt.f32.partialorder %v4194_v30, 0.0  ;;  %v4286_v23 = vmul.f32 0.2, %v4194_v30 }
 0x3ca   : > { %v10610_v47 = vadd.f32 %v12766_v9, %v9992_v32  ;;  %v3554_v2 = vpop.f32.mrb[21].mxu0  ;;  %vm4243_vm15 = vcmp.gt.f32.partialorder %v4197_v38, 0.0  ;;  %v4289_v3 = vmul.f32 0.2, %v4197_v38 }
 0x3cb   : > { %vm4241_vm14 = vcmp.gt.f32.partialorder %v4195_v56, 0.0  ;;  %v4287_v6 = vmul.f32 0.2, %v4195_v56  ;;  %v10611_v26 = vadd.f32 %v12768_v58, %v3554_v2  ;;  %v9993_v51 = vpop.f32.mrb[22].mxu0  ;;  %v4332_v43 = vsel %vm4240_vm13, %v4194_v30, %v4286_v23  ;;  %v12952_v23 = vpop.permute.xlu0 %4550 }
 0x3cc   : > { %v4146_v36 = vmul.f32 %v10610_v47, %v12883_v39  ;;  %v4334_v24 = vsel %vm4242_vm12, %v4196_v7, %v4288_v41  ;;  %v10612_v19 = vadd.f32 %v12770_v52, %v9993_v51  ;;  %v3557_v63 = vpop.f32.mrb[23].mxu0  ;;  %v4654_v9 = vmul.f32 %v12872_v46, %v4332_v43 }
 0x3cd   : > { %v4333_v8 = vsel %vm4241_vm14, %v4195_v56, %v4287_v6  ;;  %v4144_v42 = vmul.f32 %v10611_v26, %v12883_v39  ;;  %v10613_v11 = vadd.f32 %v12772_v20, %v3557_v63  ;;  %v4656_v7 = vmul.f32 %v12876_v48, %v4334_v24  ;;  %v12958_v6 = vpop.permute.xlu1 %4555 }
 0x3ce   : > { %v4655_v58 = vmul.f32 %v12874_v35, %v4333_v8  ;;  %v4200_v5 = vadd.f32 %v12893_v45, %v4146_v36  ;;  %v4147_v49 = vmul.f32 %v10612_v19, %v12883_v39  ;;  %v4335_v0 = vsel %vm4243_vm15, %v4197_v38, %v4289_v3 }
 0x3cf   : > { %v4198_v52 = vadd.f32 %v12893_v45, %v4144_v42  ;;  %v4657_v56 = vmul.f32 %v12878_v55, %v4335_v0  ;;  %v4145_v35 = vmul.f32 %v10613_v11, %v12883_v39 }
 0x3d0   : > { %v12947_v30 = vpack.c.bf16 %v4655_v58, %v4654_v9  ;;  %v4201_v46 = vadd.f32 %v12893_v45, %v4147_v49  ;;  %vm4246_vm9 = vcmp.gt.f32.partialorder %v4200_v5, 0.0  ;;  %v4292_v47 = vmul.f32 0.2, %v4200_v5 }
 0x3d1   : > { %vm4244_vm8 = vcmp.gt.f32.partialorder %v4198_v52, 0.0  ;;  %v4290_v32 = vmul.f32 0.2, %v4198_v52  ;;  %v9996_v41 = vpop.f32.mrb[24].mxu0  ;;  %v12954_v20 = vpack.c.bf16 %v4657_v56, %v4656_v7  ;;  %v4199_v48 = vadd.f32 %v12893_v45, %v4145_v35 }
 0x3d2   : > { %v10614_v38 = vadd.f32 %v12774_v28, %v9996_v41  ;;  %v3570_v2 = vpop.f32.mrb[25].mxu0  ;;  %vm4247_vm10 = vcmp.gt.f32.partialorder %v4201_v46, 0.0  ;;  %v4293_v43 = vmul.f32 0.2, %v4201_v46  ;;  %v4338_v9 = vsel %vm4246_vm9, %v4200_v5, %v4292_v47 }
 0x3d3   : > { %v4336_v26 = vsel %vm4244_vm8, %v4198_v52, %v4290_v32  ;;  %v10615_v55 = vadd.f32 %v12776_v33, %v3570_v2  ;;  %v9997_v51 = vpop.f32.mrb[26].mxu0  ;;  %vm4245_vm11 = vcmp.gt.f32.partialorder %v4199_v48, 0.0  ;;  %v4291_v24 = vmul.f32 0.2, %v4199_v48  ;;  %v4561_v52 = vpop.permute.xlu0 %4560 }
 0x3d4   : > { %v4658_v36 = vmul.f32 %v12885_v10, %v4336_v26  ;;  %v4150_v19 = vmul.f32 %v10614_v38, %v12883_v39  ;;  %v3573_v63 = vpop.f32.mrb[27].mxu0  ;;  %v10616_v8 = vadd.f32 %v12778_v16, %v9997_v51  ;;  %v4339_v42 = vsel %vm4247_vm10, %v4201_v46, %v4293_v43  ;;  %v12975_v46 = vpop.permute.xlu1 %4565 }
 0x3d5   : > { %v4148_v28 = vmul.f32 %v10615_v55, %v12883_v39  ;;  %v4337_v3 = vsel %vm4245_vm11, %v4199_v48, %v4291_v24  ;;  %v4660_v58 = vmul.f32 %v12904_v17, %v4338_v9  ;;  %v4661_v49 = vmul.f32 %v12907_v61, %v4339_v42 }
 0x3d6   : > { %v4204_v33 = vadd.f32 %v12893_v45, %v4150_v19  ;;  %v4659_v10 = vmul.f32 %v12888_v34, %v4337_v3  ;;  %v4151_v7 = vmul.f32 %v10616_v8, %v12883_v39  ;;  %v10617_v5 = vadd.f32 %v12780_v25, %v3573_v63 }
 0x3d7   : > { %v4202_v11 = vadd.f32 %v12893_v45, %v4148_v28  ;;  %v12973_v0 = vpack.c.bf16 %v4661_v49, %v4660_v58  ;;  %v12988_v19 = vpop.permute.xlu0 %4570 }
 0x3d8   : > { %vm4250_vm12 = vcmp.gt.f32.partialorder %v4204_v33, 0.0  ;;  %v4296_v16 = vmul.f32 0.2, %v4204_v33  ;;  %v12977_v56 = vpack.c.bf16 %v4659_v10, %v4658_v36  ;;  %v4205_v17 = vadd.f32 %v12893_v45, %v4151_v7  ;;  %v12993_v8 = vpop.permute.xlu1 %4575 }
 0x3d9   : > { %v4149_v61 = vmul.f32 %v10617_v5, %v12883_v39  ;;  %vm4248_vm13 = vcmp.gt.f32.partialorder %v4202_v11, 0.0  ;;  %v10000_v34 = vpop.f32.mrb[28].mxu0  ;;  %v4294_v35 = vmul.f32 0.2, %v4202_v11 }
 0x3da   : > { %v10618_v32 = vadd.f32 %v12785_v60, %v10000_v34  ;;  %v4342_v41 = vsel %vm4250_vm12, %v4204_v33, %v4296_v16  ;;  %v3586_v25 = vpop.f32.mrb[29].mxu0  ;;  %vm4251_vm14 = vcmp.gt.f32.partialorder %v4205_v17, 0.0  ;;  %v4297_v51 = vmul.f32 0.2, %v4205_v17 }
 0x3db   : > { %v4203_v48 = vadd.f32 %v12893_v45, %v4149_v61  ;;  %v10619_v38 = vadd.f32 %v12787_v18, %v3586_v25  ;;  %v10001_v47 = vpop.f32.mrb[30].mxu0  ;;  %v4340_v2 = vsel %vm4248_vm13, %v4202_v11, %v4294_v35  ;;  %v4664_v24 = vmul.f32 %v12932_v59, %v4342_v41  ;;  %v4581_v35 = vpop.permute.xlu0 %4580 }
 0x3dc   : > { %v4154_v26 = vmul.f32 %v10618_v32, %v12883_v39  ;;  %v10620_v55 = vadd.f32 %v12789_v4, %v10001_v47  ;;  %v3589_v43 = vpop.f32.mrb[31].mxu0  ;;  %v4343_v9 = vsel %vm4251_vm14, %v4205_v17, %v4297_v51  ;;  %v4662_v4 = vmul.f32 %v12915_v1, %v4340_v2 }
 0x3dd   : > { %vm4249_vm15 = vcmp.gt.f32.partialorder %v4203_v48, 0.0  ;;  %v4295_v36 = vmul.f32 0.2, %v4203_v48  ;;  %v4152_v60 = vmul.f32 %v10619_v38, %v12883_v39  ;;  %v10621_v28 = vadd.f32 %v12791_v22, %v3589_v43  ;;  %v4586_v38 = vpop.permute.xlu1 %4585 }
 0x3de   : > { %v4208_v63 = vadd.f32 %v12893_v45, %v4154_v26  ;;  %v4155_v18 = vmul.f32 %v10620_v55, %v12883_v39  ;;  %v4665_v59 = vmul.f32 %v12936_v31, %v4343_v9 }
 0x3df   : > { %v4341_v42 = vsel %vm4249_vm15, %v4203_v48, %v4295_v36  ;;  %v4206_v3 = vadd.f32 %v12893_v45, %v4152_v60  ;;  %v4153_v49 = vmul.f32 %v10621_v28, %v12883_v39 }
 0x3e0   : > { %v4663_v33 = vmul.f32 %v12920_v53, %v4341_v42  ;;  %v4209_v58 = vadd.f32 %v12893_v45, %v4155_v18  ;;  %vm4254_vm8 = vcmp.gt.f32.partialorder %v4208_v63, 0.0  ;;  %v13001_v10 = vpack.c.bf16 %v4665_v59, %v4664_v24 }
 0x3e1   : > { %vm4252_vm9 = vcmp.gt.f32.partialorder %v4206_v3, 0.0  ;;  %v4298_v22 = vmul.f32 0.2, %v4206_v3  ;;  %v10004_v11 = vpop.f32.mrb[32].mxu0  ;;  %v4300_v7 = vmul.f32 0.2, %v4208_v63  ;;  %v4207_v1 = vadd.f32 %v12893_v45, %v4153_v49 }
 0x3e2   : > { %v13003_v5 = vpack.c.bf16 %v4663_v33, %v4662_v4  ;;  %v10622_v16 = vadd.f32 %v12796_v15, %v10004_v11  ;;  %v3602_v31 = vpop.f32.mrb[33].mxu0  ;;  %vm4255_vm10 = vcmp.gt.f32.partialorder %v4209_v58, 0.0  ;;  %v4301_v34 = vmul.f32 0.2, %v4209_v58 }
 0x3e3   : > { %v4346_v53 = vsel %vm4254_vm8, %v4208_v63, %v4300_v7  ;;  %v10623_v17 = vadd.f32 %v12798_v12, %v3602_v31  ;;  %v10005_v61 = vpop.f32.mrb[34].mxu0  ;;  %v4344_v32 = vsel %vm4252_vm9, %v4206_v3, %v4298_v22  ;;  %vm4253_vm11 = vcmp.gt.f32.partialorder %v4207_v1, 0.0  ;;  %v4596_v3 = vpop.permute.xlu1 %4595 }
 0x3e4   : > { %v4299_v41 = vmul.f32 0.2, %v4207_v1  ;;  %v4158_v25 = vmul.f32 %v10622_v16, %v12883_v39  ;;  %v3605_v48 = vpop.f32.mrb[35].mxu0  ;;  %v4668_v47 = vmul.f32 %v4561_v52, %v4346_v53  ;;  %v10624_v15 = vadd.f32 %v12800_v13, %v10005_v61 }
 0x3e5   : > { %v4156_v2 = vmul.f32 %v10623_v17, %v12883_v39  ;;  %v4347_v26 = vsel %vm4255_vm10, %v4209_v58, %v4301_v34  ;;  %v10625_v43 = vadd.f32 %v12802_v29, %v3605_v48  ;;  %v4666_v36 = vmul.f32 %v12952_v23, %v4344_v32  ;;  %v4591_v23 = vpop.permute.xlu0 %4590 }
 0x3e6   : > { %v4345_v55 = vsel %vm4253_vm11, %v4207_v1, %v4299_v41  ;;  %v4212_v51 = vadd.f32 %v12893_v45, %v4158_v25  ;;  %v4669_v12 = vmul.f32 %v12975_v46, %v4347_v26  ;;  %v4159_v52 = vmul.f32 %v10624_v15, %v12883_v39 }
 0x3e7   : > { %v4667_v24 = vmul.f32 %v12958_v6, %v4345_v55  ;;  %v4210_v60 = vadd.f32 %v12893_v45, %v4156_v2  ;;  %v4157_v13 = vmul.f32 %v10625_v43, %v12883_v39 }
 0x3e8   : > { %v13018_v63 = vpack.c.bf16 %v4669_v12, %v4668_v47  ;;  %vm4258_vm12 = vcmp.gt.f32.partialorder %v4212_v51, 0.0  ;;  %v4304_v18 = vmul.f32 0.2, %v4212_v51  ;;  %v4213_v46 = vadd.f32 %v12893_v45, %v4159_v52 }
 0x3e9   : > { %v13021_v9 = vpack.c.bf16 %v4667_v24, %v4666_v36  ;;  %vm4256_vm13 = vcmp.gt.f32.partialorder %v4210_v60, 0.0  ;;  %v4302_v29 = vmul.f32 0.2, %v4210_v60  ;;  %v10008_v28 = vpop.f32.mrb[36].mxu0  ;;  %v4211_v6 = vadd.f32 %v12893_v45, %v4157_v13  ;;  %v4601_v48 = vpop.permute.xlu0 %4600 }
 0x3ea   : > { %v10626_v4 = vadd.f32 %v12807_v14, %v10008_v28  ;;  %v3618_v42 = vpop.f32.mrb[37].mxu0  ;;  %v4350_v33 = vsel %vm4258_vm12, %v4212_v51, %v4304_v18  ;;  %vm4259_vm15 = vcmp.gt.f32.partialorder %v4213_v46, 0.0  ;;  %v4305_v31 = vmul.f32 0.2, %v4213_v46 }
 0x3eb   : > { %v4348_v59 = vsel %vm4256_vm13, %v4210_v60, %v4302_v29  ;;  %v10627_v58 = vadd.f32 %v12809_v37, %v3618_v42  ;;  %v10009_v49 = vpop.f32.mrb[38].mxu0  ;;  %vm4257_vm14 = vcmp.gt.f32.partialorder %v4211_v6, 0.0  ;;  %v4303_v22 = vmul.f32 0.2, %v4211_v6 }
 0x3ec   : > { %v4162_v11 = vmul.f32 %v10626_v4, %v12883_v39  ;;  %v3621_v7 = vpop.f32.mrb[39].mxu0  ;;  %v10628_v16 = vadd.f32 %v12811_v40, %v10009_v49  ;;  %v4670_v53 = vmul.f32 %v12988_v19, %v4348_v59  ;;  %v4672_v37 = vmul.f32 %v4581_v35, %v4350_v33 }
 0x3ed   : > { %v4160_v1 = vmul.f32 %v10627_v58, %v12883_v39  ;;  %v10629_v14 = vadd.f32 %v12813_v57, %v3621_v7  ;;  %v4349_v17 = vsel %vm4257_vm14, %v4211_v6, %v4303_v22  ;;  %v4351_v25 = vsel %vm4259_vm15, %v4213_v46, %v4305_v31  ;;  %v4606_v57 = vpop.permute.xlu1 %4605 }
 0x3ee   : > { %v4216_v61 = vadd.f32 %v12893_v45, %v4162_v11  ;;  %v4671_v34 = vmul.f32 %v12993_v8, %v4349_v17  ;;  %v4163_v41 = vmul.f32 %v10628_v16, %v12883_v39  ;;  %v4673_v47 = vmul.f32 %v4586_v38, %v4351_v25 }
 0x3ef   : > { %v4214_v32 = vadd.f32 %v12893_v45, %v4160_v1  ;;  %v4161_v40 = vmul.f32 %v10629_v14, %v12883_v39 }
 0x3f0   : > { %vm4262_vm8 = vcmp.gt.f32.partialorder %v4216_v61, 0.0  ;;  %v4308_v2 = vmul.f32 0.2, %v4216_v61  ;;  %v13037_v15 = vpack.c.bf16 %v4671_v34, %v4670_v53  ;;  %v4217_v19 = vadd.f32 %v12893_v45, %v4163_v41 }
 0x3f1   : > { %vm4260_vm9 = vcmp.gt.f32.partialorder %v4214_v32, 0.0  ;;  %v4306_v35 = vmul.f32 0.2, %v4214_v32  ;;  %v10012_v26 = vpop.f32.mrb[40].mxu0  ;;  %v13040_v8 = vpack.c.bf16 %v4673_v47, %v4672_v37  ;;  %v4215_v55 = vadd.f32 %v12893_v45, %v4161_v40  ;;  %v4616_v59 = vpop.permute.xlu1 %4615  ;;  %v14466_v37 = vld [vmem:[#allocation20_spill] sm:$0xff] }
 0x3f2   : > { %v10630_v51 = vadd.f32 %v12815_v50, %v10012_v26  ;;  %v3634_v12 = vpop.f32.mrb[41].mxu0  ;;  %v4354_v43 = vsel %vm4262_vm8, %v4216_v61, %v4308_v2  ;;  %vm4263_vm11 = vcmp.gt.f32.partialorder %v4217_v19, 0.0  ;;  %v4309_v29 = vmul.f32 0.2, %v4217_v19  ;;  %v4611_v50 = vpop.permute.xlu0 %4610  ;;  %v14467_v2 = vld [vmem:[#allocation25_spill] sm:$0xff] }
 0x3f3   : > { %v4352_v38 = vsel %vm4260_vm9, %v4214_v32, %v4306_v35  ;;  %v10631_v36 = vadd.f32 %v12817_v54, %v3634_v12  ;;  %v10013_v24 = vpop.f32.mrb[42].mxu0  ;;  %vm4261_vm10 = vcmp.gt.f32.partialorder %v4215_v55, 0.0  ;;  %v4307_v60 = vmul.f32 0.2, %v4215_v55 }
 0x3f4   : > { %v4166_v52 = vmul.f32 %v10630_v51, %v12883_v39  ;;  %v3637_v13 = vpop.f32.mrb[43].mxu0  ;;  %v10632_v46 = vadd.f32 %v12819_v27, %v10013_v24  ;;  %v4674_v6 = vmul.f32 %v4591_v23, %v4352_v38  ;;  %v4676_v54 = vmul.f32 %v4601_v48, %v4354_v43 }
 0x3f5   : > { %v4164_v18 = vmul.f32 %v10631_v36, %v12883_v39  ;;  %v10633_v28 = vadd.f32 %v12821_v62, %v3637_v13  ;;  %v4353_v4 = vsel %vm4261_vm10, %v4215_v55, %v4307_v60  ;;  %v4355_v22 = vsel %vm4263_vm11, %v4217_v19, %v4309_v29  ;;  %v4626_v25 = vpop.permute.xlu1 %4625 }
 0x3f6   : > { %v4220_v42 = vadd.f32 %v12893_v45, %v4166_v52  ;;  %v4675_v33 = vmul.f32 %v4596_v3, %v4353_v4  ;;  %v4167_v49 = vmul.f32 %v10632_v46, %v12883_v39  ;;  %v4677_v11 = vmul.f32 %v4606_v57, %v4355_v22  ;;  %v4621_v17 = vpop.permute.xlu0 %4620 }
 0x3f7   : > { %v4218_v58 = vadd.f32 %v12893_v45, %v4164_v18  ;;  %v4165_v7 = vmul.f32 %v10633_v28, %v12883_v39 }
 0x3f8   : > { %vm4266_vm12 = vcmp.gt.f32.partialorder %v4220_v42, 0.0  ;;  %v4312_v27 = vmul.f32 0.2, %v4220_v42  ;;  %v13053_v1 = vpack.c.bf16 %v4675_v33, %v4674_v6  ;;  %v4221_v62 = vadd.f32 %v12893_v45, %v4167_v49 }
 0x3f9   : > { %vm4264_vm13 = vcmp.gt.f32.partialorder %v4218_v58, 0.0  ;;  %v4310_v23 = vmul.f32 0.2, %v4218_v58  ;;  %v10016_v16 = vpop.f32.mrb[44].mxu0  ;;  %v13056_v31 = vpack.c.bf16 %v4677_v11, %v4676_v54  ;;  %v4219_v3 = vadd.f32 %v12893_v45, %v4165_v7  ;;  %v4636_v6 = vpop.permute.xlu1 %4635 }
 0x3fa   : > { %v3650_v14 = vpop.f32.mrb[45].mxu0  ;;  %v4358_v61 = vsel %vm4266_vm12, %v4220_v42, %v4312_v27  ;;  %vm4267_vm14 = vcmp.gt.f32.partialorder %v4221_v62, 0.0  ;;  %v4313_v48 = vmul.f32 0.2, %v4221_v62  ;;  %v4631_v46 = vpop.permute.xlu0 %4630 }
 0x3fb   : > { %v4356_v53 = vsel %vm4264_vm13, %v4218_v58, %v4310_v23  ;;  %v10634_v34 = vadd.f32 %v14466_v37, %v3650_v14  ;;  %v10017_v32 = vpop.f32.mrb[46].mxu0  ;;  %vm4265_vm15 = vcmp.gt.f32.partialorder %v4219_v3, 0.0  ;;  %v4311_v41 = vmul.f32 0.2, %v4219_v3 }
 0x3fc   : > { %v3653_v47 = vpop.f32.mrb[47].mxu0  ;;  %v4678_v19 = vmul.f32 %v4611_v50, %v4356_v53  ;;  %v4680_v26 = vmul.f32 %v4621_v17, %v4358_v61  ;;  %v4359_v55 = vsel %vm4267_vm14, %v4221_v62, %v4313_v48 }
 0x3fd   : > { %v4168_v40 = vmul.f32 %v10634_v34, %v12883_v39  ;;  %v10635_v57 = vadd.f32 %v14467_v2, %v3653_v47  ;;  %v4357_v35 = vsel %vm4265_vm15, %v4219_v3, %v4311_v41  ;;  %v4681_v38 = vmul.f32 %v4626_v25, %v4359_v55  ;;  %v14468_v25 = vld [vmem:[#allocation24_spill] sm:$0xff]  ;;  %v14469_v47 = vld [vmem:[#allocation29_spill] sm:$0xff]  ;;  %v14471_v55 = vld [vmem:[#allocation26_spill] sm:$0xff] }
 0x3fe   : > { %v4679_v51 = vmul.f32 %v4616_v59, %v4357_v35  ;;  %v14470_v35 = vld [vmem:[#allocation21_spill] sm:$0xff] }
 0x3ff   : > { %v4222_v12 = vadd.f32 %v12893_v45, %v4168_v40  ;;  %v4169_v43 = vmul.f32 %v10635_v57, %v12883_v39  ;;  %v13066_v24 = vpack.c.bf16 %v4681_v38, %v4680_v26 }
 0x400   : > { %v13064_v36 = vpack.c.bf16 %v4679_v51, %v4678_v19 }
 0x401   : > { %v4223_v60 = vadd.f32 %v12893_v45, %v4169_v43  ;;  %v10036_v52 = vpop.f32.mrb[0].mxu0  ;;  %vm4268_vm8 = vcmp.gt.f32.partialorder %v4222_v12, 0.0  ;;  %v4314_v29 = vmul.f32 0.2, %v4222_v12 }
 0x402   : > { %v4126_v13 = vmul.f32 %v10036_v52, %v12883_v39  ;;  %v3882_v18 = vpop.f32.mrb[1].mxu0 }
 0x403   : > { %v4124_v28 = vmul.f32 %v12883_v39, %v3882_v18  ;;  %v10037_v50 = vpop.f32.mrb[2].mxu0  ;;  %vm4269_vm9 = vcmp.gt.f32.partialorder %v4223_v60, 0.0  ;;  %v4315_v4 = vmul.f32 0.2, %v4223_v60  ;;  %v4360_v54 = vsel %vm4268_vm8, %v4222_v12, %v4314_v29 }
 0x404   : > { %v4180_v42 = vadd.f32 %v12893_v45, %v4126_v13  ;;  %v4127_v59 = vmul.f32 %v10037_v50, %v12883_v39  ;;  %v3885_v33 = vpop.f32.mrb[3].mxu0  ;;  %v4682_v49 = vmul.f32 %v4631_v46, %v4360_v54 }
 0x405   : > { %v4178_v58 = vadd.f32 %v12893_v45, %v4124_v28  ;;  %v4125_v22 = vmul.f32 %v12883_v39, %v3885_v33  ;;  %v4361_v11 = vsel %vm4269_vm9, %v4223_v60, %v4315_v4 }
 0x406   : > { %vm4226_vm10 = vcmp.gt.f32.partialorder %v4180_v42, 0.0  ;;  %v4272_v7 = vmul.f32 0.2, %v4180_v42  ;;  %v4181_v27 = vadd.f32 %v12893_v45, %v4127_v59  ;;  %v4683_v62 = vmul.f32 %v4636_v6, %v4361_v11 }
 0x407   : > { %vm4224_vm11 = vcmp.gt.f32.partialorder %v4178_v58, 0.0  ;;  %v4270_v23 = vmul.f32 0.2, %v4178_v58  ;;  %v4179_v16 = vadd.f32 %v12893_v45, %v4125_v22 }
 0x408   : > { %v4318_v3 = vsel %vm4226_vm10, %v4180_v42, %v4272_v7  ;;  %vm4227_vm12 = vcmp.gt.f32.partialorder %v4181_v27, 0.0  ;;  %v4273_v14 = vmul.f32 0.2, %v4181_v27  ;;  %v13077_v53 = vpack.c.bf16 %v4683_v62, %v4682_v49  ;;  %v14472_v49 = vld [vmem:[#allocation7_spill] sm:$0xff] }
 0x409   : > { %v4316_v17 = vsel %vm4224_vm11, %v4178_v58, %v4270_v23  ;;  %vm4225_vm13 = vcmp.gt.f32.partialorder %v4179_v16, 0.0  ;;  %v4271_v61 = vmul.f32 0.2, %v4179_v16  ;;  %v10040_v37 = vpop.f32.mrb[4].mxu0  ;;  %v4640_v48 = vmul.f32 %v14468_v25, %v4318_v3  ;;  %v14473_v23 = vld [vmem:[#allocation30_spill] sm:$0xff]  ;;  %v14474_v3 = vld [vmem:[#allocation5_spill] sm:$0xff] }
 0x40a   : > { %v4319_v34 = vsel %vm4227_vm12, %v4181_v27, %v4273_v14  ;;  %v4130_v32 = vmul.f32 %v10040_v37, %v12883_v39  ;;  %v3898_v41 = vpop.f32.mrb[5].mxu0  ;;  %v4638_v26 = vmul.f32 %v14470_v35, %v4316_v17 }
 0x40b   : > { %v4641_v40 = vmul.f32 %v14469_v47, %v4319_v34  ;;  %v4317_v2 = vsel %vm4225_vm13, %v4179_v16, %v4271_v61  ;;  %v4128_v57 = vmul.f32 %v12883_v39, %v3898_v41  ;;  %v10041_v19 = vpop.f32.mrb[6].mxu0  ;;  %v14475_v34 = vld [vmem:[#allocation4_spill] sm:$0xff] }
 0x40c   : > { %v4639_v51 = vmul.f32 %v14471_v55, %v4317_v2  ;;  %v4184_v12 = vadd.f32 %v12893_v45, %v4130_v32  ;;  %v4131_v38 = vmul.f32 %v10041_v19, %v12883_v39  ;;  %v3901_v43 = vpop.f32.mrb[7].mxu0 }
 0x40d   : > { %v13087_v60 = vpack.c.bf16 %v4641_v40, %v4640_v48  ;;  %v4182_v52 = vadd.f32 %v12893_v45, %v4128_v57  ;;  %v4129_v13 = vmul.f32 %v12883_v39, %v3901_v43 }
 0x40e   : > { %v13091_v18 = vpack.c.bf16 %v4639_v51, %v4638_v26  ;;  %vm4230_vm14 = vcmp.gt.f32.partialorder %v4184_v12, 0.0  ;;  %v4276_v46 = vmul.f32 0.2, %v4184_v12  ;;  %v4185_v29 = vadd.f32 %v12893_v45, %v4131_v38 }
 0x40f   : > { %vm4228_vm15 = vcmp.gt.f32.partialorder %v4182_v52, 0.0  ;;  %v4274_v28 = vmul.f32 0.2, %v4182_v52  ;;  %v4183_v50 = vadd.f32 %v12893_v45, %v4129_v13  ;;  %v4748_v42 = vshll.u32 %v13087_v60, 16 }
 0x410   : > { %v4322_v6 = vsel %vm4230_vm14, %v4184_v12, %v4276_v46  ;;  %vm4231_vm8 = vcmp.gt.f32.partialorder %v4185_v29, 0.0  ;;  %v4277_v4 = vmul.f32 0.2, %v4185_v29  ;;  %v4741_v58 = vshrl.u32 %v13091_v18, 16 }
 0x411   : > { %v4320_v54 = vsel %vm4228_vm15, %v4182_v52, %v4274_v28  ;;  %vm4229_vm9 = vcmp.gt.f32.partialorder %v4183_v50, 0.0  ;;  %v4275_v59 = vmul.f32 0.2, %v4183_v50  ;;  %v10044_v33 = vpop.f32.mrb[8].mxu0  ;;  %v4644_v22 = vmul.f32 %v14472_v49, %v4322_v6  ;;  %v14478_v49 = vld [vmem:[#allocation8_spill] sm:$0xff] }
 0x412   : > { %v4323_v11 = vsel %vm4231_vm8, %v4185_v29, %v4277_v4  ;;  %v4134_v7 = vmul.f32 %v10044_v33, %v12883_v39  ;;  %v3914_v27 = vpop.f32.mrb[9].mxu0  ;;  %v4743_v62 = vshll.u32 %v13091_v18, 16  ;;  %v4642_v16 = vmul.f32 %v14473_v23, %v4320_v54  ;;  %v14476_v4 = vld [vmem:[#allocation10_spill] sm:$0xff]  ;;  %v14477_v54 = vld [vmem:[#allocation9_spill] sm:$0xff] }
 0x413   : > { %v4645_v14 = vmul.f32 %v14474_v3, %v4323_v11  ;;  %v4321_v17 = vsel %vm4229_vm9, %v4183_v50, %v4275_v59  ;;  %v4132_v61 = vmul.f32 %v12883_v39, %v3914_v27  ;;  %v10045_v37 = vpop.f32.mrb[10].mxu0  ;;  %v4750_v19 = vrot.slane %v4748_v42, 1  ;;  %v14479_v11 = vld [vmem:[#allocation6_spill] sm:$0xff] }
 0x414   : > { %v4643_v32 = vmul.f32 %v14475_v34, %v4321_v17  ;;  %v4188_v41 = vadd.f32 %v12893_v45, %v4134_v7  ;;  %v4135_v25 = vmul.f32 %v10045_v37, %v12883_v39  ;;  %v3917_v48 = vpop.f32.mrb[11].mxu0  ;;  %v4745_v47 = vrot.slane %v4743_v62, 1  ;;  %v14480_v37 = vld [vmem:[#allocation15_spill] sm:$0xff] }
 0x415   : > { %v13106_v40 = vpack.c.bf16 %v4645_v14, %v4644_v22  ;;  %v4186_v2 = vadd.f32 %v12893_v45, %v4132_v61  ;;  %v4133_v57 = vmul.f32 %v12883_v39, %v3917_v48  ;;  %v4752_v13 = vshrl.u32 %v13087_v60, 16  ;;  %v11399_v48 = vld [vmem:[%s14263_s4 + $0x10] sm:$0xff]  }
 0x416   : > { %v13112_v35 = vpack.c.bf16 %v4643_v32, %v4642_v16  ;;  %vm4234_vm10 = vcmp.gt.f32.partialorder %v4188_v41, 0.0  ;;  %v4280_v26 = vmul.f32 0.2, %v4188_v41  ;;  %v4189_v55 = vadd.f32 %v12893_v45, %v4135_v25  ;;  %v11398_v16 = vld [vmem:[%s14263_s4 + $0x8] sm:$0xff]  }
 0x417   : > { %vm4232_vm11 = vcmp.gt.f32.partialorder %v4186_v2, 0.0  ;;  %v4278_v51 = vmul.f32 0.2, %v4186_v2  ;;  %v4187_v12 = vadd.f32 %v12893_v45, %v4133_v57  ;;  %v4746_v38 = vor.u32 %v4745_v47, %v4741_v58 }
 0x418   : > { %v4326_v43 = vsel %vm4234_vm10, %v4188_v41, %v4280_v26  ;;  %vm4235_vm12 = vcmp.gt.f32.partialorder %v4189_v55, 0.0  ;;  %v4281_v52 = vmul.f32 0.2, %v4189_v55  ;;  %v4754_v50 = vor.u32 %v4752_v13, %v4750_v19 }
 0x419   : > { %v4324_v39 = vsel %vm4232_vm11, %v4186_v2, %v4278_v51  ;;  %vm4233_vm13 = vcmp.gt.f32.partialorder %v4187_v12, 0.0  ;;  %v4279_v46 = vmul.f32 0.2, %v4187_v12  ;;  %v4751_v28 = vsel %vm367_vm0, %v4746_v38, %v4750_v19 }
 0x41a   : > { %v4327_v29 = vsel %vm4235_vm12, %v4189_v55, %v4281_v52  ;;  %v13121_v6 = vshll.u32 %v13112_v35, 16  ;;  %v4648_v45 = vmul.f32 %v14476_v4, %v4326_v43  ;;  %10098 = vmatprep.mubr.bf16.mxu1 %v4751_v28  ;;  %v13126_v58 = vshll.u32 %v13106_v40, 16 }
 0x41b   : > { %v4649_v59 = vmul.f32 %v14477_v54, %v4327_v29  ;;  %v4325_v33 = vsel %vm4233_vm13, %v4187_v12, %v4279_v46  ;;  %v4646_v22 = vmul.f32 %v14478_v49, %v4324_v39  ;;  %v13132_v62 = vshrl.u32 %v13112_v35, 16  ;;  %v11400_v12 = vld [vmem:[%s14263_s4 + $0x18] sm:$0xff]   ;;  %v11401_v29 = vld [vmem:[%s14263_s4 + $0x20] sm:$0xff]   ;;  %v11402_v54 = vld [vmem:[%s14263_s4 + $0x28] sm:$0xff]  }
 0x41c   : > { %v4647_v7 = vmul.f32 %v14479_v11, %v4325_v33  ;;  %v4758_v27 = vrot.slane %v13121_v6, 1  ;;  %v4766_v61 = vrot.slane %v13126_v58, 1  ;;  %v13147_v32 = vshrl.u32 %v13106_v40, 16 }
 0x41d   : > { %v13134_v23 = vpack.c.bf16 %v4649_v59, %v4648_v45  ;;  %v13164_v19 = vshll.u32 %v12923_v44, 16  ;;  %v13178_v39 = vshrl.u32 %v12923_v44, 16  ;;  %v13181_v46 = vshll.u32 %v12927_v21, 16 }
 0x41e   : > { %v13139_v3 = vpack.c.bf16 %v4647_v7, %v4646_v22  ;;  %v4759_v14 = vsel %vm367_vm0, %v4754_v50, %v4758_v27  ;;  %v4762_v17 = vor.u32 %v13132_v62, %v4758_v27  ;;  %v4770_v47 = vor.u32 %v13147_v32, %v4766_v61  ;;  %v11403_v7 = vld [vmem:[%s14263_s4 + $0x30] sm:$0xff]  }
 0x41f   : > { %10099 = vmatmul.mubr.bf16.vlgmr.msra.gmra.mrb[36].mxu1 %v4759_v14  ;;  %v13153_v25 = vshll.u32 %v13134_v23, 16  ;;  %v4790_v43 = vrot.slane %v13164_v19, 1  ;;  %v13175_v52 = vshrl.u32 %v13134_v23, 16  ;;  %v13189_v4 = vshll.u32 %v12947_v30, 16 }
 0x420   : > { %10139 = vmatpush3.bf16.msra.mxu1 %v14480_v37  ;;  %v4767_v34 = vsel %vm367_vm0, %v4762_v17, %v4766_v61  ;;  %v13150_v41 = vshll.u32 %v13139_v3, 16  ;;  %v13161_v57 = vshrl.u32 %v13139_v3, 16  ;;  %v4798_v45 = vrot.slane %v13181_v46, 1  ;;  %v11404_v37 = vld [vmem:[%s14263_s4 + $0x38] sm:$0xff]  }
 0x421   : > { %10102 = vmatprep.mubr.bf16.mxu1 %v4767_v34  ;;  %10140 = vmatprep.subr.bf16.mxu1 %v11398_v16  ;;  %v4782_v51 = vrot.slane %v13153_v25, 1  ;;  %v4794_v50 = vor.u32 %v13178_v39, %v4790_v43  ;;  %v4806_v49 = vrot.slane %v13189_v4, 1  ;;  %v13199_v22 = vshrl.u32 %v12947_v30, 16 }
 0x422   : > { %v4774_v2 = vrot.slane %v13150_v41, 1  ;;  %v13202_v11 = vshll.u32 %v12954_v20, 16  ;;  %v13208_v27 = vshrl.u32 %v12927_v21, 16  ;;  %v13212_v14 = vshll.u32 %v12977_v56, 16 }
 0x423   : > { %v4786_v28 = vor.u32 %v13175_v52, %v4782_v51  ;;  %v4799_v33 = vsel %vm367_vm0, %v4794_v50, %v4798_v45 }
 0x424   : > { %v4775_v26 = vsel %vm367_vm0, %v4770_v47, %v4774_v2  ;;  %v4778_v55 = vor.u32 %v13161_v57, %v4774_v2  ;;  %10141 = vmatpush3.bf16.msra.mxu1 %v11398_v16  ;;  %v4810_v16 = vor.u32 %v13199_v22, %v4806_v49  ;;  %v4802_v17 = vor.u32 %v13208_v27, %v4798_v45 }
 0x425   : > { %10142 = vmatprep.subr.bf16.mxu1 %v11399_v48  ;;  %v4791_v59 = vsel %vm367_vm0, %v4786_v28, %v4790_v43  ;;  %v4814_v61 = vrot.slane %v13202_v11, 1  ;;  %v4822_v47 = vrot.slane %v13212_v14, 1  ;;  %v13223_v2 = vshrl.u32 %v12977_v56, 16 }
 0x426   : > { %v4783_v38 = vsel %vm367_vm0, %v4778_v55, %v4782_v51  ;;  %v4807_v34 = vsel %vm367_vm0, %v4802_v17, %v4806_v49  ;;  %v13231_v55 = vld [vmem:[%s14263_s4 + $0x80] sm:$0xff]   ;;  %v13234_v51 = vshrl.u32 %v12954_v20, 16  ;;  %v13258_v49 = vshll.u32 %v13001_v10, 16 }
 0x427   : > { %10103 = vmatmul.mubr.bf16.gmra.mrb[40].mxu1 %v4775_v26  ;;  %v13226_v26 = vshll.u32 %v12973_v0, 16  ;;  %v13267_v17 = vshll.u32 %v13021_v9, 16 }
 0x428   : > { %10106 = vmatprep.mubr.bf16.mxu1 %v4783_v38  ;;  %10143 = vmatpush3.bf16.msra.mxu1 %v11399_v48  ;;  %v4815_v48 = vsel %vm367_vm0, %v4810_v16, %v4814_v61  ;;  %v13238_v38 = vshll.u32 %v13003_v5, 16  ;;  %v4818_v43 = vor.u32 %v13234_v51, %v4814_v61  ;;  %14483 = vst [vmem:[#allocation12_spill] sm:$0xff] %v13258_v49  ;;  %v13263_v16 = vshrl.u32 %v12973_v0, 16 }
 0x429   : > { %10144 = vmatprep.subr.bf16.mxu1 %v11400_v12  ;;  %14484 = vst [vmem:[#allocation17_spill] sm:$0xff] %v13267_v17  ;;  %v4846_v61 = vrot.slane %v13258_v49, 1 }
 0x42a   : > { %14481 = vst [vmem:[#allocation11_spill] sm:$0xff] %v13238_v38  ;;  %v4823_v28 = vsel %vm367_vm0, %v4818_v43, %v4822_v47  ;;  %v4838_v45 = vrot.slane %v13238_v38, 1  ;;  %v13281_v43 = vshrl.u32 %v13001_v10, 16 }
 0x42c   : > { %10145 = vmatpush3.bf16.msra.mxu1 %v11400_v12  ;;  %v4826_v12 = vor.u32 %v13223_v2, %v4822_v47  ;;  %v13275_v47 = vshrl.u32 %v13021_v9, 16  ;;  %14487 = vst [vmem:[#allocation19_spill] sm:$0xff] %v13281_v43 }
 0x42d   : > { %10146 = vmatprep.subr.bf16.mxu1 %v11401_v29 }
 0x42e   : > { %14485 = vst [vmem:[#allocation13_spill] sm:$0xff] %v13275_v47 }
 0x42f   : > { %10107 = vmatmul.mubr.bf16.gmra.mrb[44].mxu1 %v4791_v59  ;;  %v13252_v59 = vrot.slane %v4748_v42, 3 }
 0x430   : > { %10110 = vmatprep.mubr.bf16.mxu1 %v4799_v33  ;;  %10147 = vmatpush3.bf16.msra.mxu1 %v11401_v29  ;;  %v4830_v29 = vrot.slane %v13226_v26, 1  ;;  %v13255_v33 = vshrl.u32 %v13003_v5, 16 }
 0x431   : > { %10148 = vmatprep.subr.bf16.mxu1 %v11402_v54 }
 0x432   : > { %v4831_v50 = vsel %vm367_vm0, %v4826_v12, %v4830_v29  ;;  %14482 = vst [vmem:[#allocation16_spill] sm:$0xff] %v13255_v33  ;;  %v4834_v42 = vor.u32 %v13263_v16, %v4830_v29  ;;  %v13278_v12 = vshll.u32 %v13018_v63, 16 }
 0x434   : > { %10149 = vmatpush3.bf16.msra.mxu1 %v11402_v54  ;;  %v13248_v54 = vrot.slane %v4752_v13, 2  ;;  %v4842_v13 = vor.u32 %v13255_v33, %v4838_v45  ;;  %14486 = vst [vmem:[#allocation14_spill] sm:$0xff] %v13278_v12 }
 0x435   : > { %10150 = vmatprep.subr.bf16.mxu1 %v11403_v7 }
 0x437   : > { %10111 = vmatmul.mubr.bf16.gmra.mrb[48].mxu1 %v4807_v34  ;;  %v4847_v34 = vsel %vm367_vm0, %v4842_v13, %v4846_v61 }
 0x438   : > { %10114 = vmatprep.mubr.bf16.mxu1 %v4815_v48  ;;  %10151 = vmatpush3.bf16.msra.mxu1 %v11403_v7  ;;  %v4854_v48 = vrot.slane %v13267_v17, 1  ;;  %v13296_v7 = vshll.u32 %v13040_v8, 16  ;;  %v13299_v17 = vshrl.u32 %v13018_v63, 16 }
 0x439   : > { %10152 = vmatprep.subr.bf16.mxu1 %v11404_v37 }
 0x43a   : > { %v4858_v29 = vor.u32 %v13275_v47, %v4854_v48  ;;  %14490 = vst [vmem:[#allocation22_spill] sm:$0xff] %v13296_v7  ;;  %14491 = vst [vmem:[#allocation28_spill] sm:$0xff] %v13299_v17  ;;  %v13317_v47 = vshrl.u32 %v13040_v8, 16 }
 0x43c   : > { %10153 = vmatpush3.bf16.msra.mxu1 %v11404_v37  ;;  %v4839_v37 = vsel %vm367_vm0, %v4834_v42, %v4838_v45  ;;  %v4862_v45 = vrot.slane %v13278_v12, 1  ;;  %v13303_v12 = vshll.u32 %v13053_v1, 16  ;;  %14495 = vst [vmem:[#allocation34_spill] sm:$0xff] %v13317_v47 }
 0x43d   : > { %10194 = vmatprep.subr.bf16.mxu1 %v13231_v55 }
 0x43e   : > { %v4863_v42 = vsel %vm367_vm0, %v4858_v29, %v4862_v45  ;;  %14492 = vst [vmem:[#allocation27_spill] sm:$0xff] %v13303_v12  ;;  %v4878_v29 = vrot.slane %v13296_v7, 1 }
 0x43f   : > { %10115 = vmatmul.mubr.bf16.gmra.mrb[52].mxu1 %v4823_v28  ;;  %v13285_v28 = vshll.u32 %v13037_v15, 16 }
 0x440   : > { %10118 = vmatprep.mubr.bf16.mxu1 %v4831_v50  ;;  %v4850_v50 = vor.u32 %v13281_v43, %v4846_v61  ;;  %v4882_v7 = vor.u32 %v13317_v47, %v4878_v29 }
 0x441   : > { %14488 = vst [vmem:[#allocation18_spill] sm:$0xff] %v13285_v28 }
 0x442   : > { %v4855_v13 = vsel %vm367_vm0, %v4850_v50, %v4854_v48  ;;  %v4866_v48 = vor.u32 %v13299_v17, %v4862_v45 }
 0x447   : > { %10119 = vmatmul.mubr.bf16.gmra.mrb[56].mxu1 %v4839_v37  ;;  %v4870_v37 = vrot.slane %v13285_v28, 1  ;;  %v13311_v28 = vshrl.u32 %v13053_v1, 16 }
 0x448   : > { %10122 = vmatprep.mubr.bf16.mxu1 %v4847_v34  ;;  %v13293_v34 = vshrl.u32 %v13037_v15, 16 }
 0x449   : > { %v4871_v50 = vsel %vm367_vm0, %v4866_v48, %v4870_v37  ;;  %14493 = vst [vmem:[#allocation32_spill] sm:$0xff] %v13311_v28  ;;  %v13324_v48 = vshll.u32 %v13064_v36, 16 }
 0x44a   : > { %14489 = vst [vmem:[#allocation23_spill] sm:$0xff] %v13293_v34  ;;  %v4874_v61 = vor.u32 %v13293_v34, %v4870_v37  ;;  %v13314_v34 = vshll.u32 %v13056_v31, 16 }
 0x44b   : > { %14496 = vst [vmem:[#allocation33_spill] sm:$0xff] %v13324_v48 }
 0x44c   : > { %14494 = vst [vmem:[#allocation31_spill] sm:$0xff] %v13314_v34  ;;  %v4894_v37 = vrot.slane %v13314_v34, 1  ;;  %v7370_v34 = vshrl.u32 %v13077_v53, 16 }
 0x44f   : > { %10123 = vmatmul.mubr.bf16.gmra.mrb[60].mxu1 %v4855_v13  ;;  %v4879_v13 = vsel %vm367_vm0, %v4874_v61, %v4878_v29 }
 0x450   : > { %10126 = vmatprep.mubr.bf16.mxu1 %v4863_v42  ;;  %v4886_v42 = vrot.slane %v13303_v12, 1  ;;  %v4902_v12 = vrot.slane %v13324_v48, 1 }
 0x452   : > { %v4890_v45 = vor.u32 %v13311_v28, %v4886_v42  ;;  %v4887_v61 = vsel %vm367_vm0, %v4882_v7, %v4886_v42  ;;  %v11406_v7 = vld [vmem:[%s14263_s4 + $0x88] sm:$0xff]   ;;  %v11407_v42 = vld [vmem:[%s14263_s4 + $0x90] sm:$0xff]  }
 0x457   : > { %10127 = vmatmul.mubr.bf16.gmra.mrb[64].mxu1 %v4871_v50  ;;  %v4895_v50 = vsel %vm367_vm0, %v4890_v45, %v4894_v37  ;;  %v14350_v45 = vshrl.u32 %v13066_v24, 16 }
 0x458   : > { %10130 = vmatprep.mubr.bf16.mxu1 %v4879_v13  ;;  %v13328_v13 = vshrl.u32 %v13056_v31, 16 }
 0x45a   : > { %14497 = vst [vmem:[#allocation2_spill] sm:$0xff] %v13328_v13  ;;  %v4898_v28 = vor.u32 %v13328_v13, %v4894_v37  ;;  %v11409_v37 = vld [vmem:[%s14263_s4 + $0xa0] sm:$0xff]   ;;  %v11410_v13 = vld [vmem:[%s14263_s4 + $0xa8] sm:$0xff]  }
 0x45c   : > { %v4903_v29 = vsel %vm367_vm0, %v4898_v28, %v4902_v12  ;;  %v11408_v12 = vld [vmem:[%s14263_s4 + $0x98] sm:$0xff]   ;;  %v14346_v28 = vshrl.u32 %v13064_v36, 16 }
 0x45f   : > { %10131 = vmatmul.mubr.bf16.gmra.mrb[68].mxu1 %v4887_v61  ;;  %v7361_v61 = vrot.slane %v14346_v28, 4  ;;  %v7373_v28 = vshll.u32 %v13077_v53, 16 }
 0x460   : > { %10134 = vmatprep.mubr.bf16.mxu1 %v4895_v50  ;;  %v7362_v50 = vrot.slane %v13324_v48, 5  ;;  %v7372_v48 = vrot.slane %v7370_v34, 4  ;;  %v11412_v34 = vld [vmem:[%s14263_s4 + $0xb8] sm:$0xff]  }
 0x467   : > { %10135 = vmatmul.mubr.bf16.gmra.mrb[72].mxu1 %v4903_v29  ;;  %v7365_v29 = vrot.slane %v14350_v45, 4  ;;  %v7375_v45 = vrot.slane %v7373_v28, 5  ;;  %v11413_v28 = vld [vmem:[%s14263_s4 + $0xc0] sm:$0xff]  }
 0x468   : > { %10154 = vmatprep.mubr.bf16.mxu1 %v13091_v18 }
 0x46f   : > { %10155 = vmatmul.mubr.bf16.vlgmr.msra.gmra.mrb[36].mxu1 %v13087_v60 }
 0x470   : > { %10158 = vmatprep.mubr.bf16.mxu1 %v13112_v35  ;;  %10195 = vmatpush3.bf16.msra.mxu1 %v13231_v55  ;;  %v14351_v55 = vshll.u32 %v13066_v24, 16 }
 0x471   : > { %10196 = vmatprep.subr.bf16.mxu1 %v11406_v7 }
 0x474   : > { %10197 = vmatpush3.bf16.msra.mxu1 %v11406_v7  ;;  %v13359_v7 = vor.u32 %v7362_v50, %v7361_v61  ;;  %v11411_v61 = vld [vmem:[%s14263_s4 + $0xb0] sm:$0xff]   ;;  %v7376_v50 = vor.u32 %v7375_v45, %v7372_v48  ;;  %v5445_v48 = vrot.slane %v13087_v60, 1  ;;  %v5447_v45 = vrot.slane %v13112_v35, 1 }
 0x475   : > { %10198 = vmatprep.subr.bf16.mxu1 %v11407_v42 }
 0x476   : > { %14498 = vst [vmem:[#allocation3_spill] sm:$0xff] %v13359_v7 }
 0x477   : > { %10159 = vmatmul.mubr.bf16.gmra.mrb[40].mxu1 %v13106_v40 }
 0x478   : > { %10162 = vmatprep.mubr.bf16.mxu1 %v13139_v3  ;;  %10199 = vmatpush3.bf16.msra.mxu1 %v11407_v42  ;;  %v7366_v42 = vrot.slane %v14351_v55, 5 }
 0x479   : > { %10200 = vmatprep.subr.bf16.mxu1 %v11408_v12 }
 0x47a   : > { %v7367_v47 = vor.u32 %v7366_v42, %v7365_v29  ;;  %v11414_v29 = vld [vmem:[%s14263_s4 + $0xc8] sm:$0xff]   ;;  %v5448_v42 = vsel %vm1166_vm1, %v5445_v48, %v5447_v45 }
 0x47c   : > { %10201 = vmatpush3.bf16.msra.mxu1 %v11408_v12  ;;  %v13372_v12 = vsel %vm3261_vm7, %v13359_v7, %v7367_v47  ;;  %v13378_v55 = vsel %vm3261_vm7, %v7367_v47, %v7376_v50  ;;  %v5444_v47 = vrot.slane %v13091_v18, 1  ;;  %v5451_v50 = vrot.slane %v13139_v3, 1 }
 0x47d   : > { %10202 = vmatprep.subr.bf16.mxu1 %v11409_v37  ;;  %14499 = vst [vmem:[#allocation20_spill] sm:$0xff] %v13372_v12  ;;  %14500 = vst [vmem:[#allocation25_spill] sm:$0xff] %v13378_v55  ;;  %v6171_v55 = vrot.slane %v13126_v58, 3  ;;  %v6175_v12 = vrot.slane %v13150_v41, 3 }
 0x47f   : > { %10163 = vmatmul.mubr.bf16.gmra.mrb[44].mxu1 %v13134_v23 }
 0x480   : > { %10166 = vmatprep.mubr.bf16.mxu1 %v12923_v44  ;;  %10203 = vmatpush3.bf16.msra.mxu1 %v11409_v37  ;;  %v5449_v37 = vrot.slane %v13106_v40, 1 }
 0x481   : > { %10204 = vmatprep.subr.bf16.mxu1 %v11410_v13 }
 0x482   : > { %v5450_v18 = vsel %vm1166_vm1, %v5447_v45, %v5449_v37  ;;  %v5455_v45 = vrot.slane %v12923_v44, 1 }
 0x484   : > { %10205 = vmatpush3.bf16.msra.mxu1 %v11410_v13  ;;  %v5446_v13 = vsel %vm1166_vm1, %v5444_v47, %v5445_v48  ;;  %v11416_v47 = vld [vmem:[%s14263_s4 + $0xd8] sm:$0xff]   ;;  %v5452_v48 = vsel %vm1166_vm1, %v5449_v37, %v5451_v50  ;;  %v11418_v37 = vld [vmem:[%s14263_s4 + $0xe8] sm:$0xff]  }
 0x485   : > { %10206 = vmatprep.subr.bf16.mxu1 %v11411_v61 }
 0x487   : > { %10167 = vmatmul.mubr.bf16.gmra.mrb[48].mxu1 %v12927_v21 }
 0x488   : > { %10170 = vmatprep.mubr.bf16.mxu1 %v12947_v30  ;;  %10207 = vmatpush3.bf16.msra.mxu1 %v11411_v61  ;;  %v11415_v61 = vld [vmem:[%s14263_s4 + $0xd0] sm:$0xff]  }
 0x489   : > { %10208 = vmatprep.subr.bf16.mxu1 %v11412_v34 }
 0x48c   : > { %10209 = vmatpush3.bf16.msra.mxu1 %v11412_v34  ;;  %v5453_v34 = vrot.slane %v13134_v23, 1 }
 0x48d   : > { %10250 = vmatprep.subr.bf16.mxu1 %v11413_v28 }
 0x48f   : > { %10171 = vmatmul.mubr.bf16.gmra.mrb[52].mxu1 %v12954_v20 }
 0x490   : > { %10174 = vmatprep.mubr.bf16.mxu1 %v12977_v56 }
 0x497   : > { %10175 = vmatmul.mubr.bf16.gmra.mrb[56].mxu1 %v12973_v0 }
 0x498   : > { %10178 = vmatprep.mubr.bf16.mxu1 %v13003_v5 }
 0x49f   : > { %10179 = vmatmul.mubr.bf16.gmra.mrb[60].mxu1 %v13001_v10 }
 0x4a0   : > { %10182 = vmatprep.mubr.bf16.mxu1 %v13021_v9 }
 0x4a7   : > { %10183 = vmatmul.mubr.bf16.gmra.mrb[64].mxu1 %v13018_v63 }
 0x4a8   : > { %10186 = vmatprep.mubr.bf16.mxu1 %v13037_v15 }
 0x4af   : > { %10187 = vmatmul.mubr.bf16.gmra.mrb[68].mxu1 %v13040_v8 }
 0x4b0   : > { %10190 = vmatprep.mubr.bf16.mxu1 %v13053_v1 }
 0x4b7   : > { %10191 = vmatmul.mubr.bf16.gmra.mrb[72].mxu1 %v13056_v31 }
 0x4b8   : > { %10210 = vmatprep.mubr.bf16.mxu1 %v5446_v13  ;;  %v11417_v13 = vld [vmem:[%s14263_s4 + $0xe0] sm:$0xff]  }
 0x4bf   : > { %10211 = vmatmul.mubr.bf16.vlgmr.msra.gmra.mrb[36].mxu1 %v5448_v42  ;;  %v5456_v42 = vsel %vm1166_vm1, %v5453_v34, %v5455_v45 }
 0x4c0   : > { %10214 = vmatprep.mubr.bf16.mxu1 %v5450_v18  ;;  %10251 = vmatpush3.bf16.msra.mxu1 %v11413_v28  ;;  %v5454_v28 = vsel %vm1166_vm1, %v5451_v50, %v5453_v34  ;;  %v5459_v50 = vrot.slane %v12947_v30, 1  ;;  %v11420_v34 = vld [vmem:[%s14263_s4 + $0xf8] sm:$0xff]  }
 0x4c1   : > { %10252 = vmatprep.subr.bf16.mxu1 %v11414_v29 }
 0x4c4   : > { %10253 = vmatpush3.bf16.msra.mxu1 %v11414_v29  ;;  %v5457_v29 = vrot.slane %v12927_v21, 1 }
 0x4c5   : > { %10254 = vmatprep.subr.bf16.mxu1 %v11415_v61 }
 0x4c6   : > { %v5458_v18 = vsel %vm1166_vm1, %v5455_v45, %v5457_v29  ;;  %v5463_v45 = vrot.slane %v12977_v56, 1 }
 0x4c7   : > { %10215 = vmatmul.mubr.bf16.gmra.mrb[40].mxu1 %v5452_v48  ;;  %v5460_v48 = vsel %vm1166_vm1, %v5457_v29, %v5459_v50 }
 0x4c8   : > { %10218 = vmatprep.mubr.bf16.mxu1 %v5454_v28  ;;  %10255 = vmatpush3.bf16.msra.mxu1 %v11415_v61  ;;  %v11419_v61 = vld [vmem:[%s14263_s4 + $0xf0] sm:$0xff]  }
 0x4c9   : > { %10256 = vmatprep.subr.bf16.mxu1 %v11416_v47 }
 0x4cc   : > { %10257 = vmatpush3.bf16.msra.mxu1 %v11416_v47  ;;  %v5461_v47 = vrot.slane %v12954_v20, 1 }
 0x4cd   : > { %10258 = vmatprep.subr.bf16.mxu1 %v11417_v13 }
 0x4ce   : > { %v5462_v28 = vsel %vm1166_vm1, %v5459_v50, %v5461_v47 }
 0x4cf   : > { %10219 = vmatmul.mubr.bf16.gmra.mrb[44].mxu1 %v5456_v42  ;;  %v5464_v42 = vsel %vm1166_vm1, %v5461_v47, %v5463_v45 }
 0x4d0   : > { %10222 = vmatprep.mubr.bf16.mxu1 %v5458_v18  ;;  %10259 = vmatpush3.bf16.msra.mxu1 %v11417_v13  ;;  %v11421_v13 = vld [vmem:[%s14263_s4 + $0x100] sm:$0xff]   ;;  %v5467_v18 = vrot.slane %v13003_v5, 1 }
 0x4d1   : > { %10260 = vmatprep.subr.bf16.mxu1 %v11418_v37 }
 0x4d4   : > { %10261 = vmatpush3.bf16.msra.mxu1 %v11418_v37  ;;  %v5465_v37 = vrot.slane %v12973_v0, 1 }
 0x4d5   : > { %10262 = vmatprep.subr.bf16.mxu1 %v11419_v61 }
 0x4d6   : > { %v5466_v29 = vsel %vm1166_vm1, %v5463_v45, %v5465_v37  ;;  %v5468_v50 = vsel %vm1166_vm1, %v5465_v37, %v5467_v18 }
 0x4d7   : > { %10223 = vmatmul.mubr.bf16.gmra.mrb[48].mxu1 %v5460_v48 }
 0x4d8   : > { %10226 = vmatprep.mubr.bf16.mxu1 %v5462_v28  ;;  %10263 = vmatpush3.bf16.msra.mxu1 %v11419_v61  ;;  %v5469_v61 = vrot.slane %v13001_v10, 1  ;;  %v5471_v28 = vrot.slane %v13021_v9, 1 }
 0x4d9   : > { %10264 = vmatprep.subr.bf16.mxu1 %v11420_v34 }
 0x4da   : > { %v5470_v48 = vsel %vm1166_vm1, %v5467_v18, %v5469_v61  ;;  %v5472_v47 = vsel %vm1166_vm1, %v5469_v61, %v5471_v28 }
 0x4dc   : > { %10265 = vmatpush3.bf16.msra.mxu1 %v11420_v34  ;;  %v5473_v34 = vrot.slane %v13018_v63, 1 }
 0x4dd   : > { %10306 = vmatprep.subr.bf16.mxu1 %v11421_v13 }
 0x4de   : > { %v5474_v45 = vsel %vm1166_vm1, %v5471_v28, %v5473_v34 }
 0x4df   : > { %10227 = vmatmul.mubr.bf16.gmra.mrb[52].mxu1 %v5464_v42  ;;  %v5475_v42 = vrot.slane %v13037_v15, 1 }
 0x4e0   : > { %10230 = vmatprep.mubr.bf16.mxu1 %v5466_v29  ;;  %v5477_v29 = vrot.slane %v13040_v8, 1 }
 0x4e1   : > { %v5476_v37 = vsel %vm1166_vm1, %v5473_v34, %v5475_v42  ;;  %v5804_v34 = vrot.slane %v13087_v60, 2 }
 0x4e2   : > { %v5478_v18 = vsel %vm1166_vm1, %v5475_v42, %v5477_v29 }
 0x4e7   : > { %10231 = vmatmul.mubr.bf16.gmra.mrb[56].mxu1 %v5468_v50  ;;  %v5479_v50 = vrot.slane %v13053_v1, 1 }
 0x4e8   : > { %10234 = vmatprep.mubr.bf16.mxu1 %v5470_v48  ;;  %v5481_v48 = vrot.slane %v13056_v31, 1 }
 0x4e9   : > { %v5480_v61 = vsel %vm1166_vm1, %v5477_v29, %v5479_v50  ;;  %v5809_v29 = vrot.slane %v13139_v3, 2 }
 0x4ea   : > { %v5482_v28 = vsel %vm1166_vm1, %v5479_v50, %v5481_v48  ;;  %v11422_v50 = vld [vmem:[%s14263_s4 + $0x108] sm:$0xff]  }
 0x4ef   : > { %10235 = vmatmul.mubr.bf16.gmra.mrb[60].mxu1 %v5472_v47  ;;  %v5483_v47 = vrot.slane %v13064_v36, 1 }
 0x4f0   : > { %10238 = vmatprep.mubr.bf16.mxu1 %v5474_v45  ;;  %v5805_v45 = vrot.slane %v13112_v35, 2 }
 0x4f2   : > { %v5806_v42 = vsel %vm1573_vm2, %v5804_v34, %v5805_v45  ;;  %v5813_v34 = vrot.slane %v12923_v44, 2 }
 0x4f7   : > { %10239 = vmatmul.mubr.bf16.gmra.mrb[64].mxu1 %v5476_v37  ;;  %v5484_v37 = vsel %vm1166_vm1, %v5481_v48, %v5483_v47  ;;  %v11423_v48 = vld [vmem:[%s14263_s4 + $0x110] sm:$0xff]   ;;  %v5811_v47 = vrot.slane %v13134_v23, 2 }
 0x4f8   : > { %10242 = vmatprep.mubr.bf16.mxu1 %v5478_v18  ;;  %v5807_v18 = vrot.slane %v13106_v40, 2 }
 0x4ff   : > { %10243 = vmatmul.mubr.bf16.gmra.mrb[68].mxu1 %v5480_v61  ;;  %v5808_v61 = vsel %vm1573_vm2, %v5805_v45, %v5807_v18  ;;  %v11424_v45 = vld [vmem:[%s14263_s4 + $0x118] sm:$0xff]  }
 0x500   : > { %10246 = vmatprep.mubr.bf16.mxu1 %v5482_v28  ;;  %v5810_v28 = vsel %vm1573_vm2, %v5807_v18, %v5809_v29  ;;  %v5815_v18 = vrot.slane %v12927_v21, 2 }
 0x507   : > { %10247 = vmatmul.mubr.bf16.gmra.mrb[72].mxu1 %v5484_v37  ;;  %v5812_v37 = vsel %vm1573_vm2, %v5809_v29, %v5811_v47  ;;  %v11426_v29 = vld [vmem:[%s14263_s4 + $0x128] sm:$0xff]  }
 0x508   : > { %10266 = vmatprep.mubr.bf16.mxu1 %v5806_v42  ;;  %v11425_v42 = vld [vmem:[%s14263_s4 + $0x120] sm:$0xff]  }
 0x50f   : > { %10267 = vmatmul.mubr.bf16.vlgmr.msra.gmra.mrb[36].mxu1 %v5808_v61  ;;  %v5816_v61 = vsel %vm1573_vm2, %v5813_v34, %v5815_v18 }
 0x510   : > { %10270 = vmatprep.mubr.bf16.mxu1 %v5810_v28  ;;  %10307 = vmatpush3.bf16.msra.mxu1 %v11421_v13  ;;  %v5814_v13 = vsel %vm1573_vm2, %v5811_v47, %v5813_v34  ;;  %v5819_v47 = vrot.slane %v12954_v20, 2  ;;  %v11428_v34 = vld [vmem:[%s14263_s4 + $0x138] sm:$0xff]  }
 0x511   : > { %10308 = vmatprep.subr.bf16.mxu1 %v11422_v50 }
 0x514   : > { %10309 = vmatpush3.bf16.msra.mxu1 %v11422_v50  ;;  %v5817_v50 = vrot.slane %v12947_v30, 2 }
 0x515   : > { %10310 = vmatprep.subr.bf16.mxu1 %v11423_v48 }
 0x516   : > { %v5818_v28 = vsel %vm1573_vm2, %v5815_v18, %v5817_v50  ;;  %v5823_v18 = vrot.slane %v12973_v0, 2 }
 0x517   : > { %10271 = vmatmul.mubr.bf16.gmra.mrb[40].mxu1 %v5812_v37  ;;  %v5820_v37 = vsel %vm1573_vm2, %v5817_v50, %v5819_v47 }
 0x518   : > { %10274 = vmatprep.mubr.bf16.mxu1 %v5814_v13  ;;  %10311 = vmatpush3.bf16.msra.mxu1 %v11423_v48  ;;  %v11427_v48 = vld [vmem:[%s14263_s4 + $0x130] sm:$0xff]  }
 0x519   : > { %10312 = vmatprep.subr.bf16.mxu1 %v11424_v45 }
 0x51c   : > { %10313 = vmatpush3.bf16.msra.mxu1 %v11424_v45  ;;  %v5821_v45 = vrot.slane %v12977_v56, 2 }
 0x51d   : > { %10314 = vmatprep.subr.bf16.mxu1 %v11425_v42 }
 0x51e   : > { %v5822_v13 = vsel %vm1573_vm2, %v5819_v47, %v5821_v45 }
 0x51f   : > { %10275 = vmatmul.mubr.bf16.gmra.mrb[44].mxu1 %v5816_v61  ;;  %v5824_v61 = vsel %vm1573_vm2, %v5821_v45, %v5823_v18 }
 0x520   : > { %10278 = vmatprep.mubr.bf16.mxu1 %v5818_v28  ;;  %10315 = vmatpush3.bf16.msra.mxu1 %v11425_v42  ;;  %v11429_v42 = vld [vmem:[%s14263_s4 + $0x140] sm:$0xff]   ;;  %v5827_v28 = vrot.slane %v13001_v10, 2 }
 0x521   : > { %10316 = vmatprep.subr.bf16.mxu1 %v11426_v29 }
 0x524   : > { %10317 = vmatpush3.bf16.msra.mxu1 %v11426_v29  ;;  %v5825_v29 = vrot.slane %v13003_v5, 2 }
 0x525   : > { %10318 = vmatprep.subr.bf16.mxu1 %v11427_v48 }
 0x526   : > { %v5826_v50 = vsel %vm1573_vm2, %v5823_v18, %v5825_v29  ;;  %v5828_v47 = vsel %vm1573_vm2, %v5825_v29, %v5827_v28 }
 0x527   : > { %10279 = vmatmul.mubr.bf16.gmra.mrb[48].mxu1 %v5820_v37 }
 0x528   : > { %10282 = vmatprep.mubr.bf16.mxu1 %v5822_v13  ;;  %10319 = vmatpush3.bf16.msra.mxu1 %v11427_v48  ;;  %v5829_v48 = vrot.slane %v13021_v9, 2  ;;  %v5831_v13 = vrot.slane %v13018_v63, 2 }
 0x529   : > { %10320 = vmatprep.subr.bf16.mxu1 %v11428_v34 }
 0x52a   : > { %v5830_v37 = vsel %vm1573_vm2, %v5827_v28, %v5829_v48  ;;  %v5832_v45 = vsel %vm1573_vm2, %v5829_v48, %v5831_v13 }
 0x52c   : > { %10321 = vmatpush3.bf16.msra.mxu1 %v11428_v34  ;;  %v5833_v34 = vrot.slane %v13037_v15, 2 }
 0x52d   : > { %10362 = vmatprep.subr.bf16.mxu1 %v11429_v42 }
 0x52e   : > { %v5834_v18 = vsel %vm1573_vm2, %v5831_v13, %v5833_v34 }
 0x52f   : > { %10283 = vmatmul.mubr.bf16.gmra.mrb[52].mxu1 %v5824_v61  ;;  %v5835_v61 = vrot.slane %v13040_v8, 2 }
 0x530   : > { %10286 = vmatprep.mubr.bf16.mxu1 %v5826_v50  ;;  %v5837_v50 = vrot.slane %v13053_v1, 2 }
 0x531   : > { %v5836_v29 = vsel %vm1573_vm2, %v5833_v34, %v5835_v61  ;;  %v5843_v34 = vrot.slane %v13066_v24, 2 }
 0x532   : > { %v5838_v28 = vsel %vm1573_vm2, %v5835_v61, %v5837_v50 }
 0x537   : > { %10287 = vmatmul.mubr.bf16.gmra.mrb[56].mxu1 %v5828_v47  ;;  %v5839_v47 = vrot.slane %v13056_v31, 2 }
 0x538   : > { %10290 = vmatprep.mubr.bf16.mxu1 %v5830_v37  ;;  %v5841_v37 = vrot.slane %v13064_v36, 2 }
 0x539   : > { %v5840_v48 = vsel %vm1573_vm2, %v5837_v50, %v5839_v47  ;;  %v14501_v50 = vor.u32 %v13252_v59, %v13248_v54  ;;  %v6182_v59 = vrot.slane %v13178_v39, 2 }
 0x53a   : > { %v5842_v13 = vsel %vm1573_vm2, %v5839_v47, %v5841_v37  ;;  %v5844_v61 = vsel %vm1573_vm2, %v5841_v37, %v5843_v34  ;;  %v11430_v37 = vld [vmem:[%s14263_s4 + $0x148] sm:$0xff]   ;;  %v6179_v34 = vrot.slane %v13153_v25, 3 }
 0x53f   : > { %10291 = vmatmul.mubr.bf16.gmra.mrb[60].mxu1 %v5832_v45  ;;  %v6166_v45 = vrot.slane %v13132_v62, 2 }
 0x540   : > { %10294 = vmatprep.mubr.bf16.mxu1 %v5834_v18  ;;  %v6167_v18 = vrot.slane %v13121_v6, 3 }
 0x547   : > { %10295 = vmatmul.mubr.bf16.gmra.mrb[64].mxu1 %v5836_v29  ;;  %v6168_v29 = vor.u32 %v6167_v18, %v6166_v45  ;;  %v6178_v18 = vrot.slane %v13175_v52, 2 }
 0x548   : > { %10298 = vmatprep.mubr.bf16.mxu1 %v5838_v28  ;;  %v6170_v28 = vrot.slane %v13147_v32, 2 }
 0x549   : > { %v6169_v47 = vsel %vm1979_vm3, %v14501_v50, %v6168_v29 }
 0x54f   : > { %10299 = vmatmul.mubr.bf16.gmra.mrb[68].mxu1 %v5840_v48  ;;  %v6174_v48 = vrot.slane %v13161_v57, 2 }
 0x550   : > { %10302 = vmatprep.mubr.bf16.mxu1 %v5842_v13  ;;  %v6172_v13 = vor.u32 %v6171_v55, %v6170_v28  ;;  %v6183_v55 = vrot.slane %v13164_v19, 3  ;;  %v11432_v28 = vld [vmem:[%s14263_s4 + $0x158] sm:$0xff]  }
 0x551   : > { %v6176_v7 = vor.u32 %v6175_v12, %v6174_v48  ;;  %v11431_v12 = vld [vmem:[%s14263_s4 + $0x150] sm:$0xff]  }
 0x552   : > { %v6173_v45 = vsel %vm1979_vm3, %v6168_v29, %v6172_v13  ;;  %v6184_v29 = vor.u32 %v6183_v55, %v6182_v59  ;;  %v6194_v59 = vrot.slane %v13234_v51, 2  ;;  %v6195_v55 = vrot.slane %v13202_v11, 3 }
 0x553   : > { %v6177_v54 = vsel %vm1979_vm3, %v6172_v13, %v6176_v7  ;;  %v6190_v13 = vrot.slane %v13199_v22, 2 }
 0x557   : > { %10303 = vmatmul.mubr.bf16.gmra.mrb[72].mxu1 %v5844_v61  ;;  %v6180_v61 = vor.u32 %v6179_v34, %v6178_v18  ;;  %v11434_v34 = vld [vmem:[%s14263_s4 + $0x168] sm:$0xff]  }
 0x558   : > { %10322 = vmatprep.mubr.bf16.mxu1 %v6169_v47  ;;  %v6187_v47 = vrot.slane %v13181_v46, 3 }
 0x559   : > { %v6181_v50 = vsel %vm1979_vm3, %v6176_v7, %v6180_v61  ;;  %v6185_v48 = vsel %vm1979_vm3, %v6180_v61, %v6184_v29  ;;  %v6198_v61 = vrot.slane %v13223_v2, 2 }
 0x55f   : > { %10323 = vmatmul.mubr.bf16.vlgmr.msra.gmra.mrb[36].mxu1 %v6173_v45  ;;  %v6191_v45 = vrot.slane %v13189_v4, 3 }
 0x560   : > { %10326 = vmatprep.mubr.bf16.mxu1 %v6177_v54  ;;  %10363 = vmatpush3.bf16.msra.mxu1 %v11429_v42  ;;  %v6186_v42 = vrot.slane %v13208_v27, 2 }
 0x561   : > { %10364 = vmatprep.subr.bf16.mxu1 %v11430_v37  ;;  %v6192_v7 = vor.u32 %v6191_v45, %v6190_v13  ;;  %v6202_v13 = vrot.slane %v13263_v16, 2  ;;  %v6203_v45 = vrot.slane %v13226_v26, 3 }
 0x562   : > { %v6188_v18 = vor.u32 %v6187_v47, %v6186_v42  ;;  %v6196_v42 = vor.u32 %v6195_v55, %v6194_v59  ;;  %v11436_v47 = vld [vmem:[%s14263_s4 + $0x178] sm:$0xff]  }
 0x564   : > { %10365 = vmatpush3.bf16.msra.mxu1 %v11430_v37  ;;  %v11433_v37 = vld [vmem:[%s14263_s4 + $0x160] sm:$0xff]   ;;  %v6189_v54 = vsel %vm1979_vm3, %v6184_v29, %v6188_v18 }
 0x565   : > { %10366 = vmatprep.subr.bf16.mxu1 %v11431_v12 }
 0x567   : > { %10327 = vmatmul.mubr.bf16.gmra.mrb[40].mxu1 %v6181_v50  ;;  %v6199_v50 = vrot.slane %v13212_v14, 3 }
 0x568   : > { %10330 = vmatprep.mubr.bf16.mxu1 %v6185_v48  ;;  %10367 = vmatpush3.bf16.msra.mxu1 %v11431_v12  ;;  %v6193_v12 = vsel %vm1979_vm3, %v6188_v18, %v6192_v7  ;;  %v6197_v48 = vsel %vm1979_vm3, %v6192_v7, %v6196_v42  ;;  %v6206_v18 = vrot.slane %v13255_v33, 2  ;;  %v6204_v7 = vor.u32 %v6203_v45, %v6202_v13 }
 0x569   : > { %10368 = vmatprep.subr.bf16.mxu1 %v11432_v28  ;;  %v6200_v29 = vor.u32 %v6199_v50, %v6198_v61  ;;  %v6211_v61 = vrot.slane %v13258_v49, 3  ;;  %v6218_v45 = vrot.slane %v13299_v17, 2  ;;  %v14505_v49 = vld [vmem:[#allocation23_spill] sm:$0xff] }
 0x56a   : > { %v14510_v17 = vld [vmem:[#allocation27_spill] sm:$0xff] }
 0x56b   : > { %v6205_v55 = vsel %vm1979_vm3, %v6200_v29, %v6204_v7 }
 0x56c   : > { %10369 = vmatpush3.bf16.msra.mxu1 %v11432_v28  ;;  %v11435_v28 = vld [vmem:[%s14263_s4 + $0x170] sm:$0xff]  }
 0x56d   : > { %10370 = vmatprep.subr.bf16.mxu1 %v11433_v37 }
 0x56f   : > { %10331 = vmatmul.mubr.bf16.gmra.mrb[44].mxu1 %v6189_v54  ;;  %v6207_v54 = vrot.slane %v13238_v38, 3 }
 0x570   : > { %10334 = vmatprep.mubr.bf16.mxu1 %v6193_v12  ;;  %10371 = vmatpush3.bf16.msra.mxu1 %v11433_v37  ;;  %v6201_v37 = vsel %vm1979_vm3, %v6196_v42, %v6200_v29  ;;  %v6210_v12 = vrot.slane %v13281_v43, 2  ;;  %v14506_v43 = vld [vmem:[#allocation18_spill] sm:$0xff] }
 0x571   : > { %10372 = vmatprep.subr.bf16.mxu1 %v11434_v34  ;;  %v6208_v59 = vor.u32 %v6207_v54, %v6206_v18  ;;  %v14504_v18 = vld [vmem:[#allocation14_spill] sm:$0xff] }
 0x572   : > { %v6212_v38 = vor.u32 %v6211_v61, %v6210_v12  ;;  %v6219_v29 = vrot.slane %v14504_v18, 3  ;;  %v14507_v12 = vld [vmem:[#allocation34_spill] sm:$0xff]  ;;  %v14509_v18 = vld [vmem:[#allocation32_spill] sm:$0xff] }
 0x573   : > { %v6209_v50 = vsel %vm1979_vm3, %v6204_v7, %v6208_v59  ;;  %v6223_v7 = vrot.slane %v14506_v43, 3  ;;  %v6226_v61 = vrot.slane %v14507_v12, 2 }
 0x574   : > { %10373 = vmatpush3.bf16.msra.mxu1 %v11434_v34  ;;  %v13587_v34 = vld [vmem:[%s14263_s4 + $0x180] sm:$0xff]  }
 0x575   : > { %10374 = vmatprep.subr.bf16.mxu1 %v11435_v28 }
 0x577   : > { %10335 = vmatmul.mubr.bf16.gmra.mrb[48].mxu1 %v6197_v48  ;;  %v14503_v48 = vld [vmem:[#allocation17_spill] sm:$0xff] }
 0x578   : > { %10338 = vmatprep.mubr.bf16.mxu1 %v6201_v37  ;;  %10375 = vmatpush3.bf16.msra.mxu1 %v11435_v28  ;;  %v14502_v28 = vld [vmem:[#allocation13_spill] sm:$0xff]  ;;  %v6215_v37 = vrot.slane %v14503_v48, 3 }
 0x579   : > { %10376 = vmatprep.subr.bf16.mxu1 %v11436_v47  ;;  %v6214_v42 = vrot.slane %v14502_v28, 2  ;;  %v6220_v28 = vor.u32 %v6219_v29, %v6218_v45  ;;  %v14511_v45 = vld [vmem:[#allocation2_spill] sm:$0xff] }
 0x57a   : > { %v6234_v29 = vrot.slane %v14511_v45, 2 }
 0x57b   : > { %v6216_v13 = vor.u32 %v6215_v37, %v6214_v42  ;;  %v14508_v42 = vld [vmem:[#allocation22_spill] sm:$0xff] }
 0x57c   : > { %10377 = vmatpush3.bf16.msra.mxu1 %v11436_v47  ;;  %v6213_v47 = vsel %vm1979_vm3, %v6208_v59, %v6212_v38  ;;  %v6227_v59 = vrot.slane %v14508_v42, 3 }
 0x57d   : > { %10418 = vmatprep.subr.bf16.mxu1 %v13587_v34  ;;  %v6217_v54 = vsel %vm1979_vm3, %v6212_v38, %v6216_v13  ;;  %v6231_v38 = vrot.slane %v14510_v17, 3 }
 0x57f   : > { %10339 = vmatmul.mubr.bf16.gmra.mrb[52].mxu1 %v6205_v55  ;;  %v6222_v55 = vrot.slane %v14505_v49, 2  ;;  %v6228_v49 = vor.u32 %v6227_v59, %v6226_v61  ;;  %v14515_v59 = vshrl.u32 %v13066_v24, 16 }
 0x580   : > { %10342 = vmatprep.mubr.bf16.mxu1 %v6209_v50  ;;  %v6221_v50 = vsel %vm1979_vm3, %v6216_v13, %v6220_v28 }
 0x581   : > { %v6224_v33 = vor.u32 %v6223_v7, %v6222_v55  ;;  %v14512_v55 = vld [vmem:[#allocation31_spill] sm:$0xff] }
 0x582   : > { %v6235_v13 = vrot.slane %v14512_v55, 3 }
 0x583   : > { %v6225_v37 = vsel %vm1979_vm3, %v6220_v28, %v6224_v33  ;;  %v14514_v28 = vld [vmem:[#allocation33_spill] sm:$0xff] }
 0x584   : > { %v6241_v12 = vrot.slane %v14514_v28, 3  ;;  %v6580_v28 = vrot.slane %v12923_v44, 3 }
 0x587   : > { %10343 = vmatmul.mubr.bf16.gmra.mrb[56].mxu1 %v6213_v47  ;;  %v6230_v47 = vrot.slane %v14509_v18, 2  ;;  %v6236_v18 = vor.u32 %v6235_v13, %v6234_v29 }
 0x588   : > { %10346 = vmatprep.mubr.bf16.mxu1 %v6217_v54  ;;  %v6229_v54 = vsel %vm1979_vm3, %v6224_v33, %v6228_v49  ;;  %v6247_v33 = vrot.slane %v14515_v59, 2 }
 0x589   : > { %v6232_v48 = vor.u32 %v6231_v38, %v6230_v47 }
 0x58b   : > { %v6233_v7 = vsel %vm1979_vm3, %v6228_v49, %v6232_v48  ;;  %v6237_v61 = vsel %vm1979_vm3, %v6232_v48, %v6236_v18 }
 0x58f   : > { %10347 = vmatmul.mubr.bf16.gmra.mrb[60].mxu1 %v6221_v50  ;;  %v14513_v50 = vshrl.u32 %v13064_v36, 16 }
 0x590   : > { %10350 = vmatprep.mubr.bf16.mxu1 %v6225_v37  ;;  %v14516_v37 = vshll.u32 %v13066_v24, 16 }
 0x591   : > { %v6240_v42 = vrot.slane %v14513_v50, 2  ;;  %v6571_v50 = vrot.slane %v13087_v60, 3  ;;  %v11439_v60 = vld [vmem:[%s14263_s4 + $0x190] sm:$0xff]  }
 0x592   : > { %v6250_v47 = vrot.slane %v14516_v37, 3  ;;  %v6582_v37 = vrot.slane %v12927_v21, 3 }
 0x593   : > { %v6242_v17 = vor.u32 %v6241_v12, %v6240_v42  ;;  %v6574_v12 = vrot.slane %v13106_v40, 3  ;;  %v6576_v42 = vrot.slane %v13139_v3, 3 }
 0x594   : > { %v6251_v49 = vor.u32 %v6250_v47, %v6247_v33  ;;  %v11441_v33 = vld [vmem:[%s14263_s4 + $0x1a0] sm:$0xff]   ;;  %v6584_v47 = vrot.slane %v12947_v30, 3 }
 0x595   : > { %v6243_v38 = vsel %vm1979_vm3, %v6236_v18, %v6242_v17  ;;  %v11438_v18 = vld [vmem:[%s14263_s4 + $0x188] sm:$0xff]  }
 0x596   : > { %v6252_v29 = vsel %vm1979_vm3, %v6242_v17, %v6251_v49  ;;  %v6578_v17 = vrot.slane %v13134_v23, 3  ;;  %v6583_v49 = vsel %vm2444_vm4, %v6580_v28, %v6582_v37 }
 0x597   : > { %10351 = vmatmul.mubr.bf16.gmra.mrb[64].mxu1 %v6229_v54  ;;  %v6572_v54 = vrot.slane %v13112_v35, 3 }
 0x598   : > { %10354 = vmatprep.mubr.bf16.mxu1 %v6233_v7  ;;  %v6577_v7 = vsel %vm2444_vm4, %v6574_v12, %v6576_v42  ;;  %v6579_v59 = vsel %vm2444_vm4, %v6576_v42, %v6578_v17 }
 0x599   : > { %v6573_v48 = vsel %vm2444_vm4, %v6571_v50, %v6572_v54  ;;  %v6575_v13 = vsel %vm2444_vm4, %v6572_v54, %v6574_v12  ;;  %v6585_v54 = vsel %vm2444_vm4, %v6582_v37, %v6584_v47  ;;  %v11443_v50 = vld [vmem:[%s14263_s4 + $0x1b0] sm:$0xff]   ;;  %v11444_v12 = vld [vmem:[%s14263_s4 + $0x1b8] sm:$0xff]   ;;  %v6598_v37 = vrot.slane %v13018_v63, 3 }
 0x59f   : > { %10355 = vmatmul.mubr.bf16.gmra.mrb[68].mxu1 %v6237_v61  ;;  %v11440_v61 = vld [vmem:[%s14263_s4 + $0x198] sm:$0xff]  }
 0x5a0   : > { %10358 = vmatprep.mubr.bf16.mxu1 %v6243_v38  ;;  %v11442_v38 = vld [vmem:[%s14263_s4 + $0x1a8] sm:$0xff]  }
 0x5a7   : > { %10359 = vmatmul.mubr.bf16.gmra.mrb[72].mxu1 %v6252_v29  ;;  %v6586_v29 = vrot.slane %v12954_v20, 3 }
 0x5a8   : > { %10378 = vmatprep.mubr.bf16.mxu1 %v6573_v48  ;;  %v6588_v48 = vrot.slane %v12977_v56, 3 }
 0x5a9   : > { %v6587_v42 = vsel %vm2444_vm4, %v6584_v47, %v6586_v29  ;;  %v6600_v47 = vrot.slane %v13037_v15, 3 }
 0x5af   : > { %10379 = vmatmul.mubr.bf16.vlgmr.msra.gmra.mrb[36].mxu1 %v6575_v13  ;;  %v11445_v13 = vld [vmem:[%s14263_s4 + $0x1c0] sm:$0xff]  }
 0x5b0   : > { %10382 = vmatprep.mubr.bf16.mxu1 %v6577_v7  ;;  %10419 = vmatpush3.bf16.msra.mxu1 %v13587_v34  ;;  %v6581_v34 = vsel %vm2444_vm4, %v6578_v17, %v6580_v28  ;;  %v6590_v7 = vrot.slane %v12973_v0, 3 }
 0x5b1   : > { %10420 = vmatprep.subr.bf16.mxu1 %v11438_v18 }
 0x5b2   : > { %v6591_v17 = vsel %vm2444_vm4, %v6588_v48, %v6590_v7 }
 0x5b4   : > { %10421 = vmatpush3.bf16.msra.mxu1 %v11438_v18  ;;  %v6589_v18 = vsel %vm2444_vm4, %v6586_v29, %v6588_v48 }
 0x5b5   : > { %10422 = vmatprep.subr.bf16.mxu1 %v11439_v60 }
 0x5b7   : > { %10383 = vmatmul.mubr.bf16.gmra.mrb[40].mxu1 %v6579_v59  ;;  %v6596_v59 = vrot.slane %v13021_v9, 3 }
 0x5b8   : > { %10386 = vmatprep.mubr.bf16.mxu1 %v6581_v34  ;;  %10423 = vmatpush3.bf16.msra.mxu1 %v11439_v60  ;;  %v6592_v60 = vrot.slane %v13003_v5, 3 }
 0x5b9   : > { %10424 = vmatprep.subr.bf16.mxu1 %v11440_v61 }
 0x5ba   : > { %v6593_v28 = vsel %vm2444_vm4, %v6590_v7, %v6592_v60 }
 0x5bc   : > { %10425 = vmatpush3.bf16.msra.mxu1 %v11440_v61  ;;  %v6594_v61 = vrot.slane %v13001_v10, 3 }
 0x5bd   : > { %10426 = vmatprep.subr.bf16.mxu1 %v11441_v33 }
 0x5be   : > { %v6595_v34 = vsel %vm2444_vm4, %v6592_v60, %v6594_v61  ;;  %v6610_v60 = vrot.slane %v13066_v24, 3 }
 0x5bf   : > { %10387 = vmatmul.mubr.bf16.gmra.mrb[44].mxu1 %v6583_v49  ;;  %v6601_v49 = vsel %vm2444_vm4, %v6598_v37, %v6600_v47 }
 0x5c0   : > { %10390 = vmatprep.mubr.bf16.mxu1 %v6585_v54  ;;  %10427 = vmatpush3.bf16.msra.mxu1 %v11441_v33  ;;  %v6597_v33 = vsel %vm2444_vm4, %v6594_v61, %v6596_v59  ;;  %v6602_v54 = vrot.slane %v13040_v8, 3 }
 0x5c1   : > { %10428 = vmatprep.subr.bf16.mxu1 %v11442_v38 }
 0x5c2   : > { %v6603_v29 = vsel %vm2444_vm4, %v6600_v47, %v6602_v54 }
 0x5c4   : > { %10429 = vmatpush3.bf16.msra.mxu1 %v11442_v38  ;;  %v6599_v38 = vsel %vm2444_vm4, %v6596_v59, %v6598_v37  ;;  %v11446_v37 = vld [vmem:[%s14263_s4 + $0x1c8] sm:$0xff]  }
 0x5c5   : > { %10430 = vmatprep.subr.bf16.mxu1 %v11443_v50 }
 0x5c7   : > { %10391 = vmatmul.mubr.bf16.gmra.mrb[48].mxu1 %v6587_v42  ;;  %v6608_v42 = vrot.slane %v13064_v36, 3 }
 0x5c8   : > { %10394 = vmatprep.mubr.bf16.mxu1 %v6589_v18  ;;  %10431 = vmatpush3.bf16.msra.mxu1 %v11443_v50  ;;  %v6604_v50 = vrot.slane %v13053_v1, 3 }
 0x5c9   : > { %10432 = vmatprep.subr.bf16.mxu1 %v11444_v12  ;;  %v6611_v61 = vsel %vm2444_vm4, %v6608_v42, %v6610_v60 }
 0x5ca   : > { %v6605_v48 = vsel %vm2444_vm4, %v6602_v54, %v6604_v50  ;;  %v6938_v54 = vrot.slane %v12923_v44, 4 }
 0x5cc   : > { %10433 = vmatpush3.bf16.msra.mxu1 %v11444_v12  ;;  %v6606_v12 = vrot.slane %v13056_v31, 3 }
 0x5cd   : > { %10474 = vmatprep.subr.bf16.mxu1 %v11445_v13 }
 0x5ce   : > { %v6607_v18 = vsel %vm2444_vm4, %v6604_v50, %v6606_v12  ;;  %v6609_v7 = vsel %vm2444_vm4, %v6606_v12, %v6608_v42  ;;  %v6940_v50 = vrot.slane %v12927_v21, 4  ;;  %v11449_v12 = vld [vmem:[%s14263_s4 + $0x1e0] sm:$0xff]   ;;  %v6942_v42 = vrot.slane %v12947_v30, 4 }
 0x5cf   : > { %10395 = vmatmul.mubr.bf16.gmra.mrb[52].mxu1 %v6591_v17  ;;  %v6931_v17 = vrot.slane %v13112_v35, 4 }
 0x5d0   : > { %10398 = vmatprep.mubr.bf16.mxu1 %v6593_v28  ;;  %v6932_v28 = vrot.slane %v13106_v40, 4  ;;  %v6943_v60 = vsel %vm2853_vm6, %v6940_v50, %v6942_v42 }
 0x5d2   : > { %v6933_v59 = vsel %vm2853_vm6, %v6931_v17, %v6932_v28 }
 0x5d7   : > { %10399 = vmatmul.mubr.bf16.gmra.mrb[56].mxu1 %v6595_v34  ;;  %v6934_v34 = vrot.slane %v13139_v3, 4 }
 0x5d8   : > { %10402 = vmatprep.mubr.bf16.mxu1 %v6597_v33  ;;  %v6936_v33 = vrot.slane %v13134_v23, 4 }
 0x5d9   : > { %v6935_v47 = vsel %vm2853_vm6, %v6932_v28, %v6934_v34  ;;  %v11451_v28 = vld [vmem:[%s14263_s4 + $0x1f0] sm:$0xff]  }
 0x5df   : > { %10403 = vmatmul.mubr.bf16.gmra.mrb[60].mxu1 %v6599_v38  ;;  %v6937_v38 = vsel %vm2853_vm6, %v6934_v34, %v6936_v33  ;;  %v11452_v34 = vld [vmem:[%s14263_s4 + $0x1f8] sm:$0xff]  }
 0x5e0   : > { %10406 = vmatprep.mubr.bf16.mxu1 %v6601_v49  ;;  %v11447_v49 = vld [vmem:[%s14263_s4 + $0x1d0] sm:$0xff]  }
 0x5e7   : > { %10407 = vmatmul.mubr.bf16.gmra.mrb[64].mxu1 %v6603_v29  ;;  %v11448_v29 = vld [vmem:[%s14263_s4 + $0x1d8] sm:$0xff]  }
 0x5e8   : > { %10410 = vmatprep.mubr.bf16.mxu1 %v6605_v48  ;;  %v6939_v48 = vsel %vm2853_vm6, %v6936_v33, %v6938_v54 }
 0x5ef   : > { %10411 = vmatmul.mubr.bf16.gmra.mrb[68].mxu1 %v6607_v18  ;;  %v6944_v18 = vrot.slane %v12954_v20, 4 }
 0x5f0   : > { %10414 = vmatprep.mubr.bf16.mxu1 %v6609_v7  ;;  %v11450_v7 = vld [vmem:[%s14263_s4 + $0x1e8] sm:$0xff]  }
 0x5f1   : > { %v6945_v17 = vsel %vm2853_vm6, %v6942_v42, %v6944_v18  ;;  %v6958_v42 = vrot.slane %v13037_v15, 4 }
 0x5f7   : > { %10415 = vmatmul.mubr.bf16.gmra.mrb[72].mxu1 %v6611_v61  ;;  %v6946_v61 = vrot.slane %v12977_v56, 4 }
 0x5f8   : > { %10434 = vmatprep.mubr.bf16.mxu1 %v6933_v59  ;;  %v6948_v59 = vrot.slane %v12973_v0, 4 }
 0x5f9   : > { %v6947_v33 = vsel %vm2853_vm6, %v6944_v18, %v6946_v61  ;;  %v6960_v18 = vrot.slane %v13040_v8, 4 }
 0x5ff   : > { %10435 = vmatmul.mubr.bf16.vlgmr.msra.gmra.mrb[36].mxu1 %v6935_v47  ;;  %v11453_v47 = vld [vmem:[%s14263_s4 + $0x200] sm:$0xff]  }
 0x600   : > { %10438 = vmatprep.mubr.bf16.mxu1 %v6937_v38  ;;  %10475 = vmatpush3.bf16.msra.mxu1 %v11445_v13  ;;  %v6941_v13 = vsel %vm2853_vm6, %v6938_v54, %v6940_v50  ;;  %v6950_v38 = vrot.slane %v13003_v5, 4 }
 0x601   : > { %10476 = vmatprep.subr.bf16.mxu1 %v11446_v37 }
 0x602   : > { %v6951_v54 = vsel %vm2853_vm6, %v6948_v59, %v6950_v38 }
 0x604   : > { %10477 = vmatpush3.bf16.msra.mxu1 %v11446_v37  ;;  %v6949_v37 = vsel %vm2853_vm6, %v6946_v61, %v6948_v59 }
 0x605   : > { %10478 = vmatprep.subr.bf16.mxu1 %v11447_v49 }
 0x607   : > { %10439 = vmatmul.mubr.bf16.gmra.mrb[40].mxu1 %v6939_v48  ;;  %v6956_v48 = vrot.slane %v13018_v63, 4 }
 0x608   : > { %10442 = vmatprep.mubr.bf16.mxu1 %v6941_v13  ;;  %10479 = vmatpush3.bf16.msra.mxu1 %v11447_v49  ;;  %v6952_v49 = vrot.slane %v13001_v10, 4 }
 0x609   : > { %10480 = vmatprep.subr.bf16.mxu1 %v11448_v29 }
 0x60a   : > { %v6953_v50 = vsel %vm2853_vm6, %v6950_v38, %v6952_v49  ;;  %v7290_v38 = vrot.slane %v13132_v62, 4  ;;  %v7298_v62 = vrot.slane %v13150_v41, 5 }
 0x60c   : > { %10481 = vmatpush3.bf16.msra.mxu1 %v11448_v29  ;;  %v6954_v29 = vrot.slane %v13021_v9, 4 }
 0x60d   : > { %10482 = vmatprep.subr.bf16.mxu1 %v11449_v12 }
 0x60e   : > { %v6955_v13 = vsel %vm2853_vm6, %v6952_v49, %v6954_v29 }
 0x60f   : > { %10443 = vmatmul.mubr.bf16.gmra.mrb[44].mxu1 %v6943_v60  ;;  %v6961_v60 = vsel %vm2853_vm6, %v6958_v42, %v6960_v18 }
 0x610   : > { %10446 = vmatprep.mubr.bf16.mxu1 %v6945_v17  ;;  %10483 = vmatpush3.bf16.msra.mxu1 %v11449_v12  ;;  %v6957_v12 = vsel %vm2853_vm6, %v6954_v29, %v6956_v48  ;;  %v6962_v17 = vrot.slane %v13053_v1, 4  ;;  %v7294_v29 = vrot.slane %v13126_v58, 5 }
 0x611   : > { %10484 = vmatprep.subr.bf16.mxu1 %v11450_v7 }
 0x612   : > { %v6963_v61 = vsel %vm2853_vm6, %v6960_v18, %v6962_v17  ;;  %v7297_v18 = vrot.slane %v13161_v57, 4  ;;  %v7305_v57 = vrot.slane %v13178_v39, 4  ;;  %v11456_v39 = vld [vmem:[%s14263_s4 + $0x218] sm:$0xff]  }
 0x614   : > { %10485 = vmatpush3.bf16.msra.mxu1 %v11450_v7  ;;  %v6959_v7 = vsel %vm2853_vm6, %v6956_v48, %v6958_v42  ;;  %v6970_v48 = vrot.slane %v13077_v53, 4  ;;  %v7299_v58 = vor.u32 %v7298_v62, %v7297_v18 }
 0x615   : > { %10486 = vmatprep.subr.bf16.mxu1 %v11451_v28 }
 0x617   : > { %10447 = vmatmul.mubr.bf16.gmra.mrb[48].mxu1 %v6947_v33  ;;  %v6968_v33 = vrot.slane %v13066_v24, 4 }
 0x618   : > { %10450 = vmatprep.mubr.bf16.mxu1 %v6949_v37  ;;  %10487 = vmatpush3.bf16.msra.mxu1 %v11451_v28  ;;  %v6964_v28 = vrot.slane %v13056_v31, 4 }
 0x619   : > { %10488 = vmatprep.subr.bf16.mxu1 %v11452_v34  ;;  %v6971_v42 = vsel %vm2853_vm6, %v6968_v33, %v6970_v48  ;;  %v7325_v48 = vrot.slane %v13263_v16, 4  ;;  %v14517_v16 = vld [vmem:[#allocation16_spill] sm:$0xff] }
 0x61a   : > { %v6965_v59 = vsel %vm2853_vm6, %v6962_v17, %v6964_v28  ;;  %v11454_v17 = vld [vmem:[%s14263_s4 + $0x208] sm:$0xff]   ;;  %v7329_v62 = vrot.slane %v14517_v16, 4  ;;  %v7358_v16 = vrot.slane %v14512_v55, 5  ;;  %v14532_v55 = vld [vmem:[#allocation25_spill] sm:$0xff] }
 0x61c   : > { %10489 = vmatpush3.bf16.msra.mxu1 %v11452_v34  ;;  %v6966_v34 = vrot.slane %v13064_v36, 4 }
 0x61d   : > { %10530 = vmatprep.subr.bf16.mxu1 %v11453_v47 }
 0x61e   : > { %v6967_v37 = vsel %vm2853_vm6, %v6964_v28, %v6966_v34  ;;  %v6969_v49 = vsel %vm2853_vm6, %v6966_v34, %v6968_v33 }
 0x61f   : > { %10451 = vmatmul.mubr.bf16.gmra.mrb[52].mxu1 %v6951_v54  ;;  %v7291_v54 = vrot.slane %v13121_v6, 5  ;;  %v7301_v6 = vrot.slane %v13175_v52, 4  ;;  %v7309_v52 = vrot.slane %v13208_v27, 4  ;;  %v7313_v27 = vrot.slane %v13199_v22, 4 }
 0x620   : > { %10454 = vmatprep.mubr.bf16.mxu1 %v6953_v50  ;;  %v7293_v50 = vrot.slane %v13147_v32, 4  ;;  %v7302_v32 = vrot.slane %v13153_v25, 5  ;;  %v7310_v25 = vrot.slane %v13181_v46, 5  ;;  %v7314_v46 = vrot.slane %v13189_v4, 5  ;;  %v11458_v4 = vld [vmem:[%s14263_s4 + $0x228] sm:$0xff]  }
 0x622   : > { %v7311_v33 = vor.u32 %v7310_v25, %v7309_v52  ;;  %v14522_v25 = vld [vmem:[#allocation17_spill] sm:$0xff] }
 0x627   : > { %10455 = vmatmul.mubr.bf16.gmra.mrb[56].mxu1 %v6955_v13  ;;  %v7292_v13 = vor.u32 %v7291_v54, %v7290_v38  ;;  %v7318_v38 = vrot.slane %v13202_v11, 5  ;;  %v7315_v54 = vor.u32 %v7314_v46, %v7313_v27  ;;  %v7322_v11 = vrot.slane %v13212_v14, 5  ;;  %v11460_v14 = vld [vmem:[%s14263_s4 + $0x238] sm:$0xff]  }
 0x628   : > { %10458 = vmatprep.mubr.bf16.mxu1 %v6957_v12  ;;  %v7295_v12 = vor.u32 %v7294_v29, %v7293_v50 }
 0x629   : > { %v7316_v22 = vsel %vm3261_vm7, %v7311_v33, %v7315_v54 }
 0x62a   : > { %v7300_v28 = vsel %vm3261_vm7, %v7295_v12, %v7299_v58 }
 0x62f   : > { %10459 = vmatmul.mubr.bf16.gmra.mrb[60].mxu1 %v6959_v7  ;;  %v7296_v7 = vsel %vm3261_vm7, %v7292_v13, %v7295_v12  ;;  %v7326_v13 = vrot.slane %v13226_v26, 5  ;;  %v11459_v12 = vld [vmem:[%s14263_s4 + $0x230] sm:$0xff]   ;;  %v14518_v26 = vld [vmem:[#allocation11_spill] sm:$0xff] }
 0x630   : > { %10462 = vmatprep.mubr.bf16.mxu1 %v6961_v60  ;;  %v7303_v60 = vor.u32 %v7302_v32, %v7301_v6  ;;  %v14519_v32 = vld [vmem:[#allocation19_spill] sm:$0xff] }
 0x631   : > { %v7327_v18 = vor.u32 %v7326_v13, %v7325_v48 }
 0x632   : > { %v7304_v41 = vsel %vm3261_vm7, %v7299_v58, %v7303_v60  ;;  %v7333_v58 = vrot.slane %v14519_v32, 4  ;;  %v14530_v32 = vld [vmem:[#allocation3_spill] sm:$0xff] }
 0x637   : > { %10463 = vmatmul.mubr.bf16.gmra.mrb[64].mxu1 %v6963_v61  ;;  %v7306_v61 = vrot.slane %v13164_v19, 5 }
 0x638   : > { %10466 = vmatprep.mubr.bf16.mxu1 %v6965_v59  ;;  %v11455_v59 = vld [vmem:[%s14263_s4 + $0x210] sm:$0xff]  }
 0x639   : > { %v7307_v34 = vor.u32 %v7306_v61, %v7305_v57  ;;  %v14521_v61 = vld [vmem:[#allocation13_spill] sm:$0xff] }
 0x63a   : > { %v7337_v52 = vrot.slane %v14521_v61, 4 }
 0x63b   : > { %v7308_v19 = vsel %vm3261_vm7, %v7303_v60, %v7307_v34  ;;  %v14520_v60 = vld [vmem:[#allocation12_spill] sm:$0xff] }
 0x63f   : > { %10467 = vmatmul.mubr.bf16.gmra.mrb[68].mxu1 %v6967_v37  ;;  %v7317_v37 = vrot.slane %v13234_v51, 4  ;;  %v7321_v51 = vrot.slane %v13223_v2, 4 }
 0x640   : > { %10470 = vmatprep.mubr.bf16.mxu1 %v6969_v49  ;;  %v11457_v49 = vld [vmem:[%s14263_s4 + $0x220] sm:$0xff]  }
 0x641   : > { %v7319_v50 = vor.u32 %v7318_v38, %v7317_v37  ;;  %v14525_v38 = vld [vmem:[#allocation23_spill] sm:$0xff] }
 0x643   : > { %v7320_v29 = vsel %vm3261_vm7, %v7315_v54, %v7319_v50  ;;  %v7346_v54 = vrot.slane %v14506_v43, 5  ;;  %v7357_v43 = vrot.slane %v14511_v45, 4  ;;  %v7697_v45 = vrot.slane %v13106_v40, 5 }
 0x647   : > { %10471 = vmatmul.mubr.bf16.gmra.mrb[72].mxu1 %v6971_v42  ;;  %v7323_v42 = vor.u32 %v7322_v11, %v7321_v51  ;;  %v14527_v51 = vld [vmem:[#allocation22_spill] sm:$0xff] }
 0x648   : > { %10490 = vmatprep.mubr.bf16.mxu1 %v7296_v7  ;;  %v7330_v7 = vrot.slane %v14518_v26, 5  ;;  %v7350_v11 = vrot.slane %v14527_v51, 5  ;;  %v7359_v26 = vor.u32 %v7358_v16, %v7357_v43  ;;  %v11461_v51 = vld [vmem:[%s11569_s8 + $0x38] sm:$0xff] }
 0x649   : > { %v7324_v2 = vsel %vm3261_vm7, %v7319_v50, %v7323_v42  ;;  %v7328_v6 = vsel %vm3261_vm7, %v7323_v42, %v7327_v18 }
 0x64f   : > { %10491 = vmatmul.mubr.bf16.vlgmr.msra.gmra.mrb[36].mxu1 %v7300_v28  ;;  %v7331_v28 = vor.u32 %v7330_v7, %v7329_v62 }
 0x650   : > { %10494 = vmatprep.mubr.bf16.mxu1 %v7304_v41  ;;  %10531 = vmatpush3.bf16.msra.mxu1 %v11453_v47  ;;  %v7312_v47 = vsel %vm3261_vm7, %v7307_v34, %v7311_v33  ;;  %v14523_v33 = vld [vmem:[#allocation28_spill] sm:$0xff] }
 0x651   : > { %10532 = vmatprep.subr.bf16.mxu1 %v11454_v17  ;;  %v7332_v41 = vsel %vm3261_vm7, %v7327_v18, %v7331_v28  ;;  %v14529_v18 = vld [vmem:[#allocation27_spill] sm:$0xff] }
 0x654   : > { %10533 = vmatpush3.bf16.msra.mxu1 %v11454_v17  ;;  %v7334_v17 = vrot.slane %v14520_v60, 5  ;;  %v14531_v60 = vld [vmem:[#allocation20_spill] sm:$0xff] }
 0x655   : > { %10534 = vmatprep.subr.bf16.mxu1 %v11455_v59 }
 0x656   : > { %v7335_v57 = vor.u32 %v7334_v17, %v7333_v58  ;;  %v7364_v58 = vsel %vm3261_vm7, %v7359_v26, %v14530_v32  ;;  %v7696_v17 = vrot.slane %v13112_v35, 5  ;;  %v7705_v35 = vrot.slane %v12927_v21, 5 }
 0x657   : > { %10495 = vmatmul.mubr.bf16.gmra.mrb[40].mxu1 %v7308_v19  ;;  %v14524_v19 = vld [vmem:[#allocation14_spill] sm:$0xff]  ;;  %v7713_v21 = vrot.slane %v12973_v0, 5  ;;  %v7721_v0 = vrot.slane %v13018_v63, 5  ;;  %v7729_v63 = vrot.slane %v13056_v31, 5  ;;  %v7735_v31 = vrot.slane %v13077_v53, 5 }
 0x658   : > { %10498 = vmatprep.mubr.bf16.mxu1 %v7312_v47  ;;  %10535 = vmatpush3.bf16.msra.mxu1 %v11455_v59  ;;  %v7338_v59 = vrot.slane %v14522_v25, 5  ;;  %v7336_v34 = vsel %vm3261_vm7, %v7331_v28, %v7335_v57  ;;  %v7342_v27 = vrot.slane %v14524_v19, 5  ;;  %v7698_v28 = vsel %vm3726_vm5, %v7696_v17, %v7697_v45 }
 0x659   : > { %10536 = vmatprep.subr.bf16.mxu1 %v11456_v39  ;;  %v7703_v25 = vrot.slane %v12923_v44, 5  ;;  %v7711_v44 = vrot.slane %v12977_v56, 5  ;;  %v7719_v56 = vrot.slane %v13021_v9, 5  ;;  %v7727_v9 = vrot.slane %v13053_v1, 5 }
 0x65a   : > { %v7339_v46 = vor.u32 %v7338_v59, %v7337_v52 }
 0x65b   : > { %v7706_v59 = vsel %vm3726_vm5, %v7703_v25, %v7705_v35  ;;  %v7714_v19 = vsel %vm3726_vm5, %v7711_v44, %v7713_v21 }
 0x65c   : > { %10537 = vmatpush3.bf16.msra.mxu1 %v11456_v39  ;;  %v7341_v39 = vrot.slane %v14523_v33, 4  ;;  %v7340_v37 = vsel %vm3261_vm7, %v7335_v57, %v7339_v46  ;;  %v7699_v57 = vrot.slane %v13139_v3, 5  ;;  %v7707_v3 = vrot.slane %v12947_v30, 5 }
 0x65d   : > { %10538 = vmatprep.subr.bf16.mxu1 %v11457_v49  ;;  %v7715_v30 = vrot.slane %v13003_v5, 5  ;;  %v7723_v5 = vrot.slane %v13037_v15, 5  ;;  %v7731_v15 = vrot.slane %v13064_v36, 5  ;;  %v13875_v36 = vld [vmem:[%s14264_s5] ss:$0 sm:$0xff] }
 0x65e   : > { %v7343_v47 = vor.u32 %v7342_v27, %v7341_v39  ;;  %v7700_v61 = vsel %vm3726_vm5, %v7697_v45, %v7699_v57 }
 0x65f   : > { %10499 = vmatmul.mubr.bf16.gmra.mrb[44].mxu1 %v7316_v22  ;;  %v7716_v27 = vsel %vm3726_vm5, %v7713_v21, %v7715_v30 }
 0x660   : > { %10502 = vmatprep.mubr.bf16.mxu1 %v7320_v29  ;;  %10539 = vmatpush3.bf16.msra.mxu1 %v11457_v49  ;;  %v7345_v49 = vrot.slane %v14525_v38, 4  ;;  %v7344_v50 = vsel %vm3261_vm7, %v7339_v46, %v7343_v47  ;;  %v7724_v38 = vsel %vm3726_vm5, %v7721_v0, %v7723_v5 }
 0x661   : > { %10540 = vmatprep.subr.bf16.mxu1 %v11458_v4 }
 0x662   : > { %v7347_v29 = vor.u32 %v7346_v54, %v7345_v49 }
 0x664   : > { %10541 = vmatpush3.bf16.msra.mxu1 %v11458_v4  ;;  %v14526_v4 = vld [vmem:[#allocation34_spill] sm:$0xff]  ;;  %v7348_v13 = vsel %vm3261_vm7, %v7343_v47, %v7347_v29 }
 0x665   : > { %10542 = vmatprep.subr.bf16.mxu1 %v11459_v12  ;;  %v7349_v22 = vrot.slane %v14526_v4, 4  ;;  %v7732_v4 = vsel %vm3726_vm5, %v7729_v63, %v7731_v15 }
 0x667   : > { %10503 = vmatmul.mubr.bf16.gmra.mrb[48].mxu1 %v7324_v2  ;;  %v7351_v48 = vor.u32 %v7350_v11, %v7349_v22  ;;  %v11462_v11 = vld [vmem:[%s11569_s8 + $0x40] sm:$0xff] }
 0x668   : > { %10506 = vmatprep.mubr.bf16.mxu1 %v7328_v6  ;;  %10543 = vmatpush3.bf16.msra.mxu1 %v11459_v12  ;;  %v14528_v12 = vld [vmem:[#allocation32_spill] sm:$0xff] }
 0x669   : > { %10544 = vmatprep.subr.bf16.mxu1 %v11460_v14  ;;  %v7353_v42 = vrot.slane %v14528_v12, 4  ;;  %v7352_v2 = vsel %vm3261_vm7, %v7347_v29, %v7351_v48  ;;  %v8180_v29 = vrot.slane %v11462_v11, 2  ;;  %v11464_v12 = vld [vmem:[%s11569_s8 + $0x30] sm:$0xff] }
 0x66c   : > { %10545 = vmatpush3.bf16.msra.mxu1 %v11460_v14  ;;  %v7354_v14 = vrot.slane %v14529_v18, 5  ;;  %v13884_v18 = vld [vmem:[%s14264_s5 + $0x1] ss:$0 sm:$0xff] }
 0x66e   : > { %v7355_v62 = vor.u32 %v7354_v14, %v7353_v42  ;;  %v8176_v42 = vrot.slane %v11464_v12, 2  ;;  %v11465_v14 = vld [vmem:[%s11569_s8 + $0x48] sm:$0xff] }
 0x66f   : > { %10507 = vmatmul.mubr.bf16.gmra.mrb[52].mxu1 %v7332_v41  ;;  %v7701_v41 = vrot.slane %v13134_v23, 5  ;;  %v7709_v23 = vrot.slane %v12954_v20, 5  ;;  %v7717_v20 = vrot.slane %v13001_v10, 5  ;;  %v7725_v10 = vrot.slane %v13040_v8, 5 }
 0x670   : > { %10510 = vmatprep.mubr.bf16.mxu1 %v7336_v34  ;;  %v7356_v7 = vsel %vm3261_vm7, %v7351_v48, %v7355_v62  ;;  %v7360_v6 = vsel %vm3261_vm7, %v7355_v62, %v7359_v26  ;;  %v7708_v34 = vsel %vm3726_vm5, %v7705_v35, %v7707_v3  ;;  %v7733_v8 = vrot.slane %v13066_v24, 5  ;;  %v11463_v48 = vld [vmem:[%s11569_s8 + $0x28] sm:$0xff]  ;;  %v13889_v62 = vld [vmem:[%s11569_s8 + $0x58] sm:$0xff] }
 0x671   : > { %v7702_v52 = vsel %vm3726_vm5, %v7699_v57, %v7701_v41  ;;  %v7704_v40 = vsel %vm3726_vm5, %v7701_v41, %v7703_v25  ;;  %v7710_v33 = vsel %vm3726_vm5, %v7707_v3, %v7709_v23  ;;  %v7712_v39 = vsel %vm3726_vm5, %v7709_v23, %v7711_v44  ;;  %v11468_v23 = vld [vmem:[%s11569_s8 + $0x50] sm:$0xff] }
 0x672   : > { %v7718_v46 = vsel %vm3726_vm5, %v7715_v30, %v7717_v20  ;;  %v7720_v47 = vsel %vm3726_vm5, %v7717_v20, %v7719_v56  ;;  %v7726_v49 = vsel %vm3726_vm5, %v7723_v5, %v7725_v10  ;;  %v7728_v54 = vsel %vm3726_vm5, %v7725_v10, %v7727_v9 }
 0x673   : > { %v7734_v1 = vsel %vm3726_vm5, %v7731_v15, %v7733_v8  ;;  %v7736_v22 = vsel %vm3726_vm5, %v7733_v8, %v7735_v31  ;;  %v8178_v24 = vrot.slane %v11461_v51, 2  ;;  %v8186_v26 = vrot.slane %v13889_v62, 2  ;;  %v13952_v62 = vld [vmem:[%s11569_s8 + $0x98] sm:$0xff] }
 0x675   : > { %v8181_v32 = vsel %vm1573_vm2, %v8178_v24, %v8180_v29  ;;  %v8179_v35 = vsel %vm1573_vm2, %v8176_v42, %v8178_v24 }
 0x677   : > { %10511 = vmatmul.mubr.bf16.gmra.mrb[56].mxu1 %v7340_v37  ;;  %v7722_v37 = vsel %vm3726_vm5, %v7719_v56, %v7721_v0  ;;  %v13921_v56 = vld [vmem:[%s11569_s8 + $0x80] sm:$0xff] }
 0x678   : > { %10514 = vmatprep.mubr.bf16.mxu1 %v7344_v50  ;;  %v7730_v50 = vsel %vm3726_vm5, %v7727_v9, %v7729_v63  ;;  %v8196_v0 = vrot.slane %v13921_v56, 2 }
 0x67f   : > { %10515 = vmatmul.mubr.bf16.gmra.mrb[60].mxu1 %v7348_v13  ;;  %v8175_v13 = vrot.slane %v11463_v48, 2 }
 0x680   : > { %10518 = vmatprep.mubr.bf16.mxu1 %v7352_v2  ;;  %v8182_v2 = vrot.slane %v11465_v14, 2  ;;  %v13948_v14 = vld [vmem:[%s11569_s8 + $0x88] sm:$0xff] }
 0x681   : > { %v8177_v45 = vsel %vm1573_vm2, %v8175_v13, %v8176_v42  ;;  %v11472_v42 = vld [vmem:[%s11569_s8 + $0x70] sm:$0xff] }
 0x682   : > { %v8183_v41 = vsel %vm1573_vm2, %v8180_v29, %v8182_v2 }
 0x687   : > { %10519 = vmatmul.mubr.bf16.gmra.mrb[64].mxu1 %v7356_v7  ;;  %v11467_v7 = vld [vmem:[%s11569_s8 + $0x60] sm:$0xff] }
 0x688   : > { %10522 = vmatprep.mubr.bf16.mxu1 %v7360_v6  ;;  %v8188_v6 = vrot.slane %v11467_v7, 2 }
 0x68f   : > { %10523 = vmatmul.mubr.bf16.gmra.mrb[68].mxu1 %v7364_v58 }
 0x690   : > { %10526 = vmatprep.mubr.bf16.mxu1 %v14531_v60 }
 0x697   : > { %10527 = vmatmul.mubr.bf16.gmra.mrb[72].mxu1 %v14532_v55 }
 0x698   : > { %10546 = vmatprep.mubr.bf16.mxu1 %v7698_v28 }
 0x69f   : > { %10547 = vmatmul.mubr.bf16.vlgmr.msra.gmra.mrb[36].mxu1 %v7700_v61 }
 0x6a0   : > { %10550 = vmatprep.mubr.bf16.mxu1 %v7702_v52 }
 0x6a7   : > { %10551 = vmatmul.mubr.bf16.gmra.mrb[40].mxu1 %v7704_v40  ;;  %v8189_v40 = vsel %vm1573_vm2, %v8186_v26, %v8188_v6 }
 0x6a8   : > { %10554 = vmatprep.mubr.bf16.mxu1 %v7706_v59 }
 0x6af   : > { %10555 = vmatmul.mubr.bf16.gmra.mrb[44].mxu1 %v7708_v34  ;;  %v8184_v34 = vrot.slane %v11468_v23, 2 }
 0x6b0   : > { %10558 = vmatprep.mubr.bf16.mxu1 %v7710_v33  ;;  %v13908_v33 = vld [vmem:[%s11569_s8 + $0x68] sm:$0xff] }
 0x6b1   : > { %v8190_v44 = vrot.slane %v13908_v33, 2  ;;  %v8185_v15 = vsel %vm1573_vm2, %v8182_v2, %v8184_v34  ;;  %v8187_v29 = vsel %vm1573_vm2, %v8184_v34, %v8186_v26  ;;  %v8198_v2 = vrot.slane %v13948_v14, 2 }
 0x6b2   : > { %v8202_v26 = vrot.slane %v13952_v62, 2 }
 0x6b7   : > { %10559 = vmatmul.mubr.bf16.gmra.mrb[48].mxu1 %v7712_v39 }
 0x6b8   : > { %10562 = vmatprep.mubr.bf16.mxu1 %v7714_v19  ;;  %v13917_v19 = vld [vmem:[%s11569_s8 + $0x78] sm:$0xff] }
 0x6b9   : > { %v8194_v30 = vrot.slane %v13917_v19, 2 }
 0x6bb   : > { %v8197_v48 = vsel %vm1573_vm2, %v8194_v30, %v8196_v0 }
 0x6bf   : > { %10563 = vmatmul.mubr.bf16.gmra.mrb[52].mxu1 %v7716_v27 }
 0x6c0   : > { %10566 = vmatprep.mubr.bf16.mxu1 %v7718_v46 }
 0x6c7   : > { %10567 = vmatmul.mubr.bf16.gmra.mrb[56].mxu1 %v7720_v47 }
 0x6c8   : > { %10570 = vmatprep.mubr.bf16.mxu1 %v7722_v37 }
 0x6cf   : > { %10571 = vmatmul.mubr.bf16.gmra.mrb[60].mxu1 %v7724_v38 }
 0x6d0   : > { %10574 = vmatprep.mubr.bf16.mxu1 %v7726_v49 }
 0x6d7   : > { %10575 = vmatmul.mubr.bf16.gmra.mrb[64].mxu1 %v7728_v54 }
 0x6d8   : > { %10578 = vmatprep.mubr.bf16.mxu1 %v7730_v50 }
 0x6df   : > { %10579 = vmatmul.mubr.bf16.gmra.mrb[68].mxu1 %v7732_v4 }
 0x6e0   : > { %10582 = vmatprep.mubr.bf16.mxu1 %v7734_v1 }
 0x6e7   : > { %10583 = vmatmul.mubr.bf16.gmra.mrb[72].mxu1 %v7736_v22  ;;  %v8191_v22 = vsel %vm1573_vm2, %v8188_v6, %v8190_v44 }
 0x772   : > { %v10548_v53 = vpop.f32.mrb[36].mxu1 }
 0x773   : > { %v8047_v43 = vmul.f32 %v10548_v53, %v13875_v36  ;;  %v7839_v16 = vpop.f32.mrb[37].mxu1  ;;  %v8192_v53 = vrot.slane %v11472_v42, 2 }
 0x774   : > { %v8045_v58 = vmul.f32 %v13875_v36, %v7839_v16  ;;  %v10549_v60 = vpop.f32.mrb[38].mxu1 }
 0x775   : > { %v8095_v17 = vadd.f32 %v13884_v18, %v8047_v43  ;;  %v8048_v55 = vmul.f32 %v10549_v60, %v13875_v36  ;;  %v7842_v28 = vpop.f32.mrb[39].mxu1 }
 0x776   : > { %v8093_v57 = vadd.f32 %v13884_v18, %v8045_v58  ;;  %v8046_v61 = vmul.f32 %v13875_v36, %v7842_v28  ;;  %v13956_v58 = vld [vmem:[%s11569_s8 + $0xa0] sm:$0xff] }
 0x777   : > { %v8298_v52 = vadd.f32 %v8181_v32, %v8095_v17  ;;  %v8096_v25 = vadd.f32 %v13884_v18, %v8048_v55  ;;  %v8204_v60 = vrot.slane %v13956_v58, 2 }
 0x778   : > { %v8296_v59 = vadd.f32 %v8177_v45, %v8093_v57  ;;  %v8094_v3 = vadd.f32 %v13884_v18, %v8046_v61 }
 0x779   : > { %vm8338_vm0 = vcmp.gt.f32.partialorder %v8298_v52, 0.0  ;;  %v8378_v21 = vmul.f32 0.2, %v8298_v52  ;;  %v8299_v39 = vadd.f32 %v8183_v41, %v8096_v25 }
 0x77a   : > { %vm8336_vm1 = vcmp.gt.f32.partialorder %v8296_v59, 0.0  ;;  %v8376_v20 = vmul.f32 0.2, %v8296_v59  ;;  %v8297_v27 = vadd.f32 %v8179_v35, %v8094_v3  ;;  %v10552_v46 = vpop.f32.mrb[40].mxu1 }
 0x77b   : > { %v8418_v47 = vsel %vm8338_vm0, %v8298_v52, %v8378_v21  ;;  %vm8339_vm3 = vcmp.gt.f32.partialorder %v8299_v39, 0.0  ;;  %v8379_v37 = vmul.f32 0.2, %v8299_v39  ;;  %v8051_v5 = vmul.f32 %v10552_v46, %v13875_v36  ;;  %v7855_v10 = vpop.f32.mrb[41].mxu1 }
 0x77c   : > { %8458 = vst [vmem:[%s13914_s15 + $0x10] sm:$0xff] %v8418_v47  ;;  %v8416_v38 = vsel %vm8336_vm1, %v8296_v59, %v8376_v20  ;;  %vm8337_vm4 = vcmp.gt.f32.partialorder %v8297_v27, 0.0  ;;  %v8377_v49 = vmul.f32 0.2, %v8297_v27  ;;  %v8049_v9 = vmul.f32 %v13875_v36, %v7855_v10  ;;  %v10553_v63 = vpop.f32.mrb[42].mxu1  ;;  %v13993_v10 = vld [vmem:[%s11569_s8 + $0xb8] sm:$0xff] }
 0x77d   : > { %8456 = vst [vmem:[%s13914_s15] sm:$0xff] %v8416_v38  ;;  %v8419_v54 = vsel %vm8339_vm3, %v8299_v39, %v8379_v37  ;;  %v8099_v50 = vadd.f32 %v13884_v18, %v8051_v5  ;;  %v8052_v8 = vmul.f32 %v10553_v63, %v13875_v36  ;;  %v7858_v4 = vpop.f32.mrb[43].mxu1  ;;  %v8199_v21 = vsel %vm1573_vm2, %v8196_v0, %v8198_v2  ;;  %v11476_v0 = vld [vmem:[%s11569_s8 + $0x90] sm:$0xff]  ;;  %v13989_v37 = vld [vmem:[%s11569_s8 + $0xa8] sm:$0xff] }
 0x77e   : > { %8459 = vst [vmem:[%s13914_s15 + $0x18] sm:$0xff] %v8419_v54  ;;  %v8417_v1 = vsel %vm8337_vm4, %v8297_v27, %v8377_v49  ;;  %v8097_v31 = vadd.f32 %v13884_v18, %v8049_v9  ;;  %v8050_v51 = vmul.f32 %v13875_v36, %v7858_v4  ;;  %v8195_v20 = vsel %vm1573_vm2, %v8192_v53, %v8194_v30  ;;  %v13997_v54 = vld [vmem:[%s11569_s8 + $0xc0] sm:$0xff] }
 0x77f   : > { %8457 = vst [vmem:[%s13914_s15 + $0x8] sm:$0xff] %v8417_v1  ;;  %v8302_v24 = vadd.f32 %v8189_v40, %v8099_v50  ;;  %v8100_v11 = vadd.f32 %v13884_v18, %v8052_v8  ;;  %v8193_v40 = vsel %vm1573_vm2, %v8190_v44, %v8192_v53  ;;  %v8205_v27 = vsel %vm1573_vm2, %v8202_v26, %v8204_v60 }
 0x780   : > { %v8300_v13 = vadd.f32 %v8185_v15, %v8097_v31  ;;  %v8098_v12 = vadd.f32 %v13884_v18, %v8050_v51  ;;  %v8200_v47 = vrot.slane %v11476_v0, 2  ;;  %v8206_v5 = vrot.slane %v13989_v37, 2 }
 0x781   : > { %vm8342_vm5 = vcmp.gt.f32.partialorder %v8302_v24, 0.0  ;;  %v8382_v43 = vmul.f32 0.2, %v8302_v24  ;;  %v8303_v16 = vadd.f32 %v8191_v22, %v8100_v11  ;;  %v8210_v38 = vrot.slane %v13993_v10, 2 }
 0x782   : > { %vm8340_vm6 = vcmp.gt.f32.partialorder %v8300_v13, 0.0  ;;  %v8380_v7 = vmul.f32 0.2, %v8300_v13  ;;  %v8301_v6 = vadd.f32 %v8187_v29, %v8098_v12  ;;  %v10556_v32 = vpop.f32.mrb[44].mxu1  ;;  %v8212_v50 = vrot.slane %v13997_v54, 2 }
 0x783   : > { %v8422_v17 = vsel %vm8342_vm5, %v8302_v24, %v8382_v43  ;;  %vm8343_vm7 = vcmp.gt.f32.partialorder %v8303_v16, 0.0  ;;  %v8383_v45 = vmul.f32 0.2, %v8303_v16  ;;  %v8055_v55 = vmul.f32 %v10556_v32, %v13875_v36  ;;  %v7871_v28 = vpop.f32.mrb[45].mxu1 }
 0x784   : > { %8462 = vst [vmem:[%s13914_s15 + $0x30] sm:$0xff] %v8422_v17  ;;  %v8420_v57 = vsel %vm8340_vm6, %v8300_v13, %v8380_v7  ;;  %vm8341_vm14 = vcmp.gt.f32.partialorder %v8301_v6, 0.0  ;;  %v8381_v41 = vmul.f32 0.2, %v8301_v6  ;;  %v8053_v61 = vmul.f32 %v13875_v36, %v7871_v28  ;;  %v10557_v52 = vpop.f32.mrb[46].mxu1  ;;  %v14034_v28 = vld [vmem:[%s11569_s8 + $0xd8] sm:$0xff] }
 0x785   : > { %8460 = vst [vmem:[%s13914_s15 + $0x20] sm:$0xff] %v8420_v57  ;;  %v8423_v25 = vsel %vm8343_vm7, %v8303_v16, %v8383_v45  ;;  %v8103_v35 = vadd.f32 %v13884_v18, %v8055_v55  ;;  %v8056_v59 = vmul.f32 %v10557_v52, %v13875_v36  ;;  %v7874_v3 = vpop.f32.mrb[47].mxu1  ;;  %v8207_v43 = vsel %vm1573_vm2, %v8204_v60, %v8206_v5  ;;  %v11480_v60 = vld [vmem:[%s11569_s8 + $0xb0] sm:$0xff]  ;;  %v14030_v45 = vld [vmem:[%s11569_s8 + $0xc8] sm:$0xff] }
 0x786   : > { %8463 = vst [vmem:[%s13914_s15 + $0x38] sm:$0xff] %v8423_v25  ;;  %v8421_v23 = vsel %vm8341_vm14, %v8301_v6, %v8381_v41  ;;  %v8101_v34 = vadd.f32 %v13884_v18, %v8053_v61  ;;  %v8054_v33 = vmul.f32 %v13875_v36, %v7874_v3  ;;  %v8203_v7 = vsel %vm1573_vm2, %v8200_v47, %v8202_v26  ;;  %v14038_v25 = vld [vmem:[%s11569_s8 + $0xe0] sm:$0xff] }
 0x787   : > { %8461 = vst [vmem:[%s13914_s15 + $0x28] sm:$0xff] %v8421_v23  ;;  %v8306_v39 = vadd.f32 %v8197_v48, %v8103_v35  ;;  %v8104_v44 = vadd.f32 %v13884_v18, %v8056_v59  ;;  %v8201_v48 = vsel %vm1573_vm2, %v8198_v2, %v8200_v47  ;;  %v8213_v6 = vsel %vm1573_vm2, %v8210_v38, %v8212_v50 }
 0x788   : > { %v8304_v46 = vadd.f32 %v8193_v40, %v8101_v34  ;;  %v8102_v56 = vadd.f32 %v13884_v18, %v8054_v33  ;;  %v8208_v17 = vrot.slane %v11480_v60, 2  ;;  %v8214_v55 = vrot.slane %v14030_v45, 2 }
 0x789   : > { %vm8346_vm15 = vcmp.gt.f32.partialorder %v8306_v39, 0.0  ;;  %v8386_v19 = vmul.f32 0.2, %v8306_v39  ;;  %v8307_v30 = vadd.f32 %v8199_v21, %v8104_v44  ;;  %v8218_v57 = vrot.slane %v14034_v28, 2 }
 0x78a   : > { %vm8344_vm8 = vcmp.gt.f32.partialorder %v8304_v46, 0.0  ;;  %v8384_v49 = vmul.f32 0.2, %v8304_v46  ;;  %v8305_v9 = vadd.f32 %v8195_v20, %v8102_v56  ;;  %v10560_v63 = vpop.f32.mrb[48].mxu1  ;;  %v8220_v35 = vrot.slane %v14038_v25, 2 }
 0x78b   : > { %v8426_v15 = vsel %vm8346_vm15, %v8306_v39, %v8386_v19  ;;  %vm8347_vm9 = vcmp.gt.f32.partialorder %v8307_v30, 0.0  ;;  %v8387_v8 = vmul.f32 0.2, %v8307_v30  ;;  %v8059_v4 = vmul.f32 %v10560_v63, %v13875_v36  ;;  %v7887_v1 = vpop.f32.mrb[49].mxu1 }
 0x78c   : > { %8466 = vst [vmem:[%s13914_s15 + $0x50] sm:$0xff] %v8426_v15  ;;  %v8424_v31 = vsel %vm8344_vm8, %v8304_v46, %v8384_v49  ;;  %vm8345_vm10 = vcmp.gt.f32.partialorder %v8305_v9, 0.0  ;;  %v8385_v22 = vmul.f32 0.2, %v8305_v9  ;;  %v8057_v51 = vmul.f32 %v13875_v36, %v7887_v1  ;;  %v10561_v24 = vpop.f32.mrb[50].mxu1  ;;  %v14075_v1 = vld [vmem:[%s11569_s8 + $0xf8] sm:$0xff] }
 0x78d   : > { %8464 = vst [vmem:[%s13914_s15 + $0x40] sm:$0xff] %v8424_v31  ;;  %v8427_v11 = vsel %vm8347_vm9, %v8307_v30, %v8387_v8  ;;  %v8107_v29 = vadd.f32 %v13884_v18, %v8059_v4  ;;  %v8060_v13 = vmul.f32 %v10561_v24, %v13875_v36  ;;  %v7890_v12 = vpop.f32.mrb[51].mxu1  ;;  %v8215_v19 = vsel %vm1573_vm2, %v8212_v50, %v8214_v55  ;;  %v11484_v50 = vld [vmem:[%s11569_s8 + $0xd0] sm:$0xff]  ;;  %v14071_v8 = vld [vmem:[%s11569_s8 + $0xe8] sm:$0xff] }
 0x78e   : > { %8467 = vst [vmem:[%s13914_s15 + $0x58] sm:$0xff] %v8427_v11  ;;  %v8425_v42 = vsel %vm8345_vm10, %v8305_v9, %v8385_v22  ;;  %v8105_v53 = vadd.f32 %v13884_v18, %v8057_v51  ;;  %v8058_v14 = vmul.f32 %v13875_v36, %v7890_v12  ;;  %v8211_v49 = vsel %vm1573_vm2, %v8208_v17, %v8210_v38  ;;  %v14079_v11 = vld [vmem:[%s11569_s8 + $0x100] sm:$0xff] }
 0x78f   : > { %8465 = vst [vmem:[%s13914_s15 + $0x48] sm:$0xff] %v8425_v42  ;;  %v8310_v16 = vadd.f32 %v8205_v27, %v8107_v29  ;;  %v8108_v2 = vadd.f32 %v13884_v18, %v8060_v13  ;;  %v8209_v27 = vsel %vm1573_vm2, %v8206_v5, %v8208_v17  ;;  %v8221_v9 = vsel %vm1573_vm2, %v8218_v57, %v8220_v35 }
 0x790   : > { %v8308_v32 = vadd.f32 %v8201_v48, %v8105_v53  ;;  %v8106_v58 = vadd.f32 %v13884_v18, %v8058_v14  ;;  %v8216_v15 = vrot.slane %v11484_v50, 2  ;;  %v8222_v4 = vrot.slane %v14071_v8, 2 }
 0x791   : > { %vm8350_vm11 = vcmp.gt.f32.partialorder %v8310_v16, 0.0  ;;  %v8390_v62 = vmul.f32 0.2, %v8310_v16  ;;  %v8311_v26 = vadd.f32 %v8207_v43, %v8108_v2  ;;  %v8226_v31 = vrot.slane %v14075_v1, 2 }
 0x792   : > { %vm8348_vm12 = vcmp.gt.f32.partialorder %v8308_v32, 0.0  ;;  %v8388_v41 = vmul.f32 0.2, %v8308_v32  ;;  %v8309_v61 = vadd.f32 %v8203_v7, %v8106_v58  ;;  %v10564_v52 = vpop.f32.mrb[52].mxu1  ;;  %v8228_v29 = vrot.slane %v14079_v11, 2 }
 0x793   : > { %v8430_v40 = vsel %vm8350_vm11, %v8310_v16, %v8390_v62  ;;  %vm8351_vm13 = vcmp.gt.f32.partialorder %v8311_v26, 0.0  ;;  %v8391_v59 = vmul.f32 0.2, %v8311_v26  ;;  %v8063_v3 = vmul.f32 %v10564_v52, %v13875_v36  ;;  %v7903_v23 = vpop.f32.mrb[53].mxu1 }
 0x794   : > { %8470 = vst [vmem:[%s13914_s15 + $0x70] sm:$0xff] %v8430_v40  ;;  %v8428_v34 = vsel %vm8348_vm12, %v8308_v32, %v8388_v41  ;;  %vm8349_vm0 = vcmp.gt.f32.partialorder %v8309_v61, 0.0  ;;  %v8389_v21 = vmul.f32 0.2, %v8309_v61  ;;  %v8061_v33 = vmul.f32 %v13875_v36, %v7903_v23  ;;  %v10565_v39 = vpop.f32.mrb[54].mxu1  ;;  %v14116_v23 = vld [vmem:[%s11569_s8 + $0x118] sm:$0xff] }
 0x795   : > { %8468 = vst [vmem:[%s13914_s15 + $0x60] sm:$0xff] %v8428_v34  ;;  %v8431_v44 = vsel %vm8351_vm13, %v8311_v26, %v8391_v59  ;;  %v8111_v20 = vadd.f32 %v13884_v18, %v8063_v3  ;;  %v8064_v46 = vmul.f32 %v10565_v39, %v13875_v36  ;;  %v7906_v56 = vpop.f32.mrb[55].mxu1  ;;  %v8223_v62 = vsel %vm1573_vm2, %v8220_v35, %v8222_v4  ;;  %v11488_v35 = vld [vmem:[%s11569_s8 + $0xf0] sm:$0xff]  ;;  %v14112_v59 = vld [vmem:[%s11569_s8 + $0x108] sm:$0xff] }
 0x796   : > { %8471 = vst [vmem:[%s13914_s15 + $0x78] sm:$0xff] %v8431_v44  ;;  %v8429_v0 = vsel %vm8349_vm0, %v8309_v61, %v8389_v21  ;;  %v8109_v47 = vadd.f32 %v13884_v18, %v8061_v33  ;;  %v8062_v37 = vmul.f32 %v13875_v36, %v7906_v56  ;;  %v8219_v41 = vsel %vm1573_vm2, %v8216_v15, %v8218_v57  ;;  %v14120_v44 = vld [vmem:[%s11569_s8 + $0x120] sm:$0xff] }
 0x797   : > { %8469 = vst [vmem:[%s13914_s15 + $0x68] sm:$0xff] %v8429_v0  ;;  %v8314_v30 = vadd.f32 %v8213_v6, %v8111_v20  ;;  %v8112_v5 = vadd.f32 %v13884_v18, %v8064_v46  ;;  %v8217_v6 = vsel %vm1573_vm2, %v8214_v55, %v8216_v15  ;;  %v8229_v61 = vsel %vm1573_vm2, %v8226_v31, %v8228_v29 }
 0x798   : > { %v8312_v63 = vadd.f32 %v8209_v27, %v8109_v47  ;;  %v8110_v54 = vadd.f32 %v13884_v18, %v8062_v37  ;;  %v8224_v40 = vrot.slane %v11488_v35, 2  ;;  %v8230_v3 = vrot.slane %v14112_v59, 2 }
 0x799   : > { %vm8354_vm1 = vcmp.gt.f32.partialorder %v8314_v30, 0.0  ;;  %v8394_v10 = vmul.f32 0.2, %v8314_v30  ;;  %v8315_v38 = vadd.f32 %v8215_v19, %v8112_v5  ;;  %v8234_v34 = vrot.slane %v14116_v23, 2 }
 0x79a   : > { %vm8352_vm3 = vcmp.gt.f32.partialorder %v8312_v63, 0.0  ;;  %v8392_v22 = vmul.f32 0.2, %v8312_v63  ;;  %v8313_v51 = vadd.f32 %v8211_v49, %v8110_v54  ;;  %v10568_v24 = vpop.f32.mrb[56].mxu1  ;;  %v8236_v20 = vrot.slane %v14120_v44, 2 }
 0x79b   : > { %v8434_v48 = vsel %vm8354_vm1, %v8314_v30, %v8394_v10  ;;  %vm8355_vm4 = vcmp.gt.f32.partialorder %v8315_v38, 0.0  ;;  %v8395_v13 = vmul.f32 0.2, %v8315_v38  ;;  %v8067_v12 = vmul.f32 %v10568_v24, %v13875_v36  ;;  %v7919_v42 = vpop.f32.mrb[57].mxu1 }
 0x79c   : > { %8474 = vst [vmem:[%s13914_s15 + $0x90] sm:$0xff] %v8434_v48  ;;  %v8432_v53 = vsel %vm8352_vm3, %v8312_v63, %v8392_v22  ;;  %vm8353_vm5 = vcmp.gt.f32.partialorder %v8313_v51, 0.0  ;;  %v8393_v43 = vmul.f32 0.2, %v8313_v51  ;;  %v8065_v14 = vmul.f32 %v13875_v36, %v7919_v42  ;;  %v10569_v16 = vpop.f32.mrb[58].mxu1  ;;  %v14157_v42 = vld [vmem:[%s11569_s8 + $0x138] sm:$0xff] }
 0x79d   : > { %8472 = vst [vmem:[%s13914_s15 + $0x80] sm:$0xff] %v8432_v53  ;;  %v8435_v2 = vsel %vm8355_vm4, %v8315_v38, %v8395_v13  ;;  %v8115_v7 = vadd.f32 %v13884_v18, %v8067_v12  ;;  %v8068_v32 = vmul.f32 %v10569_v16, %v13875_v36  ;;  %v7922_v58 = vpop.f32.mrb[59].mxu1  ;;  %v8231_v10 = vsel %vm1573_vm2, %v8228_v29, %v8230_v3  ;;  %v11492_v29 = vld [vmem:[%s11569_s8 + $0x110] sm:$0xff]  ;;  %v14153_v13 = vld [vmem:[%s11569_s8 + $0x128] sm:$0xff] }
 0x79e   : > { %8475 = vst [vmem:[%s13914_s15 + $0x98] sm:$0xff] %v8435_v2  ;;  %v8433_v60 = vsel %vm8353_vm5, %v8313_v51, %v8393_v43  ;;  %v8113_v17 = vadd.f32 %v13884_v18, %v8065_v14  ;;  %v8066_v45 = vmul.f32 %v13875_v36, %v7922_v58  ;;  %v8227_v22 = vsel %vm1573_vm2, %v8224_v40, %v8226_v31  ;;  %v14161_v2 = vld [vmem:[%s11569_s8 + $0x140] sm:$0xff] }
 0x79f   : > { %8473 = vst [vmem:[%s13914_s15 + $0x88] sm:$0xff] %v8433_v60  ;;  %v8318_v26 = vadd.f32 %v8221_v9, %v8115_v7  ;;  %v8116_v55 = vadd.f32 %v13884_v18, %v8068_v32  ;;  %v8225_v9 = vsel %vm1573_vm2, %v8222_v4, %v8224_v40  ;;  %v8237_v51 = vsel %vm1573_vm2, %v8234_v34, %v8236_v20 }
 0x7a0   : > { %v8316_v52 = vadd.f32 %v8217_v6, %v8113_v17  ;;  %v8114_v25 = vadd.f32 %v13884_v18, %v8066_v45  ;;  %v8232_v48 = vrot.slane %v11492_v29, 2  ;;  %v8238_v12 = vrot.slane %v14153_v13, 2 }
 0x7a1   : > { %vm8358_vm6 = vcmp.gt.f32.partialorder %v8318_v26, 0.0  ;;  %v8398_v28 = vmul.f32 0.2, %v8318_v26  ;;  %v8319_v57 = vadd.f32 %v8223_v62, %v8116_v55  ;;  %v8242_v53 = vrot.slane %v14157_v42, 2 }
 0x7a2   : > { %vm8356_vm7 = vcmp.gt.f32.partialorder %v8316_v52, 0.0  ;;  %v8396_v21 = vmul.f32 0.2, %v8316_v52  ;;  %v8317_v33 = vadd.f32 %v8219_v41, %v8114_v25  ;;  %v10572_v39 = vpop.f32.mrb[60].mxu1  ;;  %v8244_v7 = vrot.slane %v14161_v2, 2 }
 0x7a3   : > { %v8438_v27 = vsel %vm8358_vm6, %v8318_v26, %v8398_v28  ;;  %vm8359_vm14 = vcmp.gt.f32.partialorder %v8319_v57, 0.0  ;;  %v8399_v46 = vmul.f32 0.2, %v8319_v57  ;;  %v8071_v56 = vmul.f32 %v10572_v39, %v13875_v36  ;;  %v7935_v0 = vpop.f32.mrb[61].mxu1 }
 0x7a4   : > { %8478 = vst [vmem:[%s13914_s15 + $0xb0] sm:$0xff] %v8438_v27  ;;  %v8436_v47 = vsel %vm8356_vm7, %v8316_v52, %v8396_v21  ;;  %vm8357_vm15 = vcmp.gt.f32.partialorder %v8317_v33, 0.0  ;;  %v8397_v19 = vmul.f32 0.2, %v8317_v33  ;;  %v8069_v37 = vmul.f32 %v13875_v36, %v7935_v0  ;;  %v10573_v30 = vpop.f32.mrb[62].mxu1  ;;  %v14198_v0 = vld [vmem:[%s11569_s8 + $0x158] sm:$0xff] }
 0x7a5   : > { %8476 = vst [vmem:[%s13914_s15 + $0xa0] sm:$0xff] %v8436_v47  ;;  %v8439_v5 = vsel %vm8359_vm14, %v8319_v57, %v8399_v46  ;;  %v8119_v49 = vadd.f32 %v13884_v18, %v8071_v56  ;;  %v8072_v63 = vmul.f32 %v10573_v30, %v13875_v36  ;;  %v7938_v54 = vpop.f32.mrb[63].mxu1  ;;  %v8239_v28 = vsel %vm1573_vm2, %v8236_v20, %v8238_v12  ;;  %v11496_v20 = vld [vmem:[%s11569_s8 + $0x130] sm:$0xff]  ;;  %v14194_v46 = vld [vmem:[%s11569_s8 + $0x148] sm:$0xff] }
 0x7a6   : > { %8479 = vst [vmem:[%s13914_s15 + $0xb8] sm:$0xff] %v8439_v5  ;;  %v8437_v50 = vsel %vm8357_vm15, %v8317_v33, %v8397_v19  ;;  %v8117_v15 = vadd.f32 %v13884_v18, %v8069_v37  ;;  %v8070_v8 = vmul.f32 %v13875_v36, %v7938_v54  ;;  %v8235_v21 = vsel %vm1573_vm2, %v8232_v48, %v8234_v34  ;;  %v14202_v5 = vld [vmem:[%s11569_s8 + $0x160] sm:$0xff] }
 0x7a7   : > { %8477 = vst [vmem:[%s13914_s15 + $0xa8] sm:$0xff] %v8437_v50  ;;  %v8322_v38 = vadd.f32 %v8229_v61, %v8119_v49  ;;  %v8120_v4 = vadd.f32 %v13884_v18, %v8072_v63  ;;  %v8233_v61 = vsel %vm1573_vm2, %v8230_v3, %v8232_v48  ;;  %v8245_v33 = vsel %vm1573_vm2, %v8242_v53, %v8244_v7 }
 0x7a8   : > { %v8320_v24 = vadd.f32 %v8225_v9, %v8117_v15  ;;  %v8118_v11 = vadd.f32 %v13884_v18, %v8070_v8  ;;  %v8240_v27 = vrot.slane %v11496_v20, 2  ;;  %v8246_v56 = vrot.slane %v14194_v46, 2 }
 0x7a9   : > { %vm8362_vm8 = vcmp.gt.f32.partialorder %v8322_v38, 0.0  ;;  %v8402_v1 = vmul.f32 0.2, %v8322_v38  ;;  %v8323_v31 = vadd.f32 %v8231_v10, %v8120_v4  ;;  %v8250_v47 = vrot.slane %v14198_v0, 2 }
 0x7aa   : > { %vm8360_vm9 = vcmp.gt.f32.partialorder %v8320_v24, 0.0  ;;  %v8400_v43 = vmul.f32 0.2, %v8320_v24  ;;  %v8321_v14 = vadd.f32 %v8227_v22, %v8118_v11  ;;  %v10576_v16 = vpop.f32.mrb[64].mxu1  ;;  %v8252_v49 = vrot.slane %v14202_v5, 2 }
 0x7ab   : > { %v8442_v6 = vsel %vm8362_vm8, %v8322_v38, %v8402_v1  ;;  %vm8363_vm10 = vcmp.gt.f32.partialorder %v8323_v31, 0.0  ;;  %v8403_v32 = vmul.f32 0.2, %v8323_v31  ;;  %v8075_v58 = vmul.f32 %v10576_v16, %v13875_v36  ;;  %v7951_v60 = vpop.f32.mrb[65].mxu1 }
 0x7ac   : > { %8482 = vst [vmem:[%s13914_s15 + $0xd0] sm:$0xff] %v8442_v6  ;;  %v8440_v17 = vsel %vm8360_vm9, %v8320_v24, %v8400_v43  ;;  %vm8361_vm11 = vcmp.gt.f32.partialorder %v8321_v14, 0.0  ;;  %v8401_v62 = vmul.f32 0.2, %v8321_v14  ;;  %v8073_v45 = vmul.f32 %v13875_v36, %v7951_v60  ;;  %v10577_v26 = vpop.f32.mrb[66].mxu1 }
 0x7ad   : > { %8480 = vst [vmem:[%s13914_s15 + $0xc0] sm:$0xff] %v8440_v17  ;;  %v8443_v55 = vsel %vm8363_vm10, %v8323_v31, %v8403_v32  ;;  %v8123_v41 = vadd.f32 %v13884_v18, %v8075_v58  ;;  %v8076_v52 = vmul.f32 %v10577_v26, %v13875_v36  ;;  %v7954_v25 = vpop.f32.mrb[67].mxu1  ;;  %v8247_v1 = vsel %vm1573_vm2, %v8244_v7, %v8246_v56  ;;  %v11500_v32 = vld [vmem:[%s11569_s8 + $0x150] sm:$0xff] }
 0x7ae   : > { %8483 = vst [vmem:[%s13914_s15 + $0xd8] sm:$0xff] %v8443_v55  ;;  %v8441_v35 = vsel %vm8361_vm11, %v8321_v14, %v8401_v62  ;;  %v8121_v40 = vadd.f32 %v13884_v18, %v8073_v45  ;;  %v8074_v59 = vmul.f32 %v13875_v36, %v7954_v25  ;;  %v8243_v43 = vsel %vm1573_vm2, %v8240_v27, %v8242_v53  ;;  %v11501_v62 = vld [vmem:[%s11569_s8 + $0x168] sm:$0xff] }
 0x7af   : > { %8481 = vst [vmem:[%s13914_s15 + $0xc8] sm:$0xff] %v8441_v35  ;;  %v8326_v57 = vadd.f32 %v8237_v51, %v8123_v41  ;;  %v8124_v3 = vadd.f32 %v13884_v18, %v8076_v52  ;;  %v8241_v51 = vsel %vm1573_vm2, %v8238_v12, %v8240_v27  ;;  %v8253_v2 = vsel %vm1573_vm2, %v8250_v47, %v8252_v49 }
 0x7b0   : > { %v8324_v39 = vadd.f32 %v8233_v61, %v8121_v40  ;;  %v8122_v44 = vadd.f32 %v13884_v18, %v8074_v59  ;;  %v8248_v58 = vrot.slane %v11500_v32, 2  ;;  %v8254_v53 = vrot.slane %v11501_v62, 2 }
 0x7b1   : > { %vm8366_vm12 = vcmp.gt.f32.partialorder %v8326_v57, 0.0  ;;  %v8406_v23 = vmul.f32 0.2, %v8326_v57  ;;  %v8327_v34 = vadd.f32 %v8239_v28, %v8124_v3 }
 0x7b2   : > { %vm8364_vm13 = vcmp.gt.f32.partialorder %v8324_v39, 0.0  ;;  %v8404_v19 = vmul.f32 0.2, %v8324_v39  ;;  %v8325_v37 = vadd.f32 %v8235_v21, %v8122_v44  ;;  %v10580_v30 = vpop.f32.mrb[68].mxu1  ;;  %v8249_v59 = vsel %vm1573_vm2, %v8246_v56, %v8248_v58 }
 0x7b3   : > { %v8446_v9 = vsel %vm8366_vm12, %v8326_v57, %v8406_v23  ;;  %vm8367_vm0 = vcmp.gt.f32.partialorder %v8327_v34, 0.0  ;;  %v8407_v63 = vmul.f32 0.2, %v8327_v34  ;;  %v8079_v54 = vmul.f32 %v10580_v30, %v13875_v36  ;;  %v7967_v50 = vpop.f32.mrb[69].mxu1 }
 0x7b4   : > { %8486 = vst [vmem:[%s13914_s15 + $0xf0] sm:$0xff] %v8446_v9  ;;  %v8444_v15 = vsel %vm8364_vm13, %v8324_v39, %v8404_v19  ;;  %vm8365_vm1 = vcmp.gt.f32.partialorder %v8325_v37, 0.0  ;;  %v8405_v10 = vmul.f32 0.2, %v8325_v37  ;;  %v8077_v8 = vmul.f32 %v13875_v36, %v7967_v50  ;;  %v10581_v38 = vpop.f32.mrb[70].mxu1 }
 0x7b5   : > { %8484 = vst [vmem:[%s13914_s15 + $0xe0] sm:$0xff] %v8444_v15  ;;  %v8447_v4 = vsel %vm8367_vm0, %v8327_v34, %v8407_v63  ;;  %v8127_v22 = vadd.f32 %v13884_v18, %v8079_v54  ;;  %v8080_v24 = vmul.f32 %v10581_v38, %v13875_v36  ;;  %v7970_v11 = vpop.f32.mrb[71].mxu1  ;;  %v8255_v39 = vsel %vm1573_vm2, %v8252_v49, %v8254_v53 }
 0x7b6   : > { %8487 = vst [vmem:[%s13914_s15 + $0xf8] sm:$0xff] %v8447_v4  ;;  %v8445_v29 = vsel %vm8365_vm1, %v8325_v37, %v8405_v10  ;;  %v8125_v48 = vadd.f32 %v13884_v18, %v8077_v8  ;;  %v8078_v31 = vmul.f32 %v13875_v36, %v7970_v11  ;;  %v8251_v46 = vsel %vm1573_vm2, %v8248_v58, %v8250_v47 }
 0x7b7   : > { %8485 = vst [vmem:[%s13914_s15 + $0xe8] sm:$0xff] %v8445_v29  ;;  %v8330_v13 = vadd.f32 %v8245_v33, %v8127_v22  ;;  %v8128_v12 = vadd.f32 %v13884_v18, %v8080_v24 }
 0x7b8   : > { %v8328_v14 = vadd.f32 %v8241_v51, %v8125_v48  ;;  %v8126_v16 = vadd.f32 %v13884_v18, %v8078_v31 }
 0x7b9   : > { %vm8370_vm3 = vcmp.gt.f32.partialorder %v8330_v13, 0.0  ;;  %v8410_v7 = vmul.f32 0.2, %v8330_v13  ;;  %v8331_v6 = vadd.f32 %v8247_v1, %v8128_v12 }
 0x7ba   : > { %vm8368_vm4 = vcmp.gt.f32.partialorder %v8328_v14, 0.0  ;;  %v8408_v60 = vmul.f32 0.2, %v8328_v14  ;;  %v8329_v17 = vadd.f32 %v8243_v43, %v8126_v16  ;;  %v10584_v42 = vpop.f32.mrb[72].mxu1 }
 0x7bb   : > { %v8450_v45 = vsel %vm8370_vm3, %v8330_v13, %v8410_v7  ;;  %vm8371_vm5 = vcmp.gt.f32.partialorder %v8331_v6, 0.0  ;;  %v8411_v26 = vmul.f32 0.2, %v8331_v6  ;;  %v8083_v55 = vmul.f32 %v10584_v42, %v13875_v36  ;;  %v7983_v41 = vpop.f32.mrb[73].mxu1 }
 0x7bc   : > { %8490 = vst [vmem:[%s13914_s15 + $0x110] sm:$0xff] %v8450_v45  ;;  %v8448_v61 = vsel %vm8368_vm4, %v8328_v14, %v8408_v60  ;;  %vm8369_vm6 = vcmp.gt.f32.partialorder %v8329_v17, 0.0  ;;  %v8409_v52 = vmul.f32 0.2, %v8329_v17  ;;  %v8081_v25 = vmul.f32 %v13875_v36, %v7983_v41  ;;  %v10585_v35 = vpop.f32.mrb[74].mxu1 }
 0x7bd   : > { %8488 = vst [vmem:[%s13914_s15 + $0x100] sm:$0xff] %v8448_v61  ;;  %v8451_v40 = vsel %vm8371_vm5, %v8331_v6, %v8411_v26  ;;  %v8131_v28 = vadd.f32 %v13884_v18, %v8083_v55  ;;  %v8084_v57 = vmul.f32 %v10585_v35, %v13875_v36  ;;  %v7986_v3 = vpop.f32.mrb[75].mxu1 }
 0x7be   : > { %8491 = vst [vmem:[%s13914_s15 + $0x118] sm:$0xff] %v8451_v40  ;;  %v8449_v21 = vsel %vm8369_vm6, %v8329_v17, %v8409_v52  ;;  %v8129_v33 = vadd.f32 %v13884_v18, %v8081_v25  ;;  %v8082_v44 = vmul.f32 %v13875_v36, %v7986_v3 }
 0x7bf   : > { %8489 = vst [vmem:[%s13914_s15 + $0x108] sm:$0xff] %v8449_v21  ;;  %v8334_v20 = vadd.f32 %v8253_v2, %v8131_v28  ;;  %v8132_v27 = vadd.f32 %v13884_v18, %v8084_v57 }
 0x7c0   : > { %v8332_v56 = vadd.f32 %v8249_v59, %v8129_v33  ;;  %v8130_v23 = vadd.f32 %v13884_v18, %v8082_v44 }
 0x7c1   : > { %vm8374_vm7 = vcmp.gt.f32.partialorder %v8334_v20, 0.0  ;;  %v8414_v34 = vmul.f32 0.2, %v8334_v20  ;;  %v8335_v19 = vadd.f32 %v8255_v39, %v8132_v27 }
 0x7c2   : > { %vm8372_vm14 = vcmp.gt.f32.partialorder %v8332_v56, 0.0  ;;  %v8412_v36 = vmul.f32 0.2, %v8332_v56  ;;  %v8333_v37 = vadd.f32 %v8251_v46, %v8130_v23 }
 0x7c3   : > { %v8454_v30 = vsel %vm8374_vm7, %v8334_v20, %v8414_v34  ;;  %vm8375_vm15 = vcmp.gt.f32.partialorder %v8335_v19, 0.0  ;;  %v8415_v5 = vmul.f32 0.2, %v8335_v19 }
 0x7c4   : > { %8494 = vst [vmem:[%s13914_s15 + $0x130] sm:$0xff] %v8454_v30  ;;  %v8452_v49 = vsel %vm8372_vm14, %v8332_v56, %v8412_v36  ;;  %vm8373_vm8 = vcmp.gt.f32.partialorder %v8333_v37, 0.0  ;;  %v8413_v0 = vmul.f32 0.2, %v8333_v37 }
 0x7c5   : > { %8492 = vst [vmem:[%s13914_s15 + $0x120] sm:$0xff] %v8452_v49  ;;  %v8455_v47 = vsel %vm8375_vm15, %v8335_v19, %v8415_v5 }
 0x7c6   : > { %8495 = vst [vmem:[%s13914_s15 + $0x138] sm:$0xff] %v8455_v47  ;;  %v8453_v9 = vsel %vm8373_vm8, %v8333_v37, %v8413_v0 }
 0x7c7   : > { %8493 = vst [vmem:[%s13914_s15 + $0x128] sm:$0xff] %v8453_v9 }
 0x7c8 PF: > { %s16_s21 = sadd.s32 1, %s11508_s21  }
 0x7c9   : > { %p13_p4 = scmp.ge.s32.totalorder %s16_s21, 4  }
 0x7cb   :  { %15 = sbr.rel (!%p13_p4) target bundleno = 1 (0x1), region = 92 }

</bundles_post_ra>
